<compile_context>
chip_gen: v7x
topology: tpu7x:2x2x1
jax: 0.10.0
libtpu: 0.0.40
codegen_flags: <defaults>
</compile_context>

<pallas_src>
import functools

import jax
import jax.numpy as jnp
import numpy as np
from jax import lax
from jax.experimental import pallas as pl
from jax.experimental.pallas import tpu as pltpu


# ---------------------------------------------------------------------------
# In-kernel helper: 3x3 patch matrix from a zero-padded VMEM scratch.
# pad_ref: (G, H+2, W+2, C) ref with the image at offset (1,1) and zero border.
# Returns (G, H, W, 9*C); tap order along the channel axis is kh*3 + kw.
# ---------------------------------------------------------------------------
def _patch9(pad_ref, H, W):
    taps = [pad_ref[:, pl.ds(kh, H), pl.ds(kw, W), :]
            for kh in range(3) for kw in range(3)]
    return jnp.concatenate(taps, axis=-1)


# ---------------------------------------------------------------------------
# Fused decoder kernel (one group of G images per grid step).
# ---------------------------------------------------------------------------
def _decoder_kernel(x_ref, w1_ref, b1_ref, w2_ref, b2_ref,
                    w3_ref, b3_ref, w4_ref, b4_ref, o_ref,
                    pad_s, pad4_s, *, blocks, G, H, W, C, Cmid, Cout):
    M = G * H * W
    pad_s[...] = jnp.zeros_like(pad_s)
    pad4_s[...] = jnp.zeros_like(pad4_s)

    x = x_ref[...].astype(jnp.float32)                           # (G,H,W,C)

    # ---- ResBlock stack: x = x + Conv1x1(ReLU(Conv3x3(ReLU(x)))) ----------
    # (Python unroll: blocks is small here.  For many blocks switch to
    #  lax.fori_loop with w1_ref[b] dynamic indexing to bound live ranges.)
    for b in range(blocks):
        pad_s[:, pl.ds(1, H), pl.ds(1, W), :] = jnp.maximum(x, 0.0)
        patch = _patch9(pad_s, H, W).reshape(M, 9 * C)
        h = jnp.dot(patch, w1_ref[b], preferred_element_type=jnp.float32)
        h = jnp.maximum(h + b1_ref[b], 0.0)
        h = jnp.dot(h, w2_ref[b], preferred_element_type=jnp.float32) + b2_ref[b]
        x = x + h.reshape(G, H, W, C)

    # ---- deconv3: ConvTranspose2d(C -> Cmid, k=4, s=2, p=1) ----------------
    # All 4 sub-pixel phases in one matmul; y columns ordered (r, s, cmid).
    #   y[g, p*W+q, (2r+s)*Cmid+c] = deconv3_out[g, 2p+r, 2q+s, c]
    pad_s[:, pl.ds(1, H), pl.ds(1, W), :] = x
    patch = _patch9(pad_s, H, W).reshape(M, 9 * C)
    y = jnp.dot(patch, w3_ref[...], preferred_element_type=jnp.float32) + b3_ref[...]

    # ---- deconv4: ConvTranspose2d(Cmid -> Cout, k=4, s=2, p=1) -------------
    # Applied directly in deconv3's phase space (no (2H,2W) interleave).  The
    # phase tensor is padded by one *half*-row/col on each side; the composed
    # weight w4_ref selects the right (tap, phase) slices.
    pad4_s[:, pl.ds(1, H), pl.ds(1, W), :] = y.reshape(G, H, W, 4 * Cmid)
    patch = _patch9(pad4_s, H, W).reshape(M, 36 * Cmid)
    out = jnp.dot(patch, w4_ref[...], preferred_element_type=jnp.float32) + b4_ref[...]
    # out columns ordered (R=2*r1+r2, S=2*s1+s2, cout):
    #   out[g, p*W+q, (4R+S)*Cout+c] = decoder_out[g, 4p+R, 4q+S, c]
    o_ref[...] = out.reshape(G, H, W, 16 * Cout).astype(o_ref.dtype)


# ---------------------------------------------------------------------------
# Grid-step sizing: pack rows toward the MXU M dim but keep >=2 grid steps
# ("parallel") so both v7x TensorCores are used.
# ---------------------------------------------------------------------------
def _pick_images_per_step(n, rows_per_image):
    best = 1
    for g in range(1, n + 1):
        if n % g or g * rows_per_image > 256:
            continue
        if n >= 2 and n // g < 2:
            continue
        best = g
    return best


# ---------------------------------------------------------------------------
# Decoder forward (mirrors the PyTorch module; input/output are NCHW).
# ---------------------------------------------------------------------------
def decoder_forward(z_nchw, p, *, images_per_step=None):
    n, c, h, w = z_nchw.shape
    blocks = p["rb_w1"].shape[0]
    cmid = p["d3_b"].shape[1] // 4
    dim = p["d4_b"].shape[1] // 16
    if images_per_step is None:
        images_per_step = _pick_images_per_step(n, h * w)
    g = images_per_step
    assert n % g == 0 and blocks >= 1

    x = jnp.transpose(z_nchw, (0, 2, 3, 1))                 # NCHW -> NHWC (tiny)

    kernel = functools.partial(_decoder_kernel, blocks=blocks, G=g, H=h, W=w,
                               C=c, Cmid=cmid, Cout=dim)

    m_total = n * h * w
    flops = int(2 * m_total * (blocks * (9 * c * c + c * c)
                               + 9 * c * 4 * cmid + 36 * cmid * 16 * dim))
    bytes_acc = int(4 * (z_nchw.size
                         + sum(int(np.prod(v.shape)) for v in p.values())
                         + m_total * 16 * dim))

    out_flat = pl.pallas_call(
        kernel,
        out_shape=jax.ShapeDtypeStruct((n, h, w, 16 * dim), jnp.float32),
        grid_spec=pltpu.PrefetchScalarGridSpec(
            num_scalar_prefetch=0,
            grid=(n // g,),
            in_specs=[
                pl.BlockSpec((g, h, w, c), lambda i: (i, 0, 0, 0)),
                pl.BlockSpec((blocks, 9 * c, c), lambda i: (0, 0, 0)),
                pl.BlockSpec((blocks, 1, c), lambda i: (0, 0, 0)),
                pl.BlockSpec((blocks, c, c), lambda i: (0, 0, 0)),
                pl.BlockSpec((blocks, 1, c), lambda i: (0, 0, 0)),
                pl.BlockSpec((9 * c, 4 * cmid), lambda i: (0, 0)),
                pl.BlockSpec((1, 4 * cmid), lambda i: (0, 0)),
                pl.BlockSpec((36 * cmid, 16 * dim), lambda i: (0, 0)),
                pl.BlockSpec((1, 16 * dim), lambda i: (0, 0)),
            ],
            out_specs=pl.BlockSpec((g, h, w, 16 * dim), lambda i: (i, 0, 0, 0)),
            scratch_shapes=[
                pltpu.VMEM((g, h + 2, w + 2, c), jnp.float32),
                pltpu.VMEM((g, h + 2, w + 2, 4 * cmid), jnp.float32),
            ],
        ),
        compiler_params=pltpu.CompilerParams(
            dimension_semantics=("parallel",)),
        cost_estimate=pl.CostEstimate(flops=flops, transcendentals=0,
                                      bytes_accessed=bytes_acc),
    )(x, p["rb_w1"], p["rb_b1"], p["rb_w2"], p["rb_b2"],
      p["d3_w"], p["d3_b"], p["d4_w"], p["d4_b"])

    # Phase -> image interleave, folded into the mandatory NHWC -> NCHW
    # transpose of the final output (single small XLA pass).
    o = out_flat.reshape(n, h, w, 4, 4, dim)
    o = jnp.transpose(o, (0, 5, 1, 3, 2, 4))
    return o.reshape(n, dim, 4 * h, 4 * w)


# ---------------------------------------------------------------------------
# Parameter packing (done once, outside the forward pass).
# ---------------------------------------------------------------------------
def _pack_resblocks(rbs):
    cc = rbs[0][0].shape[0]
    rb_w1 = jnp.stack([jnp.transpose(a, (2, 3, 1, 0)).reshape(9 * cc, cc)
                       for (a, _, _, _) in rbs])              # (B, 9C, C)
    rb_b1 = jnp.stack([b for (_, b, _, _) in rbs])[:, None, :]  # (B, 1, C)
    rb_w2 = jnp.stack([jnp.transpose(d[:, :, 0, 0], (1, 0))
                       for (_, _, d, _) in rbs])               # (B, C, C)
    rb_b2 = jnp.stack([e for (_, _, _, e) in rbs])[:, None, :]  # (B, 1, C)
    return rb_w1, rb_b1, rb_w2, rb_b2


def _pack_deconv_subpixel(wt):
    """ConvTranspose2d(k4,s2,p1) weight (Cin,Cout,4,4) -> (9*Cin, 4*Cout).
    Row = (di*3+dj)*Cin + cin (3x3 tap over the 1-padded input), column =
    (2r+s)*Cout + cout (output phase-major)."""
    wt = np.asarray(wt)
    cin, cout = wt.shape[0], wt.shape[1]
    w = np.zeros((9 * cin, 4 * cout), np.float32)
    for r in range(2):
        for s in range(2):
            for i in range(2):
                for j in range(2):
                    di, dj = r + i, s + j
                    rr = (di * 3 + dj) * cin
                    cc = (r * 2 + s) * cout
                    w[rr:rr + cin, cc:cc + cout] = wt[:, :, 3 - r - 2 * i,
                                                      3 - s - 2 * j]
    return jnp.asarray(w)


def _pack_deconv_composed(wt):
    """Second ConvTranspose2d weight (Cmid,Cout,4,4) -> (36*Cmid, 16*Cout),
    applied in the FIRST deconv's phase space.  Row = (tap*4 + phase_in)*Cmid
    + cmid over a 3x3 tap window of the half-resolution padded phase tensor;
    column = (4*(2*r1+r2) + (2*s1+s2))*Cout + cout (composed output phase)."""
    wt = np.asarray(wt)
    cmid, cout = wt.shape[0], wt.shape[1]
    w = np.zeros((9 * 4 * cmid, 16 * cout), np.float32)
    for r1 in range(2):
        for s1 in range(2):
            for r2 in range(2):
                for s2 in range(2):
                    for i2 in range(2):
                        dr, pr = divmod(r1 + r2 + i2 - 1, 2)
                        for j2 in range(2):
                            dc, pc = divmod(s1 + s2 + j2 - 1, 2)
                            tap = (dr + 1) * 3 + (dc + 1)
                            rr = (tap * 4 + (pr * 2 + pc)) * cmid
                            cc = ((2 * r1 + r2) * 4 + (2 * s1 + s2)) * cout
                            w[rr:rr + cmid, cc:cc + cout] = wt[
                                :, :, 3 - r2 - 2 * i2, 3 - s2 - 2 * j2]
    return jnp.asarray(w)


def init_params(key, z_dim, dim, blocks):
    raw = {"resblocks": []}
    for _ in range(blocks):
        key, k1, k2, k3, k4 = jax.random.split(key, 5)
        w1 = 0.05 * jax.random.normal(k1, (z_dim, z_dim, 3, 3), jnp.float32)
        b1 = 0.05 * jax.random.normal(k2, (z_dim,), jnp.float32)
        w2 = 0.05 * jax.random.normal(k3, (z_dim, z_dim, 1, 1), jnp.float32)
        b2 = 0.05 * jax.random.normal(k4, (z_dim,), jnp.float32)
        raw["resblocks"].append((w1, b1, w2, b2))
    key, k5, k6, k7, k8 = jax.random.split(key, 5)
    raw["d3_w"] = 0.02 * jax.random.normal(k5, (z_dim, dim, 4, 4), jnp.float32)
    raw["d4_w"] = 0.02 * jax.random.normal(k6, (dim, dim, 4, 4), jnp.float32)
    # _init_weight zeroes these in the module; use small nonzero values here so
    # the self-check also exercises the bias path.
    raw["d3_b"] = 0.02 * jax.random.normal(k7, (dim,), jnp.float32)
    raw["d4_b"] = 0.02 * jax.random.normal(k8, (dim,), jnp.float32)

    kp = {}
    (kp["rb_w1"], kp["rb_b1"],
     kp["rb_w2"], kp["rb_b2"]) = _pack_resblocks(raw["resblocks"])
    kp["d3_w"] = _pack_deconv_subpixel(raw["d3_w"])
    kp["d3_b"] = jnp.tile(raw["d3_b"], 4)[None, :]
    kp["d4_w"] = _pack_deconv_composed(raw["d4_w"])
    kp["d4_b"] = jnp.tile(raw["d4_b"], 16)[None, :]
    return raw, kp


# ---------------------------------------------------------------------------
# Pure-JAX reference (lax convs) to validate the Pallas path.
# ---------------------------------------------------------------------------
def reference_forward(z_nchw, raw):
    x = jnp.transpose(z_nchw, (0, 2, 3, 1))
    dn = ("NHWC", "HWIO", "NHWC")
    for (w1, b1, w2, b2) in raw["resblocks"]:
        h = jax.nn.relu(x)
        h = lax.conv_general_dilated(h, jnp.transpose(w1, (2, 3, 1, 0)), (1, 1),
                                     [(1, 1), (1, 1)], dimension_numbers=dn) + b1
        h = jax.nn.relu(h)
        h = lax.conv_general_dilated(h, jnp.transpose(w2, (2, 3, 1, 0)), (1, 1),
                                     [(0, 0), (0, 0)], dimension_numbers=dn) + b2
        x = x + h
    for wt, b in ((raw["d3_w"], raw["d3_b"]), (raw["d4_w"], raw["d4_b"])):
        w_hwio = jnp.transpose(jnp.flip(wt, (2, 3)), (2, 3, 0, 1))
        x = lax.conv_general_dilated(x, w_hwio, (1, 1), [(2, 2), (2, 2)],
                                     lhs_dilation=(2, 2),
                                     dimension_numbers=dn) + b
    return jnp.transpose(x, (0, 3, 1, 2))


if __name__ == "__main__":
    key = jax.random.PRNGKey(0)
    kp_key, kz = jax.random.split(key)

    N, z_dim, dim, H, W, blocks = 2, 8, 16, 8, 8, 2
    raw_params, kparams = init_params(kp_key, z_dim, dim, blocks)
    z = jax.random.normal(kz, (N, z_dim, H, W), jnp.float32)   # NCHW, like PyTorch

    fwd = jax.jit(decoder_forward)
    out = jax.block_until_ready(fwd(z, kparams))
    assert out.shape == (N, dim, 4 * H, 4 * W), out.shape

    ref = jax.block_until_ready(reference_forward(z, raw_params))
    np.testing.assert_allclose(np.asarray(out), np.asarray(ref),
                               rtol=5e-4, atol=5e-4)
    print("KERNEL_OK")
</pallas_src>

<mosaic_0001>
module attributes {stable_mosaic.version = 11 : i64} {
  func.func @_decoder_kernel(%arg0: i32, %arg1: memref<1x8x8x8xf32, #tpu.memory_space<vmem>>, %arg2: memref<2x72x8xf32, #tpu.memory_space<vmem>>, %arg3: memref<2x1x8xf32, #tpu.memory_space<vmem>>, %arg4: memref<2x8x8xf32, #tpu.memory_space<vmem>>, %arg5: memref<2x1x8xf32, #tpu.memory_space<vmem>>, %arg6: memref<72x64xf32, #tpu.memory_space<vmem>>, %arg7: memref<1x64xf32, #tpu.memory_space<vmem>>, %arg8: memref<576x256xf32, #tpu.memory_space<vmem>>, %arg9: memref<1x256xf32, #tpu.memory_space<vmem>>, %arg10: memref<1x8x8x256xf32, #tpu.memory_space<vmem>>, %arg11: memref<1x10x10x8xf32, #tpu.memory_space<vmem>>, %arg12: memref<1x10x10x64xf32, #tpu.memory_space<vmem>>) attributes {dimension_semantics = [#tpu.dimension_semantics<parallel>], iteration_bounds = array<i64: 2>, scalar_prefetch = 0 : i64, scratch_operands = 2 : i64, tpu.core_type = #tpu.core_type<tc>, window_params = [{transform_indices = @transform_0, window_bounds = array<i64: 1, 8, 8, 8>}, {pipeline_mode = #tpu.pipeline_mode<synchronous>, transform_indices = @transform_1, window_bounds = array<i64: 2, 72, 8>}, {pipeline_mode = #tpu.pipeline_mode<synchronous>, transform_indices = @transform_2, window_bounds = array<i64: 2, 1, 8>}, {pipeline_mode = #tpu.pipeline_mode<synchronous>, transform_indices = @transform_3, window_bounds = array<i64: 2, 8, 8>}, {pipeline_mode = #tpu.pipeline_mode<synchronous>, transform_indices = @transform_4, window_bounds = array<i64: 2, 1, 8>}, {pipeline_mode = #tpu.pipeline_mode<synchronous>, transform_indices = @transform_5, window_bounds = array<i64: 72, 64>}, {pipeline_mode = #tpu.pipeline_mode<synchronous>, transform_indices = @transform_6, window_bounds = array<i64: 1, 64>}, {pipeline_mode = #tpu.pipeline_mode<synchronous>, transform_indices = @transform_7, window_bounds = array<i64: 576, 256>}, {pipeline_mode = #tpu.pipeline_mode<synchronous>, transform_indices = @transform_8, window_bounds = array<i64: 1, 256>}, {transform_indices = @transform_9, window_bounds = array<i64: 1, 8, 8, 256>}]} {
    %cst = arith.constant 0.000000e+00 : f32
    %0 = vector.broadcast %cst : f32 to vector<1x10x10x8xf32>
    %c0 = arith.constant 0 : index
    %c0_0 = arith.constant 0 : index
    %c0_1 = arith.constant 0 : index
    %c0_2 = arith.constant 0 : index
    %1 = vector.load %arg11[%c0, %c0_0, %c0_1, %c0_2] : memref<1x10x10x8xf32, #tpu.memory_space<vmem>>, vector<1x10x10x8xf32>
    tpu.vector_store %arg11[%c0, %c0_0, %c0_1, %c0_2], %0 {strides = array<i32>} : memref<1x10x10x8xf32, #tpu.memory_space<vmem>>, vector<1x10x10x8xf32>,
    %cst_3 = arith.constant 0.000000e+00 : f32
    %2 = vector.broadcast %cst_3 : f32 to vector<1x10x10x64xf32>
    %c0_4 = arith.constant 0 : index
    %c0_5 = arith.constant 0 : index
    %c0_6 = arith.constant 0 : index
    %c0_7 = arith.constant 0 : index
    %3 = vector.load %arg12[%c0_4, %c0_5, %c0_6, %c0_7] : memref<1x10x10x64xf32, #tpu.memory_space<vmem>>, vector<1x10x10x64xf32>
    tpu.vector_store %arg12[%c0_4, %c0_5, %c0_6, %c0_7], %2 {strides = array<i32>} : memref<1x10x10x64xf32, #tpu.memory_space<vmem>>, vector<1x10x10x64xf32>,
    %c0_8 = arith.constant 0 : index
    %c0_9 = arith.constant 0 : index
    %c0_10 = arith.constant 0 : index
    %c0_11 = arith.constant 0 : index
    %4 = vector.load %arg1[%c0_8, %c0_9, %c0_10, %c0_11] : memref<1x8x8x8xf32, #tpu.memory_space<vmem>>, vector<1x8x8x8xf32>
    %cst_12 = arith.constant 0.000000e+00 : f32
    %5 = vector.broadcast %cst_12 : f32 to vector<1x8x8x8xf32>
    %6 = arith.maximumf %4, %5 : vector<1x8x8x8xf32>
    %c0_13 = arith.constant 0 : index
    %c1 = arith.constant 1 : index
    %c1_14 = arith.constant 1 : index
    %c0_15 = arith.constant 0 : index
    %7 = vector.load %arg11[%c0_13, %c1, %c1_14, %c0_15] : memref<1x10x10x8xf32, #tpu.memory_space<vmem>>, vector<1x8x8x8xf32>
    tpu.vector_store %arg11[%c0_13, %c1, %c1_14, %c0_15], %6 {strides = array<i32>} : memref<1x10x10x8xf32, #tpu.memory_space<vmem>>, vector<1x8x8x8xf32>,
    %c0_16 = arith.constant 0 : index
    %c0_17 = arith.constant 0 : index
    %c0_18 = arith.constant 0 : index
    %c0_19 = arith.constant 0 : index
    %8 = vector.load %arg11[%c0_16, %c0_17, %c0_18, %c0_19] : memref<1x10x10x8xf32, #tpu.memory_space<vmem>>, vector<1x8x8x8xf32>
    %c0_20 = arith.constant 0 : index
    %c0_21 = arith.constant 0 : index
    %c1_22 = arith.constant 1 : index
    %c0_23 = arith.constant 0 : index
    %9 = vector.load %arg11[%c0_20, %c0_21, %c1_22, %c0_23] : memref<1x10x10x8xf32, #tpu.memory_space<vmem>>, vector<1x8x8x8xf32>
    %c0_24 = arith.constant 0 : index
    %c0_25 = arith.constant 0 : index
    %c2 = arith.constant 2 : index
    %c0_26 = arith.constant 0 : index
    %10 = vector.load %arg11[%c0_24, %c0_25, %c2, %c0_26] : memref<1x10x10x8xf32, #tpu.memory_space<vmem>>, vector<1x8x8x8xf32>
    %c0_27 = arith.constant 0 : index
    %c1_28 = arith.constant 1 : index
    %c0_29 = arith.constant 0 : index
    %c0_30 = arith.constant 0 : index
    %11 = vector.load %arg11[%c0_27, %c1_28, %c0_29, %c0_30] : memref<1x10x10x8xf32, #tpu.memory_space<vmem>>, vector<1x8x8x8xf32>
    %c0_31 = arith.constant 0 : index
    %c1_32 = arith.constant 1 : index
    %c1_33 = arith.constant 1 : index
    %c0_34 = arith.constant 0 : index
    %12 = vector.load %arg11[%c0_31, %c1_32, %c1_33, %c0_34] : memref<1x10x10x8xf32, #tpu.memory_space<vmem>>, vector<1x8x8x8xf32>
    %c0_35 = arith.constant 0 : index
    %c1_36 = arith.constant 1 : index
    %c2_37 = arith.constant 2 : index
    %c0_38 = arith.constant 0 : index
    %13 = vector.load %arg11[%c0_35, %c1_36, %c2_37, %c0_38] : memref<1x10x10x8xf32, #tpu.memory_space<vmem>>, vector<1x8x8x8xf32>
    %c0_39 = arith.constant 0 : index
    %c2_40 = arith.constant 2 : index
    %c0_41 = arith.constant 0 : index
    %c0_42 = arith.constant 0 : index
    %14 = vector.load %arg11[%c0_39, %c2_40, %c0_41, %c0_42] : memref<1x10x10x8xf32, #tpu.memory_space<vmem>>, vector<1x8x8x8xf32>
    %c0_43 = arith.constant 0 : index
    %c2_44 = arith.constant 2 : index
    %c1_45 = arith.constant 1 : index
    %c0_46 = arith.constant 0 : index
    %15 = vector.load %arg11[%c0_43, %c2_44, %c1_45, %c0_46] : memref<1x10x10x8xf32, #tpu.memory_space<vmem>>, vector<1x8x8x8xf32>
    %c0_47 = arith.constant 0 : index
    %c2_48 = arith.constant 2 : index
    %c2_49 = arith.constant 2 : index
    %c0_50 = arith.constant 0 : index
    %16 = vector.load %arg11[%c0_47, %c2_48, %c2_49, %c0_50] : memref<1x10x10x8xf32, #tpu.memory_space<vmem>>, vector<1x8x8x8xf32>
    %17 = tpu.concatenate %8, %9, %10, %11, %12, %13, %14, %15, %16 in 3 : vector<1x8x8x8xf32>, vector<1x8x8x8xf32>, vector<1x8x8x8xf32>, vector<1x8x8x8xf32>, vector<1x8x8x8xf32>, vector<1x8x8x8xf32>, vector<1x8x8x8xf32>, vector<1x8x8x8xf32>, vector<1x8x8x8xf32> -> vector<1x8x8x72xf32>
    %18 = vector.shape_cast %17 : vector<1x8x8x72xf32> to vector<64x72xf32>
    %c0_51 = arith.constant 0 : index
    %c0_52 = arith.constant 0 : index
    %c0_53 = arith.constant 0 : index
    %19 = vector.load %arg2[%c0_51, %c0_52, %c0_53] : memref<2x72x8xf32, #tpu.memory_space<vmem>>, vector<1x72x8xf32>
    %20 = vector.shape_cast %19 : vector<1x72x8xf32> to vector<72x8xf32>
    %cst_54 = arith.constant dense<0.000000e+00> : vector<64x8xf32>
    %21 = tpu.matmul %18, %20, %cst_54 {dimension_numbers = #tpu.dot_dimension_numbers<[1], [0], [0], [1], [0, 0, 1, 1], [], []>} : vector<64x72xf32>, vector<72x8xf32>, vector<64x8xf32> -> vector<64x8xf32>
    %c0_55 = arith.constant 0 : index
    %c0_56 = arith.constant 0 : index
    %c0_57 = arith.constant 0 : index
    %22 = vector.load %arg3[%c0_55, %c0_56, %c0_57] : memref<2x1x8xf32, #tpu.memory_space<vmem>>, vector<1x1x8xf32>
    %23 = vector.shape_cast %22 : vector<1x1x8xf32> to vector<1x8xf32>
    %24 = vector.broadcast %23 : vector<1x8xf32> to vector<64x8xf32>
    %25 = arith.addf %21, %24 : vector<64x8xf32>
    %cst_58 = arith.constant 0.000000e+00 : f32
    %26 = vector.broadcast %cst_58 : f32 to vector<64x8xf32>
    %27 = arith.maximumf %25, %26 : vector<64x8xf32>
    %c0_59 = arith.constant 0 : index
    %c0_60 = arith.constant 0 : index
    %c0_61 = arith.constant 0 : index
    %28 = vector.load %arg4[%c0_59, %c0_60, %c0_61] : memref<2x8x8xf32, #tpu.memory_space<vmem>>, vector<1x8x8xf32>
    %29 = vector.shape_cast %28 : vector<1x8x8xf32> to vector<8x8xf32>
    %cst_62 = arith.constant dense<0.000000e+00> : vector<64x8xf32>
    %30 = tpu.matmul %27, %29, %cst_62 {dimension_numbers = #tpu.dot_dimension_numbers<[1], [0], [0], [1], [0, 0, 1, 1], [], []>} : vector<64x8xf32>, vector<8x8xf32>, vector<64x8xf32> -> vector<64x8xf32>
    %c0_63 = arith.constant 0 : index
    %c0_64 = arith.constant 0 : index
    %c0_65 = arith.constant 0 : index
    %31 = vector.load %arg5[%c0_63, %c0_64, %c0_65] : memref<2x1x8xf32, #tpu.memory_space<vmem>>, vector<1x1x8xf32>
    %32 = vector.shape_cast %31 : vector<1x1x8xf32> to vector<1x8xf32>
    %33 = vector.broadcast %32 : vector<1x8xf32> to vector<64x8xf32>
    %34 = arith.addf %30, %33 : vector<64x8xf32>
    %35 = vector.shape_cast %34 : vector<64x8xf32> to vector<1x8x8x8xf32>
    %36 = arith.addf %4, %35 : vector<1x8x8x8xf32>
    %cst_66 = arith.constant 0.000000e+00 : f32
    %37 = vector.broadcast %cst_66 : f32 to vector<1x8x8x8xf32>
    %38 = arith.maximumf %36, %37 : vector<1x8x8x8xf32>
    %c0_67 = arith.constant 0 : index
    %c1_68 = arith.constant 1 : index
    %c1_69 = arith.constant 1 : index
    %c0_70 = arith.constant 0 : index
    %39 = vector.load %arg11[%c0_67, %c1_68, %c1_69, %c0_70] : memref<1x10x10x8xf32, #tpu.memory_space<vmem>>, vector<1x8x8x8xf32>
    tpu.vector_store %arg11[%c0_67, %c1_68, %c1_69, %c0_70], %38 {strides = array<i32>} : memref<1x10x10x8xf32, #tpu.memory_space<vmem>>, vector<1x8x8x8xf32>,
    %c0_71 = arith.constant 0 : index
    %c0_72 = arith.constant 0 : index
    %c0_73 = arith.constant 0 : index
    %c0_74 = arith.constant 0 : index
    %40 = vector.load %arg11[%c0_71, %c0_72, %c0_73, %c0_74] : memref<1x10x10x8xf32, #tpu.memory_space<vmem>>, vector<1x8x8x8xf32>
    %c0_75 = arith.constant 0 : index
    %c0_76 = arith.constant 0 : index
    %c1_77 = arith.constant 1 : index
    %c0_78 = arith.constant 0 : index
    %41 = vector.load %arg11[%c0_75, %c0_76, %c1_77, %c0_78] : memref<1x10x10x8xf32, #tpu.memory_space<vmem>>, vector<1x8x8x8xf32>
    %c0_79 = arith.constant 0 : index
    %c0_80 = arith.constant 0 : index
    %c2_81 = arith.constant 2 : index
    %c0_82 = arith.constant 0 : index
    %42 = vector.load %arg11[%c0_79, %c0_80, %c2_81, %c0_82] : memref<1x10x10x8xf32, #tpu.memory_space<vmem>>, vector<1x8x8x8xf32>
    %c0_83 = arith.constant 0 : index
    %c1_84 = arith.constant 1 : index
    %c0_85 = arith.constant 0 : index
    %c0_86 = arith.constant 0 : index
    %43 = vector.load %arg11[%c0_83, %c1_84, %c0_85, %c0_86] : memref<1x10x10x8xf32, #tpu.memory_space<vmem>>, vector<1x8x8x8xf32>
    %c0_87 = arith.constant 0 : index
    %c1_88 = arith.constant 1 : index
    %c1_89 = arith.constant 1 : index
    %c0_90 = arith.constant 0 : index
    %44 = vector.load %arg11[%c0_87, %c1_88, %c1_89, %c0_90] : memref<1x10x10x8xf32, #tpu.memory_space<vmem>>, vector<1x8x8x8xf32>
    %c0_91 = arith.constant 0 : index
    %c1_92 = arith.constant 1 : index
    %c2_93 = arith.constant 2 : index
    %c0_94 = arith.constant 0 : index
    %45 = vector.load %arg11[%c0_91, %c1_92, %c2_93, %c0_94] : memref<1x10x10x8xf32, #tpu.memory_space<vmem>>, vector<1x8x8x8xf32>
    %c0_95 = arith.constant 0 : index
    %c2_96 = arith.constant 2 : index
    %c0_97 = arith.constant 0 : index
    %c0_98 = arith.constant 0 : index
    %46 = vector.load %arg11[%c0_95, %c2_96, %c0_97, %c0_98] : memref<1x10x10x8xf32, #tpu.memory_space<vmem>>, vector<1x8x8x8xf32>
    %c0_99 = arith.constant 0 : index
    %c2_100 = arith.constant 2 : index
    %c1_101 = arith.constant 1 : index
    %c0_102 = arith.constant 0 : index
    %47 = vector.load %arg11[%c0_99, %c2_100, %c1_101, %c0_102] : memref<1x10x10x8xf32, #tpu.memory_space<vmem>>, vector<1x8x8x8xf32>
    %c0_103 = arith.constant 0 : index
    %c2_104 = arith.constant 2 : index
    %c2_105 = arith.constant 2 : index
    %c0_106 = arith.constant 0 : index
    %48 = vector.load %arg11[%c0_103, %c2_104, %c2_105, %c0_106] : memref<1x10x10x8xf32, #tpu.memory_space<vmem>>, vector<1x8x8x8xf32>
    %49 = tpu.concatenate %40, %41, %42, %43, %44, %45, %46, %47, %48 in 3 : vector<1x8x8x8xf32>, vector<1x8x8x8xf32>, vector<1x8x8x8xf32>, vector<1x8x8x8xf32>, vector<1x8x8x8xf32>, vector<1x8x8x8xf32>, vector<1x8x8x8xf32>, vector<1x8x8x8xf32>, vector<1x8x8x8xf32> -> vector<1x8x8x72xf32>
    %50 = vector.shape_cast %49 : vector<1x8x8x72xf32> to vector<64x72xf32>
    %c1_107 = arith.constant 1 : index
    %c0_108 = arith.constant 0 : index
    %c0_109 = arith.constant 0 : index
    %51 = vector.load %arg2[%c1_107, %c0_108, %c0_109] : memref<2x72x8xf32, #tpu.memory_space<vmem>>, vector<1x72x8xf32>
    %52 = vector.shape_cast %51 : vector<1x72x8xf32> to vector<72x8xf32>
    %cst_110 = arith.constant dense<0.000000e+00> : vector<64x8xf32>
    %53 = tpu.matmul %50, %52, %cst_110 {dimension_numbers = #tpu.dot_dimension_numbers<[1], [0], [0], [1], [0, 0, 1, 1], [], []>} : vector<64x72xf32>, vector<72x8xf32>, vector<64x8xf32> -> vector<64x8xf32>
    %c1_111 = arith.constant 1 : index
    %c0_112 = arith.constant 0 : index
    %c0_113 = arith.constant 0 : index
    %54 = vector.load %arg3[%c1_111, %c0_112, %c0_113] : memref<2x1x8xf32, #tpu.memory_space<vmem>>, vector<1x1x8xf32>
    %55 = vector.shape_cast %54 : vector<1x1x8xf32> to vector<1x8xf32>
    %56 = vector.broadcast %55 : vector<1x8xf32> to vector<64x8xf32>
    %57 = arith.addf %53, %56 : vector<64x8xf32>
    %cst_114 = arith.constant 0.000000e+00 : f32
    %58 = vector.broadcast %cst_114 : f32 to vector<64x8xf32>
    %59 = arith.maximumf %57, %58 : vector<64x8xf32>
    %c1_115 = arith.constant 1 : index
    %c0_116 = arith.constant 0 : index
    %c0_117 = arith.constant 0 : index
    %60 = vector.load %arg4[%c1_115, %c0_116, %c0_117] : memref<2x8x8xf32, #tpu.memory_space<vmem>>, vector<1x8x8xf32>
    %61 = vector.shape_cast %60 : vector<1x8x8xf32> to vector<8x8xf32>
    %cst_118 = arith.constant dense<0.000000e+00> : vector<64x8xf32>
    %62 = tpu.matmul %59, %61, %cst_118 {dimension_numbers = #tpu.dot_dimension_numbers<[1], [0], [0], [1], [0, 0, 1, 1], [], []>} : vector<64x8xf32>, vector<8x8xf32>, vector<64x8xf32> -> vector<64x8xf32>
    %c1_119 = arith.constant 1 : index
    %c0_120 = arith.constant 0 : index
    %c0_121 = arith.constant 0 : index
    %63 = vector.load %arg5[%c1_119, %c0_120, %c0_121] : memref<2x1x8xf32, #tpu.memory_space<vmem>>, vector<1x1x8xf32>
    %64 = vector.shape_cast %63 : vector<1x1x8xf32> to vector<1x8xf32>
    %65 = vector.broadcast %64 : vector<1x8xf32> to vector<64x8xf32>
    %66 = arith.addf %62, %65 : vector<64x8xf32>
    %67 = vector.shape_cast %66 : vector<64x8xf32> to vector<1x8x8x8xf32>
    %68 = arith.addf %36, %67 : vector<1x8x8x8xf32>
    %c0_122 = arith.constant 0 : index
    %c1_123 = arith.constant 1 : index
    %c1_124 = arith.constant 1 : index
    %c0_125 = arith.constant 0 : index
    %69 = vector.load %arg11[%c0_122, %c1_123, %c1_124, %c0_125] : memref<1x10x10x8xf32, #tpu.memory_space<vmem>>, vector<1x8x8x8xf32>
    tpu.vector_store %arg11[%c0_122, %c1_123, %c1_124, %c0_125], %68 {strides = array<i32>} : memref<1x10x10x8xf32, #tpu.memory_space<vmem>>, vector<1x8x8x8xf32>,
    %c0_126 = arith.constant 0 : index
    %c0_127 = arith.constant 0 : index
    %c0_128 = arith.constant 0 : index
    %c0_129 = arith.constant 0 : index
    %70 = vector.load %arg11[%c0_126, %c0_127, %c0_128, %c0_129] : memref<1x10x10x8xf32, #tpu.memory_space<vmem>>, vector<1x8x8x8xf32>
    %c0_130 = arith.constant 0 : index
    %c0_131 = arith.constant 0 : index
    %c1_132 = arith.constant 1 : index
    %c0_133 = arith.constant 0 : index
    %71 = vector.load %arg11[%c0_130, %c0_131, %c1_132, %c0_133] : memref<1x10x10x8xf32, #tpu.memory_space<vmem>>, vector<1x8x8x8xf32>
    %c0_134 = arith.constant 0 : index
    %c0_135 = arith.constant 0 : index
    %c2_136 = arith.constant 2 : index
    %c0_137 = arith.constant 0 : index
    %72 = vector.load %arg11[%c0_134, %c0_135, %c2_136, %c0_137] : memref<1x10x10x8xf32, #tpu.memory_space<vmem>>, vector<1x8x8x8xf32>
    %c0_138 = arith.constant 0 : index
    %c1_139 = arith.constant 1 : index
    %c0_140 = arith.constant 0 : index
    %c0_141 = arith.constant 0 : index
    %73 = vector.load %arg11[%c0_138, %c1_139, %c0_140, %c0_141] : memref<1x10x10x8xf32, #tpu.memory_space<vmem>>, vector<1x8x8x8xf32>
    %c0_142 = arith.constant 0 : index
    %c1_143 = arith.constant 1 : index
    %c1_144 = arith.constant 1 : index
    %c0_145 = arith.constant 0 : index
    %74 = vector.load %arg11[%c0_142, %c1_143, %c1_144, %c0_145] : memref<1x10x10x8xf32, #tpu.memory_space<vmem>>, vector<1x8x8x8xf32>
    %c0_146 = arith.constant 0 : index
    %c1_147 = arith.constant 1 : index
    %c2_148 = arith.constant 2 : index
    %c0_149 = arith.constant 0 : index
    %75 = vector.load %arg11[%c0_146, %c1_147, %c2_148, %c0_149] : memref<1x10x10x8xf32, #tpu.memory_space<vmem>>, vector<1x8x8x8xf32>
    %c0_150 = arith.constant 0 : index
    %c2_151 = arith.constant 2 : index
    %c0_152 = arith.constant 0 : index
    %c0_153 = arith.constant 0 : index
    %76 = vector.load %arg11[%c0_150, %c2_151, %c0_152, %c0_153] : memref<1x10x10x8xf32, #tpu.memory_space<vmem>>, vector<1x8x8x8xf32>
    %c0_154 = arith.constant 0 : index
    %c2_155 = arith.constant 2 : index
    %c1_156 = arith.constant 1 : index
    %c0_157 = arith.constant 0 : index
    %77 = vector.load %arg11[%c0_154, %c2_155, %c1_156, %c0_157] : memref<1x10x10x8xf32, #tpu.memory_space<vmem>>, vector<1x8x8x8xf32>
    %c0_158 = arith.constant 0 : index
    %c2_159 = arith.constant 2 : index
    %c2_160 = arith.constant 2 : index
    %c0_161 = arith.constant 0 : index
    %78 = vector.load %arg11[%c0_158, %c2_159, %c2_160, %c0_161] : memref<1x10x10x8xf32, #tpu.memory_space<vmem>>, vector<1x8x8x8xf32>
    %79 = tpu.concatenate %70, %71, %72, %73, %74, %75, %76, %77, %78 in 3 : vector<1x8x8x8xf32>, vector<1x8x8x8xf32>, vector<1x8x8x8xf32>, vector<1x8x8x8xf32>, vector<1x8x8x8xf32>, vector<1x8x8x8xf32>, vector<1x8x8x8xf32>, vector<1x8x8x8xf32>, vector<1x8x8x8xf32> -> vector<1x8x8x72xf32>
    %80 = vector.shape_cast %79 : vector<1x8x8x72xf32> to vector<64x72xf32>
    %c0_162 = arith.constant 0 : index
    %c0_163 = arith.constant 0 : index
    %81 = vector.load %arg6[%c0_162, %c0_163] : memref<72x64xf32, #tpu.memory_space<vmem>>, vector<72x64xf32>
    %cst_164 = arith.constant dense<0.000000e+00> : vector<64x64xf32>
    %82 = tpu.matmul %80, %81, %cst_164 {dimension_numbers = #tpu.dot_dimension_numbers<[1], [0], [0], [1], [0, 0, 1, 1], [], []>} : vector<64x72xf32>, vector<72x64xf32>, vector<64x64xf32> -> vector<64x64xf32>
    %c0_165 = arith.constant 0 : index
    %c0_166 = arith.constant 0 : index
    %83 = vector.load %arg7[%c0_165, %c0_166] : memref<1x64xf32, #tpu.memory_space<vmem>>, vector<1x64xf32>
    %84 = vector.broadcast %83 : vector<1x64xf32> to vector<64x64xf32>
    %85 = arith.addf %82, %84 : vector<64x64xf32>
    %86 = vector.shape_cast %85 : vector<64x64xf32> to vector<1x8x8x64xf32>
    %c0_167 = arith.constant 0 : index
    %c1_168 = arith.constant 1 : index
    %c1_169 = arith.constant 1 : index
    %c0_170 = arith.constant 0 : index
    %87 = vector.load %arg12[%c0_167, %c1_168, %c1_169, %c0_170] : memref<1x10x10x64xf32, #tpu.memory_space<vmem>>, vector<1x8x8x64xf32>
    tpu.vector_store %arg12[%c0_167, %c1_168, %c1_169, %c0_170], %86 {strides = array<i32>} : memref<1x10x10x64xf32, #tpu.memory_space<vmem>>, vector<1x8x8x64xf32>,
    %c0_171 = arith.constant 0 : index
    %c0_172 = arith.constant 0 : index
    %c0_173 = arith.constant 0 : index
    %c0_174 = arith.constant 0 : index
    %88 = vector.load %arg12[%c0_171, %c0_172, %c0_173, %c0_174] : memref<1x10x10x64xf32, #tpu.memory_space<vmem>>, vector<1x8x8x64xf32>
    %c0_175 = arith.constant 0 : index
    %c0_176 = arith.constant 0 : index
    %c1_177 = arith.constant 1 : index
    %c0_178 = arith.constant 0 : index
    %89 = vector.load %arg12[%c0_175, %c0_176, %c1_177, %c0_178] : memref<1x10x10x64xf32, #tpu.memory_space<vmem>>, vector<1x8x8x64xf32>
    %c0_179 = arith.constant 0 : index
    %c0_180 = arith.constant 0 : index
    %c2_181 = arith.constant 2 : index
    %c0_182 = arith.constant 0 : index
    %90 = vector.load %arg12[%c0_179, %c0_180, %c2_181, %c0_182] : memref<1x10x10x64xf32, #tpu.memory_space<vmem>>, vector<1x8x8x64xf32>
    %c0_183 = arith.constant 0 : index
    %c1_184 = arith.constant 1 : index
    %c0_185 = arith.constant 0 : index
    %c0_186 = arith.constant 0 : index
    %91 = vector.load %arg12[%c0_183, %c1_184, %c0_185, %c0_186] : memref<1x10x10x64xf32, #tpu.memory_space<vmem>>, vector<1x8x8x64xf32>
    %c0_187 = arith.constant 0 : index
    %c1_188 = arith.constant 1 : index
    %c1_189 = arith.constant 1 : index
    %c0_190 = arith.constant 0 : index
    %92 = vector.load %arg12[%c0_187, %c1_188, %c1_189, %c0_190] : memref<1x10x10x64xf32, #tpu.memory_space<vmem>>, vector<1x8x8x64xf32>
    %c0_191 = arith.constant 0 : index
    %c1_192 = arith.constant 1 : index
    %c2_193 = arith.constant 2 : index
    %c0_194 = arith.constant 0 : index
    %93 = vector.load %arg12[%c0_191, %c1_192, %c2_193, %c0_194] : memref<1x10x10x64xf32, #tpu.memory_space<vmem>>, vector<1x8x8x64xf32>
    %c0_195 = arith.constant 0 : index
    %c2_196 = arith.constant 2 : index
    %c0_197 = arith.constant 0 : index
    %c0_198 = arith.constant 0 : index
    %94 = vector.load %arg12[%c0_195, %c2_196, %c0_197, %c0_198] : memref<1x10x10x64xf32, #tpu.memory_space<vmem>>, vector<1x8x8x64xf32>
    %c0_199 = arith.constant 0 : index
    %c2_200 = arith.constant 2 : index
    %c1_201 = arith.constant 1 : index
    %c0_202 = arith.constant 0 : index
    %95 = vector.load %arg12[%c0_199, %c2_200, %c1_201, %c0_202] : memref<1x10x10x64xf32, #tpu.memory_space<vmem>>, vector<1x8x8x64xf32>
    %c0_203 = arith.constant 0 : index
    %c2_204 = arith.constant 2 : index
    %c2_205 = arith.constant 2 : index
    %c0_206 = arith.constant 0 : index
    %96 = vector.load %arg12[%c0_203, %c2_204, %c2_205, %c0_206] : memref<1x10x10x64xf32, #tpu.memory_space<vmem>>, vector<1x8x8x64xf32>
    %97 = tpu.concatenate %88, %89, %90, %91, %92, %93, %94, %95, %96 in 3 : vector<1x8x8x64xf32>, vector<1x8x8x64xf32>, vector<1x8x8x64xf32>, vector<1x8x8x64xf32>, vector<1x8x8x64xf32>, vector<1x8x8x64xf32>, vector<1x8x8x64xf32>, vector<1x8x8x64xf32>, vector<1x8x8x64xf32> -> vector<1x8x8x576xf32>
    %98 = vector.shape_cast %97 : vector<1x8x8x576xf32> to vector<64x576xf32>
    %c0_207 = arith.constant 0 : index
    %c0_208 = arith.constant 0 : index
    %99 = vector.load %arg8[%c0_207, %c0_208] : memref<576x256xf32, #tpu.memory_space<vmem>>, vector<576x256xf32>
    %cst_209 = arith.constant dense<0.000000e+00> : vector<64x256xf32>
    %100 = tpu.matmul %98, %99, %cst_209 {dimension_numbers = #tpu.dot_dimension_numbers<[1], [0], [0], [1], [0, 0, 1, 1], [], []>} : vector<64x576xf32>, vector<576x256xf32>, vector<64x256xf32> -> vector<64x256xf32>
    %c0_210 = arith.constant 0 : index
    %c0_211 = arith.constant 0 : index
    %101 = vector.load %arg9[%c0_210, %c0_211] : memref<1x256xf32, #tpu.memory_space<vmem>>, vector<1x256xf32>
    %102 = vector.broadcast %101 : vector<1x256xf32> to vector<64x256xf32>
    %103 = arith.addf %100, %102 : vector<64x256xf32>
    %104 = vector.shape_cast %103 : vector<64x256xf32> to vector<1x8x8x256xf32>
    %c0_212 = arith.constant 0 : index
    %c0_213 = arith.constant 0 : index
    %c0_214 = arith.constant 0 : index
    %c0_215 = arith.constant 0 : index
    %105 = vector.load %arg10[%c0_212, %c0_213, %c0_214, %c0_215] : memref<1x8x8x256xf32, #tpu.memory_space<vmem>>, vector<1x8x8x256xf32>
    tpu.vector_store %arg10[%c0_212, %c0_213, %c0_214, %c0_215], %104 {strides = array<i32>} : memref<1x8x8x256xf32, #tpu.memory_space<vmem>>, vector<1x8x8x256xf32>,
    return
  }
  func.func @transform_0(%arg0: i32) -> (i32, i32, i32, i32) {
    %c0_i32 = arith.constant 0 : i32
    %c0_i32_0 = arith.constant 0 : i32
    %c0_i32_1 = arith.constant 0 : i32
    %c0_i32_2 = arith.constant 0 : i32
    return %arg0, %c0_i32, %c0_i32_0, %c0_i32_1 : i32, i32, i32, i32
  }
  func.func @transform_1(%arg0: i32) -> (i32, i32, i32) {
    %c0_i32 = arith.constant 0 : i32
    %c0_i32_0 = arith.constant 0 : i32
    %c0_i32_1 = arith.constant 0 : i32
    %c0_i32_2 = arith.constant 0 : i32
    return %c0_i32, %c0_i32_0, %c0_i32_1 : i32, i32, i32
  }
  func.func @transform_2(%arg0: i32) -> (i32, i32, i32) {
    %c0_i32 = arith.constant 0 : i32
    %c0_i32_0 = arith.constant 0 : i32
    %c0_i32_1 = arith.constant 0 : i32
    %c0_i32_2 = arith.constant 0 : i32
    return %c0_i32, %c0_i32_0, %c0_i32_1 : i32, i32, i32
  }
  func.func @transform_3(%arg0: i32) -> (i32, i32, i32) {
    %c0_i32 = arith.constant 0 : i32
    %c0_i32_0 = arith.constant 0 : i32
    %c0_i32_1 = arith.constant 0 : i32
    %c0_i32_2 = arith.constant 0 : i32
    return %c0_i32, %c0_i32_0, %c0_i32_1 : i32, i32, i32
  }
  func.func @transform_4(%arg0: i32) -> (i32, i32, i32) {
    %c0_i32 = arith.constant 0 : i32
    %c0_i32_0 = arith.constant 0 : i32
    %c0_i32_1 = arith.constant 0 : i32
    %c0_i32_2 = arith.constant 0 : i32
    return %c0_i32, %c0_i32_0, %c0_i32_1 : i32, i32, i32
  }
  func.func @transform_5(%arg0: i32) -> (i32, i32) {
    %c0_i32 = arith.constant 0 : i32
    %c0_i32_0 = arith.constant 0 : i32
    %c0_i32_1 = arith.constant 0 : i32
    return %c0_i32, %c0_i32_0 : i32, i32
  }
  func.func @transform_6(%arg0: i32) -> (i32, i32) {
    %c0_i32 = arith.constant 0 : i32
    %c0_i32_0 = arith.constant 0 : i32
    %c0_i32_1 = arith.constant 0 : i32
    return %c0_i32, %c0_i32_0 : i32, i32
  }
  func.func @transform_7(%arg0: i32) -> (i32, i32) {
    %c0_i32 = arith.constant 0 : i32
    %c0_i32_0 = arith.constant 0 : i32
    %c0_i32_1 = arith.constant 0 : i32
    return %c0_i32, %c0_i32_0 : i32, i32
  }
  func.func @transform_8(%arg0: i32) -> (i32, i32) {
    %c0_i32 = arith.constant 0 : i32
    %c0_i32_0 = arith.constant 0 : i32
    %c0_i32_1 = arith.constant 0 : i32
    return %c0_i32, %c0_i32_0 : i32, i32
  }
  func.func @transform_9(%arg0: i32) -> (i32, i32, i32, i32) {
    %c0_i32 = arith.constant 0 : i32
    %c0_i32_0 = arith.constant 0 : i32
    %c0_i32_1 = arith.constant 0 : i32
    %c0_i32_2 = arith.constant 0 : i32
    return %arg0, %c0_i32, %c0_i32_0, %c0_i32_1 : i32, i32, i32, i32
  }
}

</mosaic_0001>

<bundles_post_ra>
// kernel: decoder_forward.1
= control target key start
LH: loop header
LB: loop body
LE: loop exit
PB: predicated region body
PF: predicated region fallthrough
CT: control target
= control target key end

     0   :  { %14 = vsyncpa [#allocation5], 0  ;;  %s3933_s30 = smov 0   ;;  %s5070_s0 = inlined_call_operand.vmem [shape: f32[2,8,8,8], index: 0, kind: input, shape index: {}]   ;;  %s5071_s1 = inlined_call_operand.vmem [shape: f32[2,72,8], index: 1, kind: input, shape index: {}]   ;;  %s5072_s2 = inlined_call_operand.vmem [shape: f32[2,1,8], index: 2, kind: input, shape index: {}]   ;;  %s5073_s3 = inlined_call_operand.vmem [shape: f32[2,8,8], index: 3, kind: input, shape index: {}]   ;;  %s5074_s4 = inlined_call_operand.vmem [shape: f32[2,1,8], index: 4, kind: input, shape index: {}]   ;;  %s5075_s5 = inlined_call_operand.vmem [shape: f32[72,64], index: 5, kind: input, shape index: {}]   ;;  %s5076_s6 = inlined_call_operand.vmem [shape: f32[1,64], index: 6, kind: input, shape index: {}]   ;;  %s5077_s7 = inlined_call_operand.hbm [shape: f32[576,256], index: 7, kind: input, shape index: {}]   ;;  %s5078_s8 = inlined_call_operand.vmem [shape: f32[1,256], index: 8, kind: input, shape index: {}]   ;;  %s5079_s9 = inlined_call_operand.vmem [shape: f32[2,8,8,256], index: 9, kind: output, shape index: {}]  }
   0x1 LB: > { %s3939_s10 = sadd.s32 4294967295, %s3869_s30   ;;  %p3216_p0 = scmp.ge.s32.totalorder %s3869_s30, 1  ;;  %s3869_s30 = sphi %s3933_s30, %s20_s30  }
   0x2   : > { %p245_p1 = scmp.lt.s32.totalorder %s3869_s30, 3  ;;  %s3871_s11 = smov [#allocation4]  }
   0x3   : > { %s275_s12 = sshll.u32 %s3871_s11, 4  ;;  %p5080_p3 = scmp.eq.s32.totalorder %s3939_s10, 0  ;;  %s276_s12 = int_to_ptr.vmem [resolvable:$true] %s275_s12 }
   0x4   : > { %p3943_p2 = pnand %p3216_p0, %p245_p1  ;;  %s3831_s17 = scalar_lea.hbm %s5077_s7, 18432 }
   0x5   : > { %p3832_p6 = scmp.ne.s32.totalorder %s5077_s7, %s3831_s17  ;;  %p3838_p10 = scmp.lt.u32.totalorder %s3831_s17, %s5077_s7 }
   0x6   : > { %s5082_s13 = scalar_select %p3943_p2, 1, 0 }
   0x7   : > { %p3725_p4 = pneg %p3943_p2 }
   0x9   : > { %p3952_p5 = pnand %p5080_p3, %p3725_p4 }
   0xb   : > { %p3833_p7 = pneg %p3952_p5 }
   0xd   : > { %p3834_p8 = pnand %p3833_p7, %p3832_p6 }
   0xf   : > { %p3835_p9 = pneg %p3834_p8 }
  0x11   : > { %p3840_p11 = pnand %p3838_p10, %p3835_p9 }
  0x13   : > { %3843 = shalt.err (!%p3840_p11)
}
  0x14   : > { %s3844_s22 = scalar_lea.vmem %s276_s12, 18432  ;;  %p3852_p1 = scmp.lt.s32.totalorder %s276_s12, %s276_s12 }
  0x15   : > { %p3845_p12 = scmp.ne.s32.totalorder %s276_s12, %s3844_s22  ;;  %p3853_p4 = scmp.lt.s32.totalorder %s3844_s22, %s3844_s22 }
  0x17   : > { %p3847_p13 = pnand %p3845_p12, %p3833_p7  ;;  %p3854_p3 = por %p3853_p4, %p3852_p1 }
  0x19   : > { %p3848_p0 = pneg %p3847_p13 }
  0x1b   : > { %p3855_p2 = pnand %p3854_p3, %p3848_p0 }
  0x1d   : > { %3858 = shalt.err (!%p3855_p2)
}
  0x1e   : > { %s3872_s23 = smov 256   ;;  %s3873_s24 = smov 16  }
  0x1f   : > { %3728 = dma.hbm_to_vmem [thread:$0]  (!%p3952_p5), %s5077_s7, 18432, %s276_s12, [#allocation5], %s3872_s23, %s3872_s23, %s3873_s24  }
  0x20   : > { %p5084_p6 = scmp.ne.s32.totalorder %s5082_s13, 0 }
  0x21   : > { %p5085_p8 = scmp.eq.s32.totalorder (!%p5084_p6), %s3939_s10, 0 }
  0x22   : > { %302 = sbr.rel (%p5084_p6) target bundleno = 2137 (0x859), region = 56 }
  0x29   : > { %3864 = dma.done.wait (%p5085_p8), [#allocation5], 18432   ;;  %p5086_p7 = pmov %p5085_p8 }
  0x2a   : > { %vm348_vm0 = vcmask 64512   ;;  %vm350_vm1 = vcmask 58368   ;;  %v3874_v0 = vmov 0.0   ;;  %p338_p2 = scmp.lt.s32.totalorder %s3939_s10, 1  ;;  %s3875_s12 = smov 16   ;;  %v816_v24 = vld [vmem:[%s5071_s1] sm:$0xff] }
  0x2b   : > { %3866 = vsyncadd (%p5086_p7), [#allocation5], 4294948864  ;;  %349 = vst.msk [vmem:[#allocation2] sm:$0xff] %vm348_vm0, %v3874_v0  ;;  %s3876_s13 = smov 8   ;;  %s3877_s14 = smov 24   ;;  %v817_v25 = vld [vmem:[%s5071_s1 + $0x8] sm:$0xff] }
  0x2c   : > { %351 = vst.msk [vmem:[#allocation2 + $0x8] sm:$0x3] %vm350_vm1, %v3874_v0  ;;  %353 = vst.msk [vmem:[#allocation2 + $0x18] sm:$0x3] %vm350_vm1, %v3874_v0  ;;  %s5088_s10 = smov (!%p338_p2, %s3939_s10), 1  ;;  %s3878_s15 = smov 32   ;;  %v3481_v26 = vpack.c.bf16 %v817_v25, %v816_v24 }
  0x2d   : > { %352 = vst.msk [vmem:[#allocation2 + $0x10] sm:$0xff] %vm348_vm0, %v3874_v0  ;;  %354 = vst.msk [vmem:[#allocation2 + $0x20] sm:$0xff] %vm348_vm0, %v3874_v0  ;;  %s3292_s27 = sshll.u32 %s5088_s10, 6  ;;  %s3879_s20 = smov 40   ;;  %v818_v29 = vld [vmem:[%s5071_s1 + $0x10] sm:$0xff]  ;;  %v819_v30 = vld [vmem:[%s5071_s1 + $0x18] sm:$0xff] }
  0x2e   : > { %355 = vst.msk [vmem:[#allocation2 + $0x28] sm:$0x3] %vm350_vm1, %v3874_v0  ;;  %357 = vst.msk [vmem:[#allocation2 + $0x38] sm:$0x3] %vm350_vm1, %v3874_v0  ;;  %s342_s11 = scalar_lea.vmem %s5070_s0, %s3292_s27  ;;  %3482 = vmatprep.subr.bf16.mxu0 %v3481_v26  ;;  %v3485_v31 = vpack.c.bf16 %v819_v30, %v818_v29  ;;  %v820_v32 = vld [vmem:[%s5071_s1 + $0x20] sm:$0xff]  ;;  %v821_v33 = vld [vmem:[%s5071_s1 + $0x28] sm:$0xff] }
  0x2f   : > { %356 = vst.msk [vmem:[#allocation2 + $0x30] sm:$0xff] %vm348_vm0, %v3874_v0  ;;  %358 = vst.msk [vmem:[#allocation2 + $0x40] sm:$0xff] %vm348_vm0, %v3874_v0  ;;  %v4026_v1 = vld [vmem:[%s342_s11] sm:$0xff]  ;;  %v4028_v2 = vld [vmem:[%s342_s11 + $0x8] sm:$0xff]  ;;  %3484 = vmatpush3.bf16.msra.mxu0 %v3481_v26  ;;  %s3880_s29 = smov 48   ;;  %v3489_v34 = vpack.c.bf16 %v821_v33, %v820_v32  ;;  %vm370_vm2 = vcmask 523264  }
  0x30   : > { %359 = vst.msk [vmem:[#allocation2 + $0x48] sm:$0x3] %vm350_vm1, %v3874_v0  ;;  %361 = vst.msk [vmem:[#allocation2 + $0x58] sm:$0x3] %vm350_vm1, %v3874_v0  ;;  %v4030_v3 = vld [vmem:[%s342_s11 + $0x10] sm:$0xff]  ;;  %v400_v6 = vmax.f32 %v4026_v1, 0.0  ;;  %3486 = vmatprep.subr.bf16.mxu0 %v3485_v31 }
  0x31   : > { %360 = vst.msk [vmem:[#allocation2 + $0x50] sm:$0xff] %vm348_vm0, %v3874_v0  ;;  %362 = vst.msk [vmem:[#allocation2 + $0x60] sm:$0xff] %vm348_vm0, %v3874_v0  ;;  %v401_v7 = vmax.f32 %v4028_v2, 0.0  ;;  %v402_v8 = vmax.f32 %v4030_v3, 0.0  ;;  %v4039_v9 = vld [vmem:[%s342_s11 + $0x18] sm:$0xff]  ;;  %v4046_v11 = vld [vmem:[%s342_s11 + $0x20] sm:$0xff] }
  0x32   : > { %363 = vst.msk [vmem:[#allocation2 + $0x68] sm:$0x3] %vm350_vm1, %v3874_v0  ;;  %365 = vst.msk [vmem:[#allocation2 + $0x78] sm:$0x3] %vm350_vm1, %v3874_v0  ;;  %v403_v10 = vmax.f32 %v4039_v9, 0.0  ;;  %v4048_v12 = vld [vmem:[%s342_s11 + $0x28] sm:$0xff] }
  0x33   : > { %364 = vst.msk [vmem:[#allocation2 + $0x70] sm:$0xff] %vm348_vm0, %v3874_v0  ;;  %366 = vst.msk [vmem:[#allocation2 + $0x80] sm:$0xff] %vm348_vm0, %v3874_v0  ;;  %v4032_v4 = vld [vmem:[#allocation2 + $0x2] sm:$0xff]  ;;  %v404_v13 = vmax.f32 %v4046_v11, 0.0  ;;  %v405_v14 = vmax.f32 %v4048_v12, 0.0  ;;  %v4055_v15 = vld [vmem:[%s342_s11 + $0x30] sm:$0xff]  ;;  %3488 = vmatpush3.bf16.msra.mxu0 %v3485_v31 }
  0x34   : > { %367 = vst.msk [vmem:[#allocation2 + $0x88] sm:$0x3] %vm350_vm1, %v3874_v0  ;;  %369 = vst.msk [vmem:[#allocation2 + $0x98] sm:$0x3] %vm350_vm1, %v3874_v0  ;;  %v4034_v5 = vld [vmem:[#allocation2 + $0x1] sm:$0xff]  ;;  %530 = vrot.lane.b32.xlu1 %v4032_v4, %s3875_s12  ;;  %v4057_v16 = vld [vmem:[%s342_s11 + $0x38] sm:$0xff]  ;;  %3490 = vmatprep.subr.bf16.mxu0 %v3489_v34 }
  0x35   : > { %368 = vst.msk [vmem:[#allocation2 + $0x90] sm:$0xff] %vm348_vm0, %v3874_v0  ;;  %498 = vrot.lane.b32.xlu0 %v4034_v5, %s3876_s13  ;;  %409 = vst.msk [vmem:[#allocation2 + $0x11] sm:$0xff] %vm348_vm0, %v400_v6  ;;  %v406_v17 = vmax.f32 %v4055_v15, 0.0  ;;  %v407_v18 = vmax.f32 %v4057_v16, 0.0  ;;  %v822_v37 = vld [vmem:[%s5071_s1 + $0x30] sm:$0xff]  ;;  %v823_v38 = vld [vmem:[%s5071_s1 + $0x38] sm:$0xff] }
  0x36   : > { %410 = vst.msk [vmem:[#allocation2 + $0x21] sm:$0xff] %vm348_vm0, %v401_v7  ;;  %411 = vst.msk [vmem:[#allocation2 + $0x31] sm:$0xff] %vm348_vm0, %v402_v8  ;;  %v3493_v39 = vpack.c.bf16 %v823_v38, %v822_v37  ;;  %v824_v40 = vld [vmem:[%s5071_s1 + $0x40] sm:$0xff]  ;;  %s3881_s22 = smov 56   ;;  %s3882_s23 = smov 64   ;;  %vm754_vm3 = vcmask 130048  }
  0x37   : > { %412 = vst.msk [vmem:[#allocation2 + $0x41] sm:$0xff] %vm348_vm0, %v403_v10  ;;  %413 = vst.msk [vmem:[#allocation2 + $0x51] sm:$0xff] %vm348_vm0, %v404_v13  ;;  %3492 = vmatpush3.bf16.msra.mxu0 %v3489_v34  ;;  %v4213_v24 = vld [vmem:[#allocation2] sm:$0xff]  ;;  %vm763_vm4 = vcmask 195584   ;;  %vm772_vm5 = vcmask 261120   ;;  %vm781_vm6 = vcmask 326656  }
  0x38   : > { %414 = vst.msk [vmem:[#allocation2 + $0x61] sm:$0xff] %vm348_vm0, %v405_v14  ;;  %415 = vst.msk [vmem:[#allocation2 + $0x71] sm:$0xff] %vm348_vm0, %v406_v17  ;;  %3494 = vmatprep.subr.bf16.mxu0 %v3493_v39  ;;  %vm790_vm7 = vcmask 392192   ;;  %vm799_vm8 = vcmask 457728   ;;  %vm832_vm9 = vcmask 588800   ;;  %vm372_vm10 = vcmask 517120  }
  0x39   : > { %416 = vst.msk [vmem:[#allocation2 + $0x81] sm:$0xff] %vm348_vm0, %v407_v18 }
  0x3a   : > { %371 = vst.msk [vmem:[#allocation3] sm:$0xff] %vm370_vm2, %v3874_v0  ;;  %374 = vst.msk [vmem:[#allocation3 + $0x10] sm:$0xff] %vm370_vm2, %v3874_v0 }
  0x3b   : > { %376 = vst.msk [vmem:[#allocation3 + $0x20] sm:$0xff] %vm370_vm2, %v3874_v0  ;;  %378 = vst.msk [vmem:[#allocation3 + $0x30] sm:$0xff] %vm370_vm2, %v3874_v0  ;;  %3496 = vmatpush3.bf16.msra.mxu0 %v3493_v39 }
  0x3c   : > { %v434_v19 = vld [vmem:[#allocation2 + $0x12] sm:$0xff]  ;;  %380 = vst.msk [vmem:[#allocation3 + $0x40] sm:$0xff] %vm370_vm2, %v3874_v0  ;;  %382 = vst.msk [vmem:[#allocation3 + $0x50] sm:$0xff] %vm370_vm2, %v3874_v0  ;;  %3379 = vmatprep.subr.mxu0 %v824_v40 }
  0x3d   : > { %v426_v20 = vld [vmem:[#allocation2 + $0x11] sm:$0xff]  ;;  %532 = vrot.lane.b32.xlu1 %v434_v19, %s3875_s12  ;;  %v4068_v21 = vld [vmem:[#allocation2 + $0x20] sm:$0xff]  ;;  %384 = vst.msk [vmem:[#allocation3 + $0x60] sm:$0xff] %vm370_vm2, %v3874_v0  ;;  %386 = vst.msk [vmem:[#allocation3 + $0x70] sm:$0xff] %vm370_vm2, %v3874_v0 }
  0x3e   : > { %500 = vrot.lane.b32.xlu0 %v426_v20, %s3876_s13  ;;  %v4070_v22 = vld [vmem:[#allocation2 + $0x10] sm:$0xff]  ;;  %v427_v23 = vld [vmem:[#allocation2 + $0x21] sm:$0xff]  ;;  %388 = vst.msk [vmem:[#allocation3 + $0x80] sm:$0xff] %vm370_vm2, %v3874_v0  ;;  %390 = vst.msk [vmem:[#allocation3 + $0x90] sm:$0xff] %vm370_vm2, %v3874_v0 }
  0x3f   : > { %v435_v27 = vld [vmem:[#allocation2 + $0x22] sm:$0xff]  ;;  %v428_v28 = vld [vmem:[#allocation2 + $0x31] sm:$0xff]  ;;  %3380 = vmatpush3.msra.mxu0 %v824_v40  ;;  %377 = vst.msk [vmem:[#allocation3 + $0x28] sm:$0x3] %vm372_vm10, %v3874_v0  ;;  %373 = vst.msk [vmem:[#allocation3 + $0x8] sm:$0x3] %vm372_vm10, %v3874_v0 }
  0x40   : > { %v4103_v35 = vld [vmem:[#allocation2 + $0x30] sm:$0xff]  ;;  %v4140_v41 = vld [vmem:[#allocation2 + $0x40] sm:$0xff]  ;;  %375 = vst.msk [vmem:[#allocation3 + $0x18] sm:$0x3] %vm372_vm10, %v3874_v0  ;;  %379 = vst.msk [vmem:[#allocation3 + $0x38] sm:$0x3] %vm372_vm10, %v3874_v0 }
  0x41   : > { %564 = vrot.lane.b32.xlu1 %v4068_v21, %s3877_s14  ;;  %v436_v36 = vld [vmem:[#allocation2 + $0x32] sm:$0xff]  ;;  %v452_v42 = vld [vmem:[#allocation2 + $0x41] sm:$0xff]  ;;  %381 = vst.msk [vmem:[#allocation3 + $0x48] sm:$0x3] %vm372_vm10, %v3874_v0  ;;  %383 = vst.msk [vmem:[#allocation3 + $0x58] sm:$0x3] %vm372_vm10, %v3874_v0 }
  0x42   : > { %562 = vrot.lane.b32.xlu0 %v4070_v22, %s3877_s14  ;;  %v460_v43 = vld [vmem:[#allocation2 + $0x42] sm:$0xff]  ;;  %v430_v44 = vld [vmem:[#allocation2 + $0x51] sm:$0xff]  ;;  %385 = vst.msk [vmem:[#allocation3 + $0x68] sm:$0x3] %vm372_vm10, %v3874_v0  ;;  %387 = vst.msk [vmem:[#allocation3 + $0x78] sm:$0x3] %vm372_vm10, %v3874_v0 }
  0x43   : > { %v4156_v45 = vld [vmem:[#allocation2 + $0x50] sm:$0xff]  ;;  %v4166_v47 = vld [vmem:[#allocation2 + $0x60] sm:$0xff]  ;;  %389 = vst.msk [vmem:[#allocation3 + $0x88] sm:$0x3] %vm372_vm10, %v3874_v0  ;;  %391 = vst.msk [vmem:[#allocation3 + $0x98] sm:$0x3] %vm372_vm10, %v3874_v0 }
  0x44   : > { %v438_v46 = vld [vmem:[#allocation2 + $0x52] sm:$0xff]  ;;  %v454_v48 = vld [vmem:[#allocation2 + $0x61] sm:$0xff] }
  0x45   : > { %502 = vrot.lane.b32.xlu1 %v427_v23, %s3876_s13  ;;  %v462_v49 = vld [vmem:[#allocation2 + $0x62] sm:$0xff]  ;;  %v432_v50 = vld [vmem:[#allocation2 + $0x71] sm:$0xff] }
  0x46   : > { %594 = vrot.lane.b32.xlu0 %v426_v20, %s3878_s15  ;;  %v4180_v51 = vld [vmem:[#allocation2 + $0x70] sm:$0xff]  ;;  %v448_v53 = vld [vmem:[#allocation2 + $0x80] sm:$0xff] }
  0x47   : > { %v440_v52 = vld [vmem:[#allocation2 + $0x72] sm:$0xff]  ;;  %v456_v54 = vld [vmem:[#allocation2 + $0x81] sm:$0xff] }
  0x48   : > { %v464_v55 = vld [vmem:[#allocation2 + $0x82] sm:$0xff]  ;;  %v473_v58 = vld [vmem:[#allocation2 + $0x90] sm:$0xff] }
  0x49   : > { %626 = vrot.lane.b32.xlu1 %v434_v19, %s3879_s20  ;;  %v4198_v59 = vld [vmem:[#allocation2 + $0x91] sm:$0xff] }
  0x4a   : > { %596 = vrot.lane.b32.xlu0 %v427_v23, %s3878_s15  ;;  %v4203_v62 = vld [vmem:[#allocation2 + $0x92] sm:$0xff] }
  0x4d   : > { %534 = vrot.lane.b32.xlu1 %v435_v27, %s3875_s12 }
  0x4e   : > { %504 = vrot.lane.b32.xlu0 %v428_v28, %s3876_s13 }
  0x51   : > { %658 = vrot.lane.b32.xlu1 %v4068_v21, %s3880_s29 }
  0x52   : > { %628 = vrot.lane.b32.xlu0 %v435_v27, %s3879_s20 }
  0x55   : > { %566 = vrot.lane.b32.xlu1 %v4103_v35, %s3877_s14 }
  0x56   : > { %536 = vrot.lane.b32.xlu0 %v436_v36, %s3875_s12 }
  0x59   : > { %690 = vrot.lane.b32.xlu1 %v427_v23, %s3881_s22 }
  0x5a   : > { %660 = vrot.lane.b32.xlu0 %v4103_v35, %s3880_s29 }
  0x5d   : > { %598 = vrot.lane.b32.xlu1 %v428_v28, %s3878_s15 }
  0x5e   : > { %568 = vrot.lane.b32.xlu0 %v4140_v41, %s3877_s14 }
  0x61   : > { %722 = vrot.lane.b32.xlu1 %v435_v27, %s3882_s23 }
  0x62   : > { %692 = vrot.lane.b32.xlu0 %v428_v28, %s3881_s22 }
  0x65   : > { %630 = vrot.lane.b32.xlu1 %v436_v36, %s3879_s20 }
  0x66   : > { %600 = vrot.lane.b32.xlu0 %v452_v42, %s3878_s15 }
  0x69   : > { %506 = vrot.lane.b32.xlu1 %v452_v42, %s3876_s13 }
  0x6a   : > { %724 = vrot.lane.b32.xlu0 %v436_v36, %s3882_s23 }
  0x6d   : > { %662 = vrot.lane.b32.xlu1 %v4140_v41, %s3880_s29 }
  0x6e   : > { %632 = vrot.lane.b32.xlu0 %v460_v43, %s3879_s20 }
  0x71   : > { %538 = vrot.lane.b32.xlu1 %v460_v43, %s3875_s12 }
  0x72   : > { %508 = vrot.lane.b32.xlu0 %v430_v44, %s3876_s13 }
  0x75   : > { %694 = vrot.lane.b32.xlu1 %v452_v42, %s3881_s22 }
  0x76   : > { %664 = vrot.lane.b32.xlu0 %v4156_v45, %s3880_s29 }
  0x79   : > { %570 = vrot.lane.b32.xlu1 %v4156_v45, %s3877_s14 }
  0x7a   : > { %540 = vrot.lane.b32.xlu0 %v438_v46, %s3875_s12 }
  0x7d   : > { %726 = vrot.lane.b32.xlu1 %v460_v43, %s3882_s23 }
  0x7e   : > { %696 = vrot.lane.b32.xlu0 %v430_v44, %s3881_s22 }
  0x81   : > { %602 = vrot.lane.b32.xlu1 %v430_v44, %s3878_s15 }
  0x82   : > { %572 = vrot.lane.b32.xlu0 %v4166_v47, %s3877_s14 }
  0x85   : > { %604 = vrot.lane.b32.xlu1 %v454_v48, %s3878_s15 }
  0x86   : > { %728 = vrot.lane.b32.xlu0 %v438_v46, %s3882_s23 }
  0x89   : > { %510 = vrot.lane.b32.xlu1 %v454_v48, %s3876_s13 }
  0x8a   : > { %634 = vrot.lane.b32.xlu0 %v438_v46, %s3879_s20 }
  0x8d   : > { %666 = vrot.lane.b32.xlu1 %v4166_v47, %s3880_s29 }
  0x8e   : > { %636 = vrot.lane.b32.xlu0 %v462_v49, %s3879_s20 }
  0x91   : > { %542 = vrot.lane.b32.xlu1 %v462_v49, %s3875_s12 }
  0x92   : > { %512 = vrot.lane.b32.xlu0 %v432_v50, %s3876_s13 }
  0x95   : > { %698 = vrot.lane.b32.xlu1 %v454_v48, %s3881_s22 }
  0x96   : > { %668 = vrot.lane.b32.xlu0 %v4180_v51, %s3880_s29 }
  0x99   : > { %574 = vrot.lane.b32.xlu1 %v4180_v51, %s3877_s14 }
  0x9a   : > { %544 = vrot.lane.b32.xlu0 %v440_v52, %s3875_s12 }
  0x9d   : > { %730 = vrot.lane.b32.xlu1 %v462_v49, %s3882_s23 }
  0x9e   : > { %700 = vrot.lane.b32.xlu0 %v432_v50, %s3881_s22 }
  0xa1   : > { %606 = vrot.lane.b32.xlu1 %v432_v50, %s3878_s15 }
  0xa2   : > { %576 = vrot.lane.b32.xlu0 %v448_v53, %s3877_s14 }
  0xa5   : > { %608 = vrot.lane.b32.xlu1 %v456_v54, %s3878_s15 }
  0xa6   : > { %732 = vrot.lane.b32.xlu0 %v440_v52, %s3882_s23  ;;  %v531_v56 = vpop.permute.xlu1 %530 }
  0xa7   : > { %v499_v57 = vpop.permute.xlu0 %498 }
  0xa8   : > { %v746_v25 = vsel %vm348_vm0, %v4213_v24, %v499_v57 }
  0xa9   : > { %640 = vrot.lane.b32.xlu1 %v464_v55, %s3879_s20  ;;  %v755_v27 = vsel %vm754_vm3, %v746_v25, %v531_v56 }
  0xaa   : > { %638 = vrot.lane.b32.xlu0 %v440_v52, %s3879_s20 }
  0xad   : > { %672 = vrot.lane.b32.xlu1 %v473_v58, %s3880_s29 }
  0xae   : > { %670 = vrot.lane.b32.xlu0 %v448_v53, %s3880_s29 }
  0xaf   : > { %v533_v60 = vpop.permute.xlu1 %532 }
  0xb0   : > { %v501_v61 = vpop.permute.xlu0 %500 }
  0xb1   : > { %704 = vrot.lane.b32.xlu1 %v4198_v59, %s3881_s22  ;;  %v747_v33 = vsel %vm348_vm0, %v4070_v22, %v501_v61 }
  0xb2   : > { %702 = vrot.lane.b32.xlu0 %v456_v54, %s3881_s22  ;;  %v756_v39 = vsel %vm754_vm3, %v747_v33, %v533_v60 }
  0xb3   : > { %v565_v63 = vpop.permute.xlu1 %564 }
  0xb4   : > { %v563_v6 = vpop.permute.xlu0 %562  ;;  %v765_v40 = vsel %vm763_vm4, %v756_v39, %v565_v63 }
  0xb5   : > { %736 = vrot.lane.b32.xlu1 %v4203_v62, %s3882_s23 }
  0xb6   : > { %734 = vrot.lane.b32.xlu0 %v464_v55, %s3882_s23 }
  0xb7   : > { %v503_v7 = vpop.permute.xlu1 %502 }
  0xb8   : > { %v595_v8 = vpop.permute.xlu0 %594  ;;  %v748_v57 = vsel %vm348_vm0, %v4068_v21, %v503_v7 }
  0xb9   : > { %1385 = vrot.lane.b32.xlu1 %v473_v58, %s3880_s29 }
  0xba   : > { %1211 = vrot.lane.b32.xlu0 %v4034_v5, %s3876_s13 }
  0xbb   : > { %v627_v10 = vpop.permute.xlu1 %626 }
  0xbc   : > { %v597_v13 = vpop.permute.xlu0 %596 }
  0xbd   : > { %v774_v44 = vsel %vm772_vm5, %v765_v40, %v597_v13 }
  0xbe   : > { %1243 = vrot.lane.b32.xlu0 %v4032_v4, %s3875_s12  ;;  %v764_v4 = vsel %vm763_vm4, %v755_v27, %v563_v6 }
  0xbf   : > { %v535_v14 = vpop.permute.xlu1 %534  ;;  %v773_v30 = vsel %vm772_vm5, %v764_v4, %v595_v8 }
  0xc0   : > { %v505_v17 = vpop.permute.xlu0 %504  ;;  %v782_v31 = vsel %vm781_vm6, %v773_v30, %v627_v10  ;;  %v757_v61 = vsel %vm754_vm3, %v748_v57, %v535_v14 }
  0xc1   : > { %v749_v7 = vsel %vm348_vm0, %v4103_v35, %v505_v17 }
  0xc3   : > { %v659_v18 = vpop.permute.xlu1 %658 }
  0xc4   : > { %v629_v19 = vpop.permute.xlu0 %628  ;;  %v791_v32 = vsel %vm790_vm7, %v782_v31, %v659_v18 }
  0xc5   : > { %v783_v46 = vsel %vm781_vm6, %v774_v44, %v629_v19 }
  0xc7   : > { %v567_v20 = vpop.permute.xlu1 %566 }
  0xc8   : > { %v537_v23 = vpop.permute.xlu0 %536  ;;  %v766_v63 = vsel %vm763_vm4, %v757_v61, %v567_v20 }
  0xc9   : > { %v758_v14 = vsel %vm754_vm3, %v749_v7, %v537_v23 }
  0xcb   : > { %v691_v5 = vpop.permute.xlu1 %690 }
  0xcc   : > { %v661_v26 = vpop.permute.xlu0 %660  ;;  %v800_v34 = vsel %vm799_vm8, %v791_v32, %v691_v5 }
  0xcd   : > { %v792_v22 = vsel %vm790_vm7, %v783_v46, %v661_v26 }
  0xcf   : > { %v599_v28 = vpop.permute.xlu1 %598 }
  0xd0   : > { %v569_v29 = vpop.permute.xlu0 %568  ;;  %v775_v10 = vsel %vm772_vm5, %v766_v63, %v599_v28 }
  0xd1   : > { %v767_v20 = vsel %vm763_vm4, %v758_v14, %v569_v29 }
  0xd3   : > { %v723_v36 = vpop.permute.xlu1 %722 }
  0xd4   : > { %v693_v37 = vpop.permute.xlu0 %692  ;;  %v808_v38 = vsel %vm370_vm2, %v800_v34, %v723_v36 }
  0xd5   : > { %3381 = vmatprep.mubr.msk.f32.mxu0 %vm832_vm9, %v808_v38  ;;  %v801_v48 = vsel %vm799_vm8, %v792_v22, %v693_v37 }
  0xd7   : > { %v631_v42 = vpop.permute.xlu1 %630 }
  0xd8   : > { %v601_v43 = vpop.permute.xlu0 %600  ;;  %v784_v13 = vsel %vm781_vm6, %v775_v10, %v631_v42 }
  0xd9   : > { %v776_v4 = vsel %vm772_vm5, %v767_v20, %v601_v43 }
  0xdb   : > { %v507_v49 = vpop.permute.xlu1 %506 }
  0xdc   : > { %v725_v50 = vpop.permute.xlu0 %724  ;;  %v750_v38 = vsel %vm348_vm0, %v4140_v41, %v507_v49 }
  0xdd   : > { %v809_v52 = vsel %vm370_vm2, %v801_v48, %v725_v50 }
  0xde   : > { %3382 = vmatmul.mubr.msk.f32.vlgmr.msra.gmra.mrb[0].mxu0 %vm832_vm9, %v809_v52 }
  0xdf   : > { %v663_v53 = vpop.permute.xlu1 %662 }
  0xe0   : > { %v633_v54 = vpop.permute.xlu0 %632  ;;  %v793_v18 = vsel %vm790_vm7, %v784_v13, %v663_v53 }
  0xe1   : > { %v785_v28 = vsel %vm781_vm6, %v776_v4, %v633_v54 }
  0xe3   : > { %v539_v55 = vpop.permute.xlu1 %538 }
  0xe4   : > { %v509_v56 = vpop.permute.xlu0 %508  ;;  %v759_v42 = vsel %vm754_vm3, %v750_v38, %v539_v55 }
  0xe5   : > { %v751_v49 = vsel %vm348_vm0, %v4156_v45, %v509_v56 }
  0xe7   : > { %v695_v58 = vpop.permute.xlu1 %694 }
  0xe8   : > { %v665_v60 = vpop.permute.xlu0 %664  ;;  %v802_v19 = vsel %vm799_vm8, %v793_v18, %v695_v58 }
  0xe9   : > { %v794_v30 = vsel %vm790_vm7, %v785_v28, %v665_v60 }
  0xeb   : > { %v571_v6 = vpop.permute.xlu1 %570 }
  0xec   : > { %v541_v8 = vpop.permute.xlu0 %540  ;;  %v768_v43 = vsel %vm763_vm4, %v759_v42, %v571_v6 }
  0xed   : > { %v760_v55 = vsel %vm754_vm3, %v751_v49, %v541_v8 }
  0xef   : > { %v727_v25 = vpop.permute.xlu1 %726 }
  0xf0   : > { %v697_v5 = vpop.permute.xlu0 %696  ;;  %v810_v21 = vsel %vm370_vm2, %v802_v19, %v727_v25 }
  0xf1   : > { %3384 = vmatprep.mubr.msk.f32.mxu0 %vm832_vm9, %v810_v21  ;;  %v803_v31 = vsel %vm799_vm8, %v794_v30, %v697_v5 }
  0xf3   : > { %v603_v26 = vpop.permute.xlu1 %602 }
  0xf4   : > { %v573_v27 = vpop.permute.xlu0 %572  ;;  %v777_v22 = vsel %vm772_vm5, %v768_v43, %v603_v26 }
  0xf5   : > { %v769_v57 = vsel %vm763_vm4, %v760_v55, %v573_v27 }
  0xf7   : > { %v605_v32 = vpop.permute.xlu1 %604 }
  0xf8   : > { %v729_v33 = vpop.permute.xlu0 %728  ;;  %v778_v61 = vsel %vm772_vm5, %v769_v57, %v605_v32 }
  0xf9   : > { %v811_v35 = vsel %vm370_vm2, %v803_v31, %v729_v33 }
  0xfa   : > { %3385 = vmatmul.mubr.msk.f32.gmra.mrb[2].mxu0 %vm832_vm9, %v811_v35 }
  0xfb   : > { %v511_v17 = vpop.permute.xlu1 %510 }
  0xfc   : > { %v635_v23 = vpop.permute.xlu0 %634  ;;  %v752_v19 = vsel %vm348_vm0, %v4166_v47, %v511_v17 }
  0xfd   : > { %v786_v48 = vsel %vm781_vm6, %v777_v22, %v635_v23 }
  0xff   : > { %v667_v34 = vpop.permute.xlu1 %666 }
 0x100   : > { %v637_v29 = vpop.permute.xlu0 %636  ;;  %v795_v50 = vsel %vm790_vm7, %v786_v48, %v667_v34 }
 0x101   : > { %v787_v63 = vsel %vm781_vm6, %v778_v61, %v637_v29 }
 0x103   : > { %v543_v36 = vpop.permute.xlu1 %542 }
 0x104   : > { %v513_v37 = vpop.permute.xlu0 %512  ;;  %v761_v7 = vsel %vm754_vm3, %v752_v19, %v543_v36  ;;  %v970_v36 = vld [vmem:[%s5073_s3] sm:$0xff] }
 0x105   : > { %v753_v21 = vsel %vm348_vm0, %v4180_v51, %v513_v37  ;;  %3393 = vmatprep.subr.mxu1 %v970_v36  ;;  %v3225_v37 = vld [vmem:[%s5072_s2] ss:$0 sm:$0xff] }
 0x106   : > { %3394 = vmatpush3.msra.mxu1 %v970_v36 }
 0x107   : > { %v699_v39 = vpop.permute.xlu1 %698 }
 0x108   : > { %v669_v40 = vpop.permute.xlu0 %668  ;;  %v804_v52 = vsel %vm799_vm8, %v795_v50, %v699_v39 }
 0x109   : > { %v796_v6 = vsel %vm790_vm7, %v787_v63, %v669_v40 }
 0x10b   : > { %v575_v44 = vpop.permute.xlu1 %574 }
 0x10c   : > { %v545_v46 = vpop.permute.xlu0 %544  ;;  %v770_v20 = vsel %vm763_vm4, %v761_v7, %v575_v44 }
 0x10d   : > { %v762_v14 = vsel %vm754_vm3, %v753_v21, %v545_v46 }
 0x10f   : > { %v731_v53 = vpop.permute.xlu1 %730 }
 0x110   : > { %v701_v54 = vpop.permute.xlu0 %700  ;;  %v812_v41 = vsel %vm370_vm2, %v804_v52, %v731_v53 }
 0x111   : > { %3387 = vmatprep.mubr.msk.f32.mxu0 %vm832_vm9, %v812_v41  ;;  %v805_v10 = vsel %vm799_vm8, %v796_v6, %v701_v54 }
 0x113   : > { %v607_v58 = vpop.permute.xlu1 %606 }
 0x114   : > { %v577_v60 = vpop.permute.xlu0 %576  ;;  %v779_v28 = vsel %vm772_vm5, %v770_v20, %v607_v58 }
 0x115   : > { %v771_v26 = vsel %vm763_vm4, %v762_v14, %v577_v60 }
 0x117   : > { %v609_v13 = vpop.permute.xlu1 %608 }
 0x118   : > { %v733_v18 = vpop.permute.xlu0 %732  ;;  %v780_v30 = vsel %vm772_vm5, %v771_v26, %v609_v13 }
 0x119   : > { %v813_v45 = vsel %vm370_vm2, %v805_v10, %v733_v18  ;;  %v4312_v18 = vld [vmem:[%s5074_s4] ss:$0 sm:$0xff] }
 0x11a   : > { %3388 = vmatmul.mubr.msk.f32.gmra.mrb[4].mxu0 %vm832_vm9, %v813_v45 }
 0x11b   : > { %v641_v56 = vpop.permute.xlu1 %640 }
 0x11c   : > { %v639_v8 = vpop.permute.xlu0 %638  ;;  %v789_v47 = vsel %vm781_vm6, %v780_v30, %v641_v56 }
 0x11d   : > { %v788_v31 = vsel %vm781_vm6, %v779_v28, %v639_v8 }
 0x11f   : > { %v673_v25 = vpop.permute.xlu1 %672 }
 0x120   : > { %v671_v5 = vpop.permute.xlu0 %670  ;;  %v798_v51 = vsel %vm790_vm7, %v789_v47, %v673_v25 }
 0x121   : > { %v797_v32 = vsel %vm790_vm7, %v788_v31, %v671_v5 }
 0x123   : > { %v705_v27 = vpop.permute.xlu1 %704 }
 0x124   : > { %v703_v4 = vpop.permute.xlu0 %702  ;;  %v807_v33 = vsel %vm799_vm8, %v798_v51, %v705_v27 }
 0x125   : > { %v806_v35 = vsel %vm799_vm8, %v797_v32, %v703_v4 }
 0x127   : > { %v737_v17 = vpop.permute.xlu1 %736 }
 0x128   : > { %v735_v23 = vpop.permute.xlu0 %734  ;;  %v815_v34 = vsel %vm370_vm2, %v807_v33, %v737_v17  ;;  %v3244_v33 = vld [vmem:[%s5071_s1 + $0x50] sm:$0xff] }
 0x129   : > { %v814_v29 = vsel %vm370_vm2, %v806_v35, %v735_v23  ;;  %v3245_v23 = vld [vmem:[%s5071_s1 + $0x58] sm:$0xff] }
 0x12a   : > { %3390 = vmatprep.mubr.msk.f32.mxu0 %vm832_vm9, %v814_v29 }
 0x12b   : > { %3391 = vmatmul.mubr.msk.f32.gmra.mrb[6].mxu0 %vm832_vm9, %v815_v34  ;;  %v3246_v34 = vld [vmem:[%s5071_s1 + $0x60] sm:$0xff] }
 0x12c   : > { %v3501_v29 = vpack.c.bf16 %v3246_v34, %v3245_v23 }
 0x1b1   : > { %v3383_v38 = vpop.f32.mrb[0].mxu0 }
 0x1b2   : > { %v929_v39 = vadd.f32 %v3383_v38, %v3225_v37  ;;  %v923_v40 = vpop.f32.mrb[1].mxu0  ;;  %v3248_v38 = vld [vmem:[%s5071_s1 + $0x70] sm:$0xff] }
 0x1b3   : > { %v924_v42 = vadd.f32 %v3225_v37, %v923_v40 }
 0x1b4   : > { %v963_v44 = vmax.f32 %v929_v39, 0.0 }
 0x1b5   : > { %v962_v43 = vmax.f32 %v924_v42, 0.0  ;;  %v3249_v42 = vld [vmem:[%s5071_s1 + $0x78] sm:$0xff] }
 0x1b7   : > { %3395 = vmatprep.mubr.msk.f32.mxu1 %vm348_vm0, %v962_v43  ;;  %v3250_v43 = vld [vmem:[%s5071_s1 + $0x80] sm:$0xff] }
 0x1b8   : > { %3396 = vmatmul.mubr.msk.f32.vlgmr.msra.gmra.mrb[0].mxu1 %vm348_vm0, %v963_v44  ;;  %v3509_v44 = vpack.c.bf16 %v3250_v43, %v3249_v42 }
 0x1cd   : > { %v3386_v46 = vpop.f32.mrb[2].mxu0 }
 0x1ce   : > { %v939_v22 = vadd.f32 %v3386_v46, %v3225_v37  ;;  %v933_v48 = vpop.f32.mrb[3].mxu0 }
 0x1cf   : > { %v934_v50 = vadd.f32 %v3225_v37, %v933_v48 }
 0x1d0   : > { %v965_v53 = vmax.f32 %v939_v22, 0.0  ;;  %v3251_v22 = vld [vmem:[%s5071_s1 + $0x88] sm:$0xff] }
 0x1d1   : > { %v964_v52 = vmax.f32 %v934_v50, 0.0 }
 0x1d3   : > { %3398 = vmatprep.mubr.msk.f32.mxu1 %vm348_vm0, %v964_v52 }
 0x1d4   : > { %3399 = vmatmul.mubr.msk.f32.gmra.mrb[2].mxu1 %vm348_vm0, %v965_v53 }
 0x1ed   : > { %v3389_v54 = vpop.f32.mrb[4].mxu0 }
 0x1ee   : > { %v949_v41 = vadd.f32 %v3389_v54, %v3225_v37  ;;  %v943_v49 = vpop.f32.mrb[5].mxu0 }
 0x1ef   : > { %v944_v55 = vadd.f32 %v3225_v37, %v943_v49 }
 0x1f0   : > { %v967_v58 = vmax.f32 %v949_v41, 0.0 }
 0x1f1   : > { %v966_v57 = vmax.f32 %v944_v55, 0.0 }
 0x1f3   : > { %3401 = vmatprep.mubr.msk.f32.mxu1 %vm348_vm0, %v966_v57 }
 0x1f4   : > { %3402 = vmatmul.mubr.msk.f32.gmra.mrb[4].mxu1 %vm348_vm0, %v967_v58 }
 0x1fe   : > { %v3392_v60 = vpop.f32.mrb[6].mxu0 }
 0x1ff   : > { %v959_v61 = vadd.f32 %v3392_v60, %v3225_v37  ;;  %v953_v63 = vpop.f32.mrb[7].mxu0 }
 0x200   : > { %v954_v6 = vadd.f32 %v3225_v37, %v953_v63  ;;  %v3247_v37 = vld [vmem:[%s5071_s1 + $0x68] sm:$0xff] }
 0x201   : > { %v969_v13 = vmax.f32 %v959_v61, 0.0  ;;  %v3505_v39 = vpack.c.bf16 %v3248_v38, %v3247_v37 }
 0x202   : > { %v968_v10 = vmax.f32 %v954_v6, 0.0 }
 0x204   : > { %3404 = vmatprep.mubr.msk.f32.mxu1 %vm348_vm0, %v968_v10 }
 0x205   : > { %3405 = vmatmul.mubr.msk.f32.gmra.mrb[6].mxu1 %vm348_vm0, %v969_v13 }
 0x28b   : > { %v3397_v45 = vpop.f32.mrb[0].mxu1 }
 0x28c   : > { %v1074_v56 = vadd.f32 %v3397_v45, %v4312_v18  ;;  %v1068_v8 = vpop.f32.mrb[1].mxu1 }
 0x28d   : > { %v1069_v19 = vadd.f32 %v4312_v18, %v1068_v8 }
 0x28e   : > { %v4317_v25 = vadd.f32 %v1074_v56, %v4028_v2 }
 0x28f   : > { %v4320_v5 = vadd.f32 %v1069_v19, %v4026_v1 }
 0x290   : > { %v1116_v21 = vmax.f32 %v4317_v25, 0.0 }
 0x291   : > { %v1115_v7 = vmax.f32 %v4320_v5, 0.0 }
 0x292   : > { %1124 = vst.msk [vmem:[#allocation2 + $0x21] sm:$0xff] %vm348_vm0, %v1116_v21 }
 0x293   : > { %1123 = vst.msk [vmem:[#allocation2 + $0x11] sm:$0xff] %vm348_vm0, %v1115_v7 }
 0x299   : > { %v1164_v14 = vld [vmem:[#allocation2 + $0x21] sm:$0xff] }
 0x29a   : > { %v4326_v20 = vld [vmem:[#allocation2 + $0x20] sm:$0xff]  ;;  %1309 = vrot.lane.b32.xlu0 %v1164_v14, %s3878_s15  ;;  %v4333_v1 = vld [vmem:[#allocation2 + $0x10] sm:$0xff] }
 0x29b   : > { %1277 = vrot.lane.b32.xlu1 %v4326_v20, %s3877_s14  ;;  %v1172_v2 = vld [vmem:[#allocation2 + $0x22] sm:$0xff]  ;;  %v1163_v26 = vld [vmem:[#allocation2 + $0x11] sm:$0xff] }
 0x29c   : > { %v1148_v17 = vld [vmem:[#allocation2 + $0x12] sm:$0xff] }
 0x29e   : > { %1341 = vrot.lane.b32.xlu0 %v1172_v2, %s3879_s20 }
 0x29f   : > { %1215 = vrot.lane.b32.xlu1 %v1164_v14, %s3876_s13 }
 0x2a2   : > { %1275 = vrot.lane.b32.xlu0 %v4333_v1, %s3877_s14 }
 0x2a3   : > { %1247 = vrot.lane.b32.xlu1 %v1172_v2, %s3875_s12 }
 0x2a6   : > { %1307 = vrot.lane.b32.xlu0 %v1163_v26, %s3878_s15 }
 0x2a7   : > { %1371 = vrot.lane.b32.xlu1 %v4326_v20, %s3880_s29  ;;  %v3400_v27 = vpop.f32.mrb[2].mxu1 }
 0x2a8   : > { %v1084_v4 = vadd.f32 %v3400_v27, %v4312_v18  ;;  %v1078_v28 = vpop.f32.mrb[3].mxu1  ;;  %v4468_v27 = vpop.permute.xlu1 %1385 }
 0x2a9   : > { %v1079_v30 = vadd.f32 %v4312_v18, %v1078_v28 }
 0x2aa   : > { %v4344_v47 = vadd.f32 %v1084_v4, %v4039_v9  ;;  %v3243_v9 = vld [vmem:[%s5071_s1 + $0x48] sm:$0xff] }
 0x2ab   : > { %1403 = vrot.lane.b32.xlu1 %v1164_v14, %s3881_s22  ;;  %v4348_v31 = vadd.f32 %v1079_v30, %v4030_v3  ;;  %v3497_v3 = vpack.c.bf16 %v3244_v33, %v3243_v9 }
 0x2ac   : > { %v1118_v51 = vmax.f32 %v4344_v47, 0.0 }
 0x2ad   : > { %v1117_v32 = vmax.f32 %v4348_v31, 0.0  ;;  %3498 = vmatprep.subr.bf16.mxu1 %v3497_v3 }
 0x2ae   : > { %1126 = vst.msk [vmem:[#allocation2 + $0x41] sm:$0xff] %vm348_vm0, %v1118_v51  ;;  %3500 = vmatpush3.bf16.msra.mxu1 %v3497_v3 }
 0x2af   : > { %1435 = vrot.lane.b32.xlu1 %v1172_v2, %s3882_s23  ;;  %1125 = vst.msk [vmem:[#allocation2 + $0x31] sm:$0xff] %vm348_vm0, %v1117_v32  ;;  %3502 = vmatprep.subr.bf16.mxu1 %v3501_v29 }
 0x2b2   : > { %3504 = vmatpush3.bf16.msra.mxu1 %v3501_v29 }
 0x2b3   : > { %1213 = vrot.lane.b32.xlu1 %v1163_v26, %s3876_s13  ;;  %3506 = vmatprep.subr.bf16.mxu1 %v3505_v39  ;;  %v1212_v26 = vpop.permute.xlu0 %1211 }
 0x2b5   : > { %v4362_v35 = vld [vmem:[#allocation2 + $0x40] sm:$0xff] }
 0x2b6   : > { %1281 = vrot.lane.b32.xlu0 %v4362_v35, %s3877_s14  ;;  %v1166_v36 = vld [vmem:[#allocation2 + $0x41] sm:$0xff]  ;;  %3508 = vmatpush3.bf16.msra.mxu1 %v3505_v39  ;;  %v1142_v46 = vld [vmem:[#allocation2 + $0x31] sm:$0xff] }
 0x2b7   : > { %1245 = vrot.lane.b32.xlu1 %v1148_v17, %s3875_s12  ;;  %v1174_v40 = vld [vmem:[#allocation2 + $0x42] sm:$0xff]  ;;  %3510 = vmatprep.subr.bf16.mxu1 %v3509_v44  ;;  %v1150_v48 = vld [vmem:[#allocation2 + $0x32] sm:$0xff]  ;;  %v1244_v28 = vpop.permute.xlu0 %1243 }
 0x2b8   : > { %v4399_v41 = vld [vmem:[#allocation2 + $0x30] sm:$0xff] }
 0x2ba   : > { %1313 = vrot.lane.b32.xlu0 %v1166_v36, %s3878_s15  ;;  %3512 = vmatpush3.bf16.msra.mxu1 %v3509_v44 }
 0x2bb   : > { %1339 = vrot.lane.b32.xlu1 %v1148_v17, %s3879_s20  ;;  %3423 = vmatprep.subr.mxu1 %v3251_v22 }
 0x2be   : > { %1345 = vrot.lane.b32.xlu0 %v1174_v40, %s3879_s20  ;;  %3424 = vmatpush3.msra.mxu1 %v3251_v22 }
 0x2bf   : > { %1219 = vrot.lane.b32.xlu1 %v1166_v36, %s3876_s13 }
 0x2c2   : > { %1217 = vrot.lane.b32.xlu0 %v1142_v46, %s3876_s13 }
 0x2c3   : > { %1375 = vrot.lane.b32.xlu1 %v4362_v35, %s3880_s29 }
 0x2c6   : > { %1249 = vrot.lane.b32.xlu0 %v1150_v48, %s3875_s12 }
 0x2c7   : > { %1251 = vrot.lane.b32.xlu1 %v1174_v40, %s3875_s12  ;;  %v3403_v50 = vpop.f32.mrb[4].mxu1 }
 0x2c8   : > { %v1094_v52 = vadd.f32 %v3403_v50, %v4312_v18  ;;  %v1088_v53 = vpop.f32.mrb[5].mxu1 }
 0x2c9   : > { %v1089_v54 = vadd.f32 %v4312_v18, %v1088_v53 }
 0x2ca   : > { %v4402_v49 = vadd.f32 %v1094_v52, %v4048_v12  ;;  %1373 = vrot.lane.b32.xlu0 %v4399_v41, %s3880_s29 }
 0x2cb   : > { %1407 = vrot.lane.b32.xlu1 %v1166_v36, %s3881_s22  ;;  %v4408_v55 = vadd.f32 %v1089_v54, %v4046_v11 }
 0x2cc   : > { %v1120_v57 = vmax.f32 %v4402_v49, 0.0 }
 0x2cd   : > { %v1119_v58 = vmax.f32 %v4408_v55, 0.0 }
 0x2ce   : > { %1128 = vst.msk [vmem:[#allocation2 + $0x61] sm:$0xff] %vm348_vm0, %v1120_v57  ;;  %1405 = vrot.lane.b32.xlu0 %v1142_v46, %s3881_s22 }
 0x2cf   : > { %1439 = vrot.lane.b32.xlu1 %v1174_v40, %s3882_s23  ;;  %1127 = vst.msk [vmem:[#allocation2 + $0x51] sm:$0xff] %vm348_vm0, %v1119_v58 }
 0x2d2   : > { %1437 = vrot.lane.b32.xlu0 %v1150_v48, %s3882_s23 }
 0x2d3   : > { %1279 = vrot.lane.b32.xlu1 %v4399_v41, %s3877_s14 }
 0x2d5   : > { %v4419_v12 = vld [vmem:[#allocation2 + $0x60] sm:$0xff] }
 0x2d6   : > { %1285 = vrot.lane.b32.xlu0 %v4419_v12, %s3877_s14  ;;  %v1191_v45 = vld [vmem:[#allocation2 + $0x61] sm:$0xff]  ;;  %v1152_v8 = vld [vmem:[#allocation2 + $0x52] sm:$0xff] }
 0x2d7   : > { %1311 = vrot.lane.b32.xlu1 %v1142_v46, %s3878_s15 }
 0x2d8   : > { %v3406_v11 = vpop.f32.mrb[6].mxu1 }
 0x2d9   : > { %v1104_v60 = vadd.f32 %v3406_v11, %v4312_v18  ;;  %v1098_v61 = vpop.f32.mrb[7].mxu1 }
 0x2da   : > { %v1099_v63 = vadd.f32 %v4312_v18, %v1098_v61  ;;  %1379 = vrot.lane.b32.xlu0 %v4419_v12, %s3880_s29  ;;  %v1199_v18 = vld [vmem:[#allocation2 + $0x62] sm:$0xff] }
 0x2db   : > { %1343 = vrot.lane.b32.xlu1 %v1150_v48, %s3879_s20  ;;  %v4430_v6 = vadd.f32 %v1104_v60, %v4057_v16  ;;  %v4445_v16 = vld [vmem:[#allocation2 + $0x50] sm:$0xff] }
 0x2dc   : > { %v4433_v10 = vadd.f32 %v1099_v63, %v4055_v15  ;;  %v1144_v15 = vld [vmem:[#allocation2 + $0x51] sm:$0xff] }
 0x2dd   : > { %v1122_v13 = vmax.f32 %v4430_v6, 0.0 }
 0x2de   : > { %v1121_v56 = vmax.f32 %v4433_v10, 0.0  ;;  %1411 = vrot.lane.b32.xlu0 %v1191_v45, %s3881_s22 }
 0x2df   : > { %1317 = vrot.lane.b32.xlu1 %v1191_v45, %s3878_s15  ;;  %1130 = vst.msk [vmem:[#allocation2 + $0x81] sm:$0xff] %vm348_vm0, %v1122_v13 }
 0x2e0   : > { %1129 = vst.msk [vmem:[#allocation2 + $0x71] sm:$0xff] %vm348_vm0, %v1121_v56 }
 0x2e2   : > { %1443 = vrot.lane.b32.xlu0 %v1199_v18, %s3882_s23 }
 0x2e3   : > { %1349 = vrot.lane.b32.xlu1 %v1199_v18, %s3879_s20 }
 0x2e6   : > { %1255 = vrot.lane.b32.xlu0 %v1199_v18, %s3875_s12  ;;  %v1162_v19 = vld [vmem:[#allocation2 + $0x80] sm:$0xff] }
 0x2e7   : > { %1223 = vrot.lane.b32.xlu1 %v1191_v45, %s3876_s13  ;;  %v1170_v21 = vld [vmem:[#allocation2 + $0x81] sm:$0xff]  ;;  %v4459_v14 = vld [vmem:[#allocation2 + $0x70] sm:$0xff] }
 0x2e8   : > { %v1178_v7 = vld [vmem:[#allocation2 + $0x82] sm:$0xff]  ;;  %v1192_v2 = vld [vmem:[#allocation2 + $0x71] sm:$0xff] }
 0x2e9   : > { %v1200_v4 = vld [vmem:[#allocation2 + $0x72] sm:$0xff] }
 0x2ea   : > { %1221 = vrot.lane.b32.xlu0 %v1144_v15, %s3876_s13 }
 0x2eb   : > { %1283 = vrot.lane.b32.xlu1 %v4445_v16, %s3877_s14 }
 0x2ee   : > { %1377 = vrot.lane.b32.xlu0 %v4445_v16, %s3880_s29 }
 0x2ef   : > { %1315 = vrot.lane.b32.xlu1 %v1144_v15, %s3878_s15 }
 0x2f2   : > { %1253 = vrot.lane.b32.xlu0 %v1152_v8, %s3875_s12 }
 0x2f3   : > { %1289 = vrot.lane.b32.xlu1 %v1162_v19, %s3877_s14 }
 0x2f6   : > { %1409 = vrot.lane.b32.xlu0 %v1144_v15, %s3881_s22 }
 0x2f7   : > { %1321 = vrot.lane.b32.xlu1 %v1170_v21, %s3878_s15 }
 0x2fa   : > { %1441 = vrot.lane.b32.xlu0 %v1152_v8, %s3882_s23 }
 0x2fb   : > { %1353 = vrot.lane.b32.xlu1 %v1178_v7, %s3879_s20 }
 0x2fe   : > { %1347 = vrot.lane.b32.xlu0 %v1152_v8, %s3879_s20 }
 0x2ff   : > { %1381 = vrot.lane.b32.xlu1 %v4459_v14, %s3880_s29 }
 0x302   : > { %1383 = vrot.lane.b32.xlu0 %v1162_v19, %s3880_s29 }
 0x303   : > { %1413 = vrot.lane.b32.xlu1 %v1192_v2, %s3881_s22 }
 0x306   : > { %1415 = vrot.lane.b32.xlu0 %v1170_v21, %s3881_s22 }
 0x307   : > { %1225 = vrot.lane.b32.xlu1 %v1192_v2, %s3876_s13 }
 0x30a   : > { %1445 = vrot.lane.b32.xlu0 %v1200_v4, %s3882_s23 }
 0x30b   : > { %1257 = vrot.lane.b32.xlu1 %v1200_v4, %s3875_s12 }
 0x30c   : > { %v1310_v32 = vpop.permute.xlu0 %1309 }
 0x30d   : > { %v1278_v30 = vpop.permute.xlu1 %1277 }
 0x30e   : > { %1287 = vrot.lane.b32.xlu0 %v4459_v14, %s3877_s14 }
 0x30f   : > { %1417 = vrot.lane.b32.xlu1 %v4198_v59, %s3881_s22  ;;  %v1459_v59 = vsel %vm348_vm0, %v4213_v24, %v1212_v26 }
 0x310   : > { %v1342_v33 = vpop.permute.xlu0 %1341  ;;  %v1467_v39 = vsel %vm754_vm3, %v1459_v59, %v1244_v28 }
 0x311   : > { %v1216_v51 = vpop.permute.xlu1 %1215 }
 0x312   : > { %1319 = vrot.lane.b32.xlu0 %v1192_v2, %s3878_s15  ;;  %v1461_v26 = vsel %vm348_vm0, %v4326_v20, %v1216_v51 }
 0x313   : > { %1449 = vrot.lane.b32.xlu1 %v4203_v62, %s3882_s23 }
 0x314   : > { %v1276_v23 = vpop.permute.xlu0 %1275 }
 0x315   : > { %v1248_v9 = vpop.permute.xlu1 %1247  ;;  %v1475_v62 = vsel %vm763_vm4, %v1467_v39, %v1276_v23 }
 0x316   : > { %1351 = vrot.lane.b32.xlu0 %v1200_v4, %s3879_s20  ;;  %v1469_v4 = vsel %vm754_vm3, %v1461_v26, %v1248_v9 }
 0x318   : > { %v1308_v29 = vpop.permute.xlu0 %1307 }
 0x319   : > { %v1372_v3 = vpop.permute.xlu1 %1371  ;;  %v1483_v40 = vsel %vm772_vm5, %v1475_v62, %v1308_v29 }
 0x31a   : > { %1447 = vrot.lane.b32.xlu0 %v1178_v7, %s3882_s23 }
 0x31d   : > { %v1404_v17 = vpop.permute.xlu1 %1403 }
 0x321   : > { %v1436_v34 = vpop.permute.xlu1 %1435 }
 0x325   : > { %v1214_v36 = vpop.permute.xlu1 %1213 }
 0x326   : > { %v1460_v54 = vsel %vm348_vm0, %v4333_v1, %v1214_v36 }
 0x328   : > { %v1282_v37 = vpop.permute.xlu0 %1281 }
 0x329   : > { %v1246_v38 = vpop.permute.xlu1 %1245 }
 0x32a   : > { %v1468_v11 = vsel %vm754_vm3, %v1460_v54, %v1246_v38 }
 0x32b   : > { %v1476_v60 = vsel %vm763_vm4, %v1468_v11, %v1278_v30 }
 0x32c   : > { %v1314_v42 = vpop.permute.xlu0 %1313  ;;  %v1484_v13 = vsel %vm772_vm5, %v1476_v60, %v1310_v32 }
 0x32d   : > { %v1340_v43 = vpop.permute.xlu1 %1339  ;;  %v1492_v18 = vsel %vm781_vm6, %v1484_v13, %v1342_v33 }
 0x32e   : > { %v1491_v44 = vsel %vm781_vm6, %v1483_v40, %v1340_v43 }
 0x32f   : > { %v1499_v46 = vsel %vm790_vm7, %v1491_v44, %v1372_v3 }
 0x330   : > { %v1507_v22 = vsel %vm799_vm8, %v1499_v46, %v1404_v17  ;;  %v1346_v48 = vpop.permute.xlu0 %1345 }
 0x331   : > { %v1220_v50 = vpop.permute.xlu1 %1219  ;;  %v1515_v24 = vsel %vm370_vm2, %v1507_v22, %v1436_v34 }
 0x332   : > { %3425 = vmatprep.mubr.msk.f32.mxu1 %vm832_vm9, %v1515_v24 }
 0x334   : > { %v1218_v52 = vpop.permute.xlu0 %1217 }
 0x335   : > { %v1376_v53 = vpop.permute.xlu1 %1375  ;;  %v1462_v62 = vsel %vm348_vm0, %v4399_v41, %v1218_v52  ;;  %v1463_v52 = vsel %vm348_vm0, %v4362_v35, %v1220_v50 }
 0x338   : > { %v1250_v57 = vpop.permute.xlu0 %1249 }
 0x339   : > { %v1252_v58 = vpop.permute.xlu1 %1251  ;;  %v1470_v44 = vsel %vm754_vm3, %v1462_v62, %v1250_v57 }
 0x33a   : > { %v1478_v46 = vsel %vm763_vm4, %v1470_v44, %v1282_v37  ;;  %v1471_v37 = vsel %vm754_vm3, %v1463_v52, %v1252_v58 }
 0x33c   : > { %v1374_v61 = vpop.permute.xlu0 %1373 }
 0x33d   : > { %v1408_v63 = vpop.permute.xlu1 %1407  ;;  %v1500_v15 = vsel %vm790_vm7, %v1492_v18, %v1374_v61 }
 0x340   : > { %v1406_v45 = vpop.permute.xlu0 %1405 }
 0x341   : > { %v1440_v56 = vpop.permute.xlu1 %1439  ;;  %v1508_v8 = vsel %vm799_vm8, %v1500_v15, %v1406_v45 }
 0x344   : > { %v1438_v19 = vpop.permute.xlu0 %1437 }
 0x345   : > { %v1280_v1 = vpop.permute.xlu1 %1279  ;;  %v1516_v21 = vsel %vm370_vm2, %v1508_v8, %v1438_v19 }
 0x346   : > { %3426 = vmatmul.mubr.msk.f32.vlgmr.msra.gmra.mrb[8].mxu1 %vm832_vm9, %v1516_v21  ;;  %v1477_v28 = vsel %vm763_vm4, %v1469_v4, %v1280_v1 }
 0x348   : > { %v1286_v7 = vpop.permute.xlu0 %1285 }
 0x349   : > { %v1312_v2 = vpop.permute.xlu1 %1311 }
 0x34a   : > { %v1485_v30 = vsel %vm772_vm5, %v1477_v28, %v1312_v2 }
 0x34c   : > { %v1380_v32 = vpop.permute.xlu0 %1379 }
 0x34d   : > { %v1344_v33 = vpop.permute.xlu1 %1343 }
 0x34e   : > { %v1493_v3 = vsel %vm781_vm6, %v1485_v30, %v1344_v33 }
 0x34f   : > { %v1501_v17 = vsel %vm790_vm7, %v1493_v3, %v1376_v53  ;;  %v1486_v53 = vsel %vm772_vm5, %v1478_v46, %v1314_v42 }
 0x350   : > { %v1509_v23 = vsel %vm799_vm8, %v1501_v17, %v1408_v63  ;;  %v1412_v34 = vpop.permute.xlu0 %1411  ;;  %v1494_v60 = vsel %vm781_vm6, %v1486_v53, %v1346_v48 }
 0x351   : > { %v1318_v29 = vpop.permute.xlu1 %1317  ;;  %v1517_v36 = vsel %vm370_vm2, %v1509_v23, %v1440_v56 }
 0x352   : > { %3428 = vmatprep.mubr.msk.f32.mxu1 %vm832_vm9, %v1517_v36 }
 0x354   : > { %v1444_v20 = vpop.permute.xlu0 %1443 }
 0x355   : > { %v1350_v51 = vpop.permute.xlu1 %1349 }
 0x358   : > { %v1256_v9 = vpop.permute.xlu0 %1255 }
 0x359   : > { %v1224_v59 = vpop.permute.xlu1 %1223 }
 0x35c   : > { %v1222_v38 = vpop.permute.xlu0 %1221 }
 0x35d   : > { %v1284_v39 = vpop.permute.xlu1 %1283  ;;  %v1464_v48 = vsel %vm348_vm0, %v4445_v16, %v1222_v38 }
 0x35e   : > { %v1479_v42 = vsel %vm763_vm4, %v1471_v37, %v1284_v39 }
 0x360   : > { %v1378_v40 = vpop.permute.xlu0 %1377 }
 0x361   : > { %v1316_v43 = vpop.permute.xlu1 %1315  ;;  %v1502_v61 = vsel %vm790_vm7, %v1494_v60, %v1378_v40 }
 0x362   : > { %v1487_v45 = vsel %vm772_vm5, %v1479_v42, %v1316_v43 }
 0x364   : > { %v1254_v22 = vpop.permute.xlu0 %1253 }
 0x365   : > { %v1290_v24 = vpop.permute.xlu1 %1289  ;;  %v1472_v15 = vsel %vm754_vm3, %v1464_v48, %v1254_v22 }
 0x366   : > { %v1480_v58 = vsel %vm763_vm4, %v1472_v15, %v1286_v7 }
 0x367   : > { %v1488_v16 = vsel %vm772_vm5, %v1480_v58, %v1318_v29  ;;  %v1465_v29 = vsel %vm348_vm0, %v4419_v12, %v1224_v59 }
 0x368   : > { %v1410_v54 = vpop.permute.xlu0 %1409  ;;  %v1496_v4 = vsel %vm781_vm6, %v1488_v16, %v1350_v51  ;;  %v1473_v38 = vsel %vm754_vm3, %v1465_v29, %v1256_v9 }
 0x369   : > { %v1322_v11 = vpop.permute.xlu1 %1321  ;;  %v1510_v63 = vsel %vm799_vm8, %v1502_v61, %v1410_v54  ;;  %v3253_v54 = vld [vmem:[%s5072_s2 + $0x1] ss:$0 sm:$0xff] }
 0x36c   : > { %v1442_v13 = vpop.permute.xlu0 %1441 }
 0x36d   : > { %v1354_v41 = vpop.permute.xlu1 %1353  ;;  %v1518_v57 = vsel %vm370_vm2, %v1510_v63, %v1442_v13 }
 0x36e   : > { %3429 = vmatmul.mubr.msk.f32.gmra.mrb[10].mxu1 %vm832_vm9, %v1518_v57 }
 0x370   : > { %v1348_v56 = vpop.permute.xlu0 %1347 }
 0x371   : > { %v1382_v18 = vpop.permute.xlu1 %1381  ;;  %v1495_v8 = vsel %vm781_vm6, %v1487_v45, %v1348_v56 }
 0x372   : > { %v1503_v35 = vsel %vm790_vm7, %v1495_v8, %v1380_v32  ;;  %v1504_v28 = vsel %vm790_vm7, %v1496_v4, %v1382_v18  ;;  %v1849_v4 = vld [vmem:[#allocation2 + $0x2] sm:$0xff] }
 0x373   : > { %v1511_v50 = vsel %vm799_vm8, %v1503_v35, %v1412_v34 }
 0x374   : > { %v1384_v19 = vpop.permute.xlu0 %1383  ;;  %v1519_v21 = vsel %vm370_vm2, %v1511_v50, %v1444_v20 }
 0x375   : > { %v1414_v1 = vpop.permute.xlu1 %1413  ;;  %3431 = vmatprep.mubr.msk.f32.mxu1 %vm832_vm9, %v1519_v21 }
 0x376   : > { %v1512_v30 = vsel %vm799_vm8, %v1504_v28, %v1414_v1  ;;  %v1888_v28 = vld [vmem:[#allocation2 + $0x90] sm:$0xff] }
 0x377   : > { %2087 = vrot.lane.b32.xlu1 %v1888_v28, %s3880_s29 }
 0x378   : > { %v1416_v2 = vpop.permute.xlu0 %1415 }
 0x379   : > { %v1226_v26 = vpop.permute.xlu1 %1225 }
 0x37a   : > { %v1466_v7 = vsel %vm348_vm0, %v4459_v14, %v1226_v26  ;;  %v1841_v26 = vld [vmem:[#allocation2 + $0x1] sm:$0xff] }
 0x37b   : > { %1913 = vrot.lane.b32.xlu0 %v1841_v26, %s3876_s13 }
 0x37c   : > { %v1446_v32 = vpop.permute.xlu0 %1445 }
 0x37d   : > { %v1258_v33 = vpop.permute.xlu1 %1257  ;;  %v1520_v3 = vsel %vm370_vm2, %v1512_v30, %v1446_v32  ;;  %v4582_v30 = vld [vmem:[%s5074_s4 + $0x1] ss:$0 sm:$0xff] }
 0x37e   : > { %v1474_v17 = vsel %vm754_vm3, %v1466_v7, %v1258_v33  ;;  %3432 = vmatmul.mubr.msk.f32.gmra.mrb[12].mxu1 %vm832_vm9, %v1520_v3 }
 0x37f   : > { %v1482_v34 = vsel %vm763_vm4, %v1474_v17, %v1290_v24  ;;  %1945 = vrot.lane.b32.xlu0 %v1849_v4, %s3875_s12 }
 0x380   : > { %v1288_v23 = vpop.permute.xlu0 %1287  ;;  %v1490_v36 = vsel %vm772_vm5, %v1482_v34, %v1322_v11 }
 0x381   : > { %v1418_v51 = vpop.permute.xlu1 %1417  ;;  %v1481_v14 = vsel %vm763_vm4, %v1473_v38, %v1288_v23  ;;  %v1498_v39 = vsel %vm781_vm6, %v1490_v36, %v1354_v41 }
 0x382   : > { %v1506_v44 = vsel %vm790_vm7, %v1498_v39, %v4468_v27  ;;  %v3262_v27 = vld [vmem:[%s5073_s3 + $0x8] sm:$0xff] }
 0x383   : > { %v1514_v9 = vsel %vm799_vm8, %v1506_v44, %v1418_v51  ;;  %3437 = vmatprep.subr.mxu1 %v3262_v27 }
 0x384   : > { %v1320_v20 = vpop.permute.xlu0 %1319  ;;  %3438 = vmatpush3.msra.mxu1 %v3262_v27  ;;  %v2226_v27 = vld [vmem:[%s5075_s5 + $0x8] sm:$0xff] }
 0x385   : > { %v1489_v62 = vsel %vm772_vm5, %v1481_v14, %v1320_v20  ;;  %v1450_v59 = vpop.permute.xlu1 %1449 }
 0x386   : > { %v1522_v53 = vsel %vm370_vm2, %v1514_v9, %v1450_v59 }
 0x388   : > { %v1352_v40 = vpop.permute.xlu0 %1351 }
 0x389   : > { %v1497_v43 = vsel %vm781_vm6, %v1489_v62, %v1352_v40 }
 0x38a   : > { %v1505_v12 = vsel %vm790_vm7, %v1497_v43, %v1384_v19 }
 0x38b   : > { %v1513_v46 = vsel %vm799_vm8, %v1505_v12, %v1416_v2 }
 0x38c   : > { %v1448_v22 = vpop.permute.xlu0 %1447 }
 0x38d   : > { %v1521_v24 = vsel %vm370_vm2, %v1513_v46, %v1448_v22 }
 0x38e   : > { %3434 = vmatprep.mubr.msk.f32.mxu1 %vm832_vm9, %v1521_v24 }
 0x38f   : > { %3435 = vmatmul.mubr.msk.f32.gmra.mrb[14].mxu1 %vm832_vm9, %v1522_v53  ;;  %v2225_v53 = vld [vmem:[%s5075_s5] sm:$0xff] }
 0x3e9   : > { %v4710_v4 = vpop.permute.xlu1 %2087 }
 0x3ed   : > { %v1914_v28 = vpop.permute.xlu0 %1913 }
 0x419   : > { %v3427_v11 = vpop.f32.mrb[8].mxu1 }
 0x41a   : > { %v1637_v60 = vadd.f32 %v3427_v11, %v3253_v54  ;;  %v1631_v61 = vpop.f32.mrb[9].mxu1  ;;  %v2228_v11 = vld [vmem:[%s5075_s5 + $0x18] sm:$0xff] }
 0x41b   : > { %v1632_v63 = vadd.f32 %v3253_v54, %v1631_v61 }
 0x41c   : > { %v1671_v41 = vmax.f32 %v1637_v60, 0.0 }
 0x41d   : > { %v1670_v13 = vmax.f32 %v1632_v63, 0.0  ;;  %v2229_v63 = vld [vmem:[%s5075_s5 + $0x20] sm:$0xff] }
 0x41f   : > { %3439 = vmatprep.mubr.msk.f32.mxu1 %vm348_vm0, %v1670_v13  ;;  %v2230_v13 = vld [vmem:[%s5075_s5 + $0x28] sm:$0xff] }
 0x420   : > { %3440 = vmatmul.mubr.msk.f32.vlgmr.msra.gmra.mrb[16].mxu1 %vm348_vm0, %v1671_v41  ;;  %v3521_v41 = vpack.c.bf16 %v2230_v13, %v2229_v63 }
 0x441   : > { %v3430_v52 = vpop.f32.mrb[10].mxu1 }
 0x442   : > { %v1647_v57 = vadd.f32 %v3430_v52, %v3253_v54  ;;  %v1641_v37 = vpop.f32.mrb[11].mxu1 }
 0x443   : > { %v1642_v42 = vadd.f32 %v3253_v54, %v1641_v37  ;;  %v2232_v37 = vld [vmem:[%s5075_s5 + $0x38] sm:$0xff] }
 0x444   : > { %v1673_v45 = vmax.f32 %v1647_v57, 0.0  ;;  %v2231_v57 = vld [vmem:[%s5075_s5 + $0x30] sm:$0xff] }
 0x445   : > { %v1672_v48 = vmax.f32 %v1642_v42, 0.0 }
 0x447   : > { %3442 = vmatprep.mubr.msk.f32.mxu1 %vm348_vm0, %v1672_v48  ;;  %v3525_v48 = vpack.c.bf16 %v2232_v37, %v2231_v57 }
 0x448   : > { %3443 = vmatmul.mubr.msk.f32.gmra.mrb[18].mxu1 %vm348_vm0, %v1673_v45 }
 0x451   : > { %v3433_v56 = vpop.f32.mrb[12].mxu1 }
 0x452   : > { %v1657_v18 = vadd.f32 %v3433_v56, %v3253_v54  ;;  %v1651_v15 = vpop.f32.mrb[13].mxu1 }
 0x453   : > { %v1652_v8 = vadd.f32 %v3253_v54, %v1651_v15 }
 0x454   : > { %v1675_v50 = vmax.f32 %v1657_v18, 0.0 }
 0x455   : > { %v1674_v35 = vmax.f32 %v1652_v8, 0.0 }
 0x457   : > { %3445 = vmatprep.mubr.msk.f32.mxu1 %vm348_vm0, %v1674_v35 }
 0x458   : > { %3446 = vmatmul.mubr.msk.f32.gmra.mrb[20].mxu1 %vm348_vm0, %v1675_v50  ;;  %v2233_v50 = vld [vmem:[%s5075_s5 + $0x40] sm:$0xff] }
 0x462   : > { %v3436_v58 = vpop.f32.mrb[14].mxu1 }
 0x463   : > { %v1667_v19 = vadd.f32 %v3436_v58, %v3253_v54  ;;  %v1661_v1 = vpop.f32.mrb[15].mxu1 }
 0x464   : > { %v1662_v21 = vadd.f32 %v3253_v54, %v1661_v1  ;;  %v2227_v54 = vld [vmem:[%s5075_s5 + $0x10] sm:$0xff] }
 0x465   : > { %v1677_v2 = vmax.f32 %v1667_v19, 0.0  ;;  %v3517_v60 = vpack.c.bf16 %v2228_v11, %v2227_v54 }
 0x466   : > { %v1676_v16 = vmax.f32 %v1662_v21, 0.0 }
 0x468   : > { %3448 = vmatprep.mubr.msk.f32.mxu1 %vm348_vm0, %v1676_v16 }
 0x469   : > { %3449 = vmatmul.mubr.msk.f32.gmra.mrb[22].mxu1 %vm348_vm0, %v1677_v2 }
 0x4f3   : > { %v3441_v32 = vpop.f32.mrb[16].mxu1 }
 0x4f4   : > { %v1784_v33 = vadd.f32 %v3441_v32, %v4582_v30  ;;  %v1778_v7 = vpop.f32.mrb[17].mxu1 }
 0x4f5   : > { %v1779_v3 = vadd.f32 %v4582_v30, %v1778_v7 }
 0x4f6   : > { %v1818_v17 = vadd.f32 %v1784_v33, %v4317_v25  ;;  %v1896_v33 = vld [vmem:[#allocation2 + $0x91] sm:$0xff] }
 0x4f7   : > { %v1817_v23 = vadd.f32 %v1779_v3, %v4320_v5  ;;  %v1946_v3 = vpop.permute.xlu0 %1945 }
 0x4f8   : > { %1826 = vst.msk [vmem:[#allocation2 + $0x21] sm:$0xff] %vm348_vm0, %v1818_v17  ;;  %v1904_v17 = vld [vmem:[#allocation2 + $0x92] sm:$0xff] }
 0x4f9   : > { %1825 = vst.msk [vmem:[#allocation2 + $0x11] sm:$0xff] %vm348_vm0, %v1817_v23 }
 0x4ff   : > { %v1866_v34 = vld [vmem:[#allocation2 + $0x21] sm:$0xff] }
 0x500   : > { %v4590_v29 = vld [vmem:[#allocation2 + $0x20] sm:$0xff]  ;;  %2011 = vrot.lane.b32.xlu0 %v1866_v34, %s3878_s15  ;;  %v4597_v25 = vld [vmem:[#allocation2 + $0x10] sm:$0xff] }
 0x501   : > { %1979 = vrot.lane.b32.xlu1 %v4590_v29, %s3877_s14  ;;  %v1874_v36 = vld [vmem:[#allocation2 + $0x22] sm:$0xff]  ;;  %v1865_v5 = vld [vmem:[#allocation2 + $0x11] sm:$0xff] }
 0x502   : > { %v1850_v51 = vld [vmem:[#allocation2 + $0x12] sm:$0xff] }
 0x504   : > { %2043 = vrot.lane.b32.xlu0 %v1874_v36, %s3879_s20 }
 0x505   : > { %1917 = vrot.lane.b32.xlu1 %v1866_v34, %s3876_s13 }
 0x508   : > { %1977 = vrot.lane.b32.xlu0 %v4597_v25, %s3877_s14 }
 0x509   : > { %1949 = vrot.lane.b32.xlu1 %v1874_v36, %s3875_s12 }
 0x50c   : > { %2009 = vrot.lane.b32.xlu0 %v1865_v5, %s3878_s15 }
 0x50d   : > { %2073 = vrot.lane.b32.xlu1 %v4590_v29, %s3880_s29 }
 0x511   : > { %2105 = vrot.lane.b32.xlu1 %v1866_v34, %s3881_s22 }
 0x515   : > { %2137 = vrot.lane.b32.xlu1 %v1874_v36, %s3882_s23 }
 0x519   : > { %1915 = vrot.lane.b32.xlu1 %v1865_v5, %s3876_s13 }
 0x51b   : > { %v3444_v20 = vpop.f32.mrb[18].mxu1 }
 0x51c   : > { %v1794_v38 = vadd.f32 %v3444_v20, %v4582_v30  ;;  %v1788_v14 = vpop.f32.mrb[19].mxu1 }
 0x51d   : > { %1947 = vrot.lane.b32.xlu1 %v1850_v51, %s3875_s12  ;;  %v1789_v39 = vadd.f32 %v4582_v30, %v1788_v14  ;;  %v1833_v14 = vld [vmem:[#allocation2] sm:$0xff] }
 0x51e   : > { %v1820_v62 = vadd.f32 %v1794_v38, %v4344_v47 }
 0x51f   : > { %v1819_v40 = vadd.f32 %v1789_v39, %v4348_v31 }
 0x520   : > { %1828 = vst.msk [vmem:[#allocation2 + $0x41] sm:$0xff] %vm348_vm0, %v1820_v62 }
 0x521   : > { %2041 = vrot.lane.b32.xlu1 %v1850_v51, %s3879_s20  ;;  %1827 = vst.msk [vmem:[#allocation2 + $0x31] sm:$0xff] %vm348_vm0, %v1819_v40  ;;  %v2161_v40 = vsel %vm348_vm0, %v1833_v14, %v1914_v28 }
 0x527   : > { %v4616_v43 = vld [vmem:[#allocation2 + $0x40] sm:$0xff] }
 0x528   : > { %v1876_v44 = vld [vmem:[#allocation2 + $0x42] sm:$0xff]  ;;  %1983 = vrot.lane.b32.xlu0 %v4616_v43, %s3877_s14  ;;  %v4627_v24 = vld [vmem:[#allocation2 + $0x30] sm:$0xff] }
 0x529   : > { %2047 = vrot.lane.b32.xlu1 %v1876_v44, %s3879_s20  ;;  %v1868_v59 = vld [vmem:[#allocation2 + $0x41] sm:$0xff]  ;;  %v1875_v61 = vld [vmem:[#allocation2 + $0x32] sm:$0xff] }
 0x52b   : > { %v3447_v12 = vpop.f32.mrb[20].mxu1 }
 0x52c   : > { %v1804_v47 = vadd.f32 %v3447_v12, %v4582_v30  ;;  %v1798_v46 = vpop.f32.mrb[21].mxu1  ;;  %2015 = vrot.lane.b32.xlu0 %v1868_v59, %s3878_s15 }
 0x52d   : > { %1921 = vrot.lane.b32.xlu1 %v1868_v59, %s3876_s13  ;;  %v1799_v31 = vadd.f32 %v4582_v30, %v1798_v46 }
 0x52e   : > { %v1822_v22 = vadd.f32 %v1804_v47, %v4402_v49  ;;  %v3513_v49 = vpack.c.bf16 %v2226_v27, %v2225_v53 }
 0x52f   : > { %v1821_v9 = vadd.f32 %v1799_v31, %v4408_v55  ;;  %v1867_v55 = vld [vmem:[#allocation2 + $0x31] sm:$0xff] }
 0x530   : > { %1830 = vst.msk [vmem:[#allocation2 + $0x61] sm:$0xff] %vm348_vm0, %v1822_v22  ;;  %2077 = vrot.lane.b32.xlu0 %v4616_v43, %s3880_s29  ;;  %3514 = vmatprep.subr.bf16.mxu1 %v3513_v49 }
 0x531   : > { %1981 = vrot.lane.b32.xlu1 %v4627_v24, %s3877_s14  ;;  %1829 = vst.msk [vmem:[#allocation2 + $0x51] sm:$0xff] %vm348_vm0, %v1821_v9  ;;  %3516 = vmatpush3.bf16.msra.mxu1 %v3513_v49 }
 0x532   : > { %3518 = vmatprep.subr.bf16.mxu1 %v3517_v60 }
 0x534   : > { %2109 = vrot.lane.b32.xlu0 %v1868_v59, %s3881_s22 }
 0x535   : > { %2013 = vrot.lane.b32.xlu1 %v1867_v55, %s3878_s15  ;;  %3520 = vmatpush3.bf16.msra.mxu1 %v3517_v60 }
 0x536   : > { %3522 = vmatprep.subr.bf16.mxu1 %v3521_v41 }
 0x537   : > { %v4657_v52 = vld [vmem:[#allocation2 + $0x60] sm:$0xff] }
 0x538   : > { %2141 = vrot.lane.b32.xlu0 %v1876_v44, %s3882_s23  ;;  %v1870_v8 = vld [vmem:[#allocation2 + $0x61] sm:$0xff]  ;;  %v1854_v19 = vld [vmem:[#allocation2 + $0x52] sm:$0xff] }
 0x539   : > { %2045 = vrot.lane.b32.xlu1 %v1875_v61, %s3879_s20  ;;  %3524 = vmatpush3.bf16.msra.mxu1 %v3521_v41  ;;  %v1878_v58 = vld [vmem:[#allocation2 + $0x62] sm:$0xff] }
 0x53a   : > { %3526 = vmatprep.subr.bf16.mxu1 %v3525_v48 }
 0x53c   : > { %v3450_v42 = vpop.f32.mrb[22].mxu1  ;;  %1953 = vrot.lane.b32.xlu0 %v1876_v44, %s3875_s12  ;;  %v2169_v44 = vsel %vm754_vm3, %v2161_v40, %v1946_v3 }
 0x53d   : > { %1987 = vrot.lane.b32.xlu1 %v4657_v52, %s3877_s14  ;;  %v1814_v45 = vadd.f32 %v3450_v42, %v4582_v30  ;;  %v1808_v56 = vpop.f32.mrb[23].mxu1  ;;  %3528 = vmatpush3.bf16.msra.mxu1 %v3525_v48 }
 0x53e   : > { %v1809_v18 = vadd.f32 %v4582_v30, %v1808_v56  ;;  %3467 = vmatprep.subr.mxu1 %v2233_v50 }
 0x53f   : > { %v1824_v15 = vadd.f32 %v1814_v45, %v4430_v6  ;;  %v4684_v6 = vld [vmem:[#allocation2 + $0x50] sm:$0xff] }
 0x540   : > { %v1823_v35 = vadd.f32 %v1809_v18, %v4433_v10  ;;  %1919 = vrot.lane.b32.xlu0 %v1867_v55, %s3876_s13  ;;  %v1892_v10 = vld [vmem:[#allocation2 + $0x51] sm:$0xff] }
 0x541   : > { %2019 = vrot.lane.b32.xlu1 %v1870_v8, %s3878_s15  ;;  %1832 = vst.msk [vmem:[#allocation2 + $0x81] sm:$0xff] %vm348_vm0, %v1824_v15  ;;  %3468 = vmatpush3.msra.mxu1 %v2233_v50 }
 0x542   : > { %1831 = vst.msk [vmem:[#allocation2 + $0x71] sm:$0xff] %vm348_vm0, %v1823_v35 }
 0x544   : > { %1951 = vrot.lane.b32.xlu0 %v1875_v61, %s3875_s12 }
 0x545   : > { %2051 = vrot.lane.b32.xlu1 %v1878_v58, %s3879_s20 }
 0x548   : > { %2075 = vrot.lane.b32.xlu0 %v4627_v24, %s3880_s29  ;;  %v1864_v1 = vld [vmem:[#allocation2 + $0x80] sm:$0xff] }
 0x549   : > { %1925 = vrot.lane.b32.xlu1 %v1870_v8, %s3876_s13  ;;  %v1872_v21 = vld [vmem:[#allocation2 + $0x81] sm:$0xff]  ;;  %v4702_v2 = vld [vmem:[#allocation2 + $0x70] sm:$0xff] }
 0x54a   : > { %v1880_v16 = vld [vmem:[#allocation2 + $0x82] sm:$0xff]  ;;  %v1894_v26 = vld [vmem:[#allocation2 + $0x71] sm:$0xff] }
 0x54b   : > { %v1856_v32 = vld [vmem:[#allocation2 + $0x72] sm:$0xff] }
 0x54c   : > { %2107 = vrot.lane.b32.xlu0 %v1867_v55, %s3881_s22 }
 0x54d   : > { %2079 = vrot.lane.b32.xlu1 %v4684_v6, %s3880_s29 }
 0x550   : > { %2139 = vrot.lane.b32.xlu0 %v1875_v61, %s3882_s23 }
 0x551   : > { %2111 = vrot.lane.b32.xlu1 %v1892_v10, %s3881_s22 }
 0x554   : > { %2081 = vrot.lane.b32.xlu0 %v4657_v52, %s3880_s29 }
 0x555   : > { %1923 = vrot.lane.b32.xlu1 %v1892_v10, %s3876_s13 }
 0x558   : > { %2113 = vrot.lane.b32.xlu0 %v1870_v8, %s3881_s22 }
 0x559   : > { %1955 = vrot.lane.b32.xlu1 %v1854_v19, %s3875_s12 }
 0x55c   : > { %2145 = vrot.lane.b32.xlu0 %v1878_v58, %s3882_s23 }
 0x55d   : > { %1991 = vrot.lane.b32.xlu1 %v1864_v1, %s3877_s14 }
 0x560   : > { %1957 = vrot.lane.b32.xlu0 %v1878_v58, %s3875_s12 }
 0x561   : > { %2023 = vrot.lane.b32.xlu1 %v1872_v21, %s3878_s15 }
 0x564   : > { %2143 = vrot.lane.b32.xlu0 %v1854_v19, %s3882_s23 }
 0x565   : > { %2055 = vrot.lane.b32.xlu1 %v1880_v16, %s3879_s20 }
 0x568   : > { %1985 = vrot.lane.b32.xlu0 %v4684_v6, %s3877_s14 }
 0x569   : > { %2083 = vrot.lane.b32.xlu1 %v4702_v2, %s3880_s29 }
 0x56c   : > { %2017 = vrot.lane.b32.xlu0 %v1892_v10, %s3878_s15 }
 0x56d   : > { %2115 = vrot.lane.b32.xlu1 %v1894_v26, %s3881_s22 }
 0x570   : > { %2049 = vrot.lane.b32.xlu0 %v1854_v19, %s3879_s20 }
 0x571   : > { %1927 = vrot.lane.b32.xlu1 %v1894_v26, %s3876_s13 }
 0x572   : > { %v2012_v5 = vpop.permute.xlu0 %2011 }
 0x573   : > { %v4714_v30 = vpop.permute.xlu1 %1979 }
 0x574   : > { %2085 = vrot.lane.b32.xlu0 %v1864_v1, %s3880_s29 }
 0x575   : > { %1959 = vrot.lane.b32.xlu1 %v1856_v32, %s3875_s12 }
 0x577   : > { %v1918_v7 = vpop.permute.xlu1 %1917 }
 0x578   : > { %2117 = vrot.lane.b32.xlu0 %v1872_v21, %s3881_s22  ;;  %v2163_v23 = vsel %vm348_vm0, %v4590_v29, %v1918_v7  ;;  %v2044_v29 = vpop.permute.xlu0 %2043 }
 0x579   : > { %2119 = vrot.lane.b32.xlu1 %v1896_v33, %s3881_s22 }
 0x57b   : > { %v1950_v34 = vpop.permute.xlu1 %1949 }
 0x57c   : > { %v2171_v36 = vsel %vm754_vm3, %v2163_v23, %v1950_v34  ;;  %2147 = vrot.lane.b32.xlu0 %v1856_v32, %s3882_s23  ;;  %v1978_v39 = vpop.permute.xlu0 %1977 }
 0x57d   : > { %2151 = vrot.lane.b32.xlu1 %v1904_v17, %s3882_s23  ;;  %v2177_v47 = vsel %vm763_vm4, %v2169_v44, %v1978_v39 }
 0x57f   : > { %v2074_v20 = vpop.permute.xlu1 %2073 }
 0x580   : > { %1989 = vrot.lane.b32.xlu0 %v4702_v2, %s3877_s14  ;;  %v2010_v59 = vpop.permute.xlu0 %2009 }
 0x581   : > { %v2185_v46 = vsel %vm772_vm5, %v2177_v47, %v2010_v59 }
 0x583   : > { %v2106_v51 = vpop.permute.xlu1 %2105 }
 0x584   : > { %2021 = vrot.lane.b32.xlu0 %v1894_v26, %s3878_s15 }
 0x587   : > { %v2138_v38 = vpop.permute.xlu1 %2137 }
 0x588   : > { %2053 = vrot.lane.b32.xlu0 %v1856_v32, %s3879_s20  ;;  %s3293_s20 = sshll.u32 %s5088_s10, 7 }
 0x58b   : > { %v1916_v62 = vpop.permute.xlu1 %1915 }
 0x58c   : > { %2149 = vrot.lane.b32.xlu0 %v1880_v16, %s3882_s23  ;;  %v2162_v56 = vsel %vm348_vm0, %v4597_v25, %v1916_v62 }
 0x58f   : > { %v1948_v12 = vpop.permute.xlu1 %1947 }
 0x590   : > { %v2170_v8 = vsel %vm754_vm3, %v2162_v56, %v1948_v12 }
 0x591   : > { %v2178_v50 = vsel %vm763_vm4, %v2170_v8, %v4714_v30 }
 0x592   : > { %v2186_v21 = vsel %vm772_vm5, %v2178_v50, %v2012_v5 }
 0x593   : > { %v2042_v31 = vpop.permute.xlu1 %2041  ;;  %v2194_v28 = vsel %vm781_vm6, %v2186_v21, %v2044_v29 }
 0x594   : > { %v2193_v22 = vsel %vm781_vm6, %v2185_v46, %v2042_v31 }
 0x595   : > { %v2201_v9 = vsel %vm790_vm7, %v2193_v22, %v2074_v20 }
 0x596   : > { %v2209_v53 = vsel %vm799_vm8, %v2201_v9, %v2106_v51 }
 0x597   : > { %v2217_v27 = vsel %vm370_vm2, %v2209_v53, %v2138_v38 }
 0x598   : > { %3469 = vmatprep.mubr.msk.f32.mxu1 %vm832_vm9, %v2217_v27 }
 0x59a   : > { %v1984_v49 = vpop.permute.xlu0 %1983 }
 0x59b   : > { %v2048_v55 = vpop.permute.xlu1 %2047 }
 0x59e   : > { %v2016_v54 = vpop.permute.xlu0 %2015 }
 0x59f   : > { %v1922_v11 = vpop.permute.xlu1 %1921 }
 0x5a0   : > { %v2165_v27 = vsel %vm348_vm0, %v4616_v43, %v1922_v11 }
 0x5a2   : > { %v2078_v60 = vpop.permute.xlu0 %2077 }
 0x5a3   : > { %v1982_v61 = vpop.permute.xlu1 %1981 }
 0x5a4   : > { %v2179_v35 = vsel %vm763_vm4, %v2171_v36, %v1982_v61 }
 0x5a6   : > { %v2110_v63 = vpop.permute.xlu0 %2109 }
 0x5a7   : > { %v2014_v13 = vpop.permute.xlu1 %2013 }
 0x5a8   : > { %v2187_v58 = vsel %vm772_vm5, %v2179_v35, %v2014_v13 }
 0x5aa   : > { %v2142_v41 = vpop.permute.xlu0 %2141 }
 0x5ab   : > { %v2046_v57 = vpop.permute.xlu1 %2045 }
 0x5ac   : > { %v2195_v1 = vsel %vm781_vm6, %v2187_v58, %v2046_v57 }
 0x5ad   : > { %v2203_v25 = vsel %vm790_vm7, %v2195_v1, %v2078_v60 }
 0x5ae   : > { %v1954_v37 = vpop.permute.xlu0 %1953  ;;  %v2211_v33 = vsel %vm799_vm8, %v2203_v25, %v2110_v63 }
 0x5af   : > { %v1988_v42 = vpop.permute.xlu1 %1987  ;;  %v2219_v23 = vsel %vm370_vm2, %v2211_v33, %v2142_v41 }
 0x5b2   : > { %v1920_v48 = vpop.permute.xlu0 %1919 }
 0x5b3   : > { %v4749_v45 = vpop.permute.xlu1 %2019  ;;  %v2164_v5 = vsel %vm348_vm0, %v4627_v24, %v1920_v48 }
 0x5b6   : > { %v1952_v18 = vpop.permute.xlu0 %1951 }
 0x5b7   : > { %v4753_v15 = vpop.permute.xlu1 %2051  ;;  %v2172_v29 = vsel %vm754_vm3, %v2164_v5, %v1952_v18 }
 0x5b8   : > { %v2180_v38 = vsel %vm763_vm4, %v2172_v29, %v1984_v49  ;;  %v2173_v49 = vsel %vm754_vm3, %v2165_v27, %v1954_v37  ;;  %v2679_v29 = vld [vmem:[#allocation4 + $0x218] sm:$0xff]  ;;  %v2689_v27 = vld [vmem:[#allocation4 + $0x268] sm:$0xff] }
 0x5b9   : > { %v2188_v62 = vsel %vm772_vm5, %v2180_v38, %v2016_v54  ;;  %v2676_v38 = vld [vmem:[#allocation4 + $0x200] sm:$0xff] }
 0x5ba   : > { %v2076_v10 = vpop.permute.xlu0 %2075  ;;  %v2196_v12 = vsel %vm781_vm6, %v2188_v62, %v2048_v55  ;;  %v2683_v62 = vld [vmem:[#allocation4 + $0x238] sm:$0xff] }
 0x5bb   : > { %v4760_v19 = vpop.permute.xlu1 %1925  ;;  %v2202_v32 = vsel %vm790_vm7, %v2194_v28, %v2076_v10 }
 0x5be   : > { %v2108_v16 = vpop.permute.xlu0 %2107 }
 0x5bf   : > { %v2080_v26 = vpop.permute.xlu1 %2079  ;;  %v2210_v30 = vsel %vm799_vm8, %v2202_v32, %v2108_v16 }
 0x5c0   : > { %v2204_v59 = vsel %vm790_vm7, %v2196_v12, %v2080_v26  ;;  %v2167_v26 = vsel %vm348_vm0, %v4657_v52, %v4760_v19  ;;  %v2680_v12 = vld [vmem:[#allocation4 + $0x220] sm:$0xff] }
 0x5c2   : > { %v2140_v7 = vpop.permute.xlu0 %2139 }
 0x5c3   : > { %v2112_v3 = vpop.permute.xlu1 %2111  ;;  %v2218_v17 = vsel %vm370_vm2, %v2210_v30, %v2140_v7 }
 0x5c4   : > { %3470 = vmatmul.mubr.msk.f32.vlgmr.msra.gmra.mrb[24].mxu1 %vm832_vm9, %v2218_v17  ;;  %v2212_v47 = vsel %vm799_vm8, %v2204_v59, %v2112_v3  ;;  %v2682_v59 = vld [vmem:[#allocation4 + $0x230] sm:$0xff] }
 0x5c5   : > { %3472 = vmatprep.mubr.msk.f32.mxu1 %vm832_vm9, %v2219_v23 }
 0x5c6   : > { %v2082_v34 = vpop.permute.xlu0 %2081 }
 0x5c7   : > { %v1924_v36 = vpop.permute.xlu1 %1923 }
 0x5c8   : > { %v2166_v60 = vsel %vm348_vm0, %v4684_v6, %v1924_v36 }
 0x5ca   : > { %v2114_v20 = vpop.permute.xlu0 %2113 }
 0x5cb   : > { %v1956_v51 = vpop.permute.xlu1 %1955 }
 0x5cc   : > { %v2174_v13 = vsel %vm754_vm3, %v2166_v60, %v1956_v51  ;;  %v2677_v51 = vld [vmem:[#allocation4 + $0x208] sm:$0xff]  ;;  %v2690_v60 = vld [vmem:[#allocation4 + $0x270] sm:$0xff] }
 0x5cd   : > { %v2182_v43 = vsel %vm763_vm4, %v2174_v13, %v1988_v42  ;;  %v2695_v13 = vld [vmem:[#allocation4 + $0x298] sm:$0xff] }
 0x5ce   : > { %v2146_v14 = vpop.permute.xlu0 %2145  ;;  %v2190_v6 = vsel %vm772_vm5, %v2182_v43, %v4749_v45 }
 0x5cf   : > { %v1992_v39 = vpop.permute.xlu1 %1991  ;;  %v2198_v8 = vsel %vm781_vm6, %v2190_v6, %v4753_v15  ;;  %v2696_v6 = vld [vmem:[#allocation4 + $0x2a0] sm:$0xff] }
 0x5d2   : > { %v1958_v40 = vpop.permute.xlu0 %1957 }
 0x5d3   : > { %v2024_v44 = vpop.permute.xlu1 %2023  ;;  %v2175_v32 = vsel %vm754_vm3, %v2167_v26, %v1958_v40  ;;  %v2709_v26 = vld [vmem:[#allocation4 + $0x308] sm:$0xff] }
 0x5d6   : > { %v2144_v46 = vpop.permute.xlu0 %2143 }
 0x5d7   : > { %v2056_v24 = vpop.permute.xlu1 %2055  ;;  %v2220_v31 = vsel %vm370_vm2, %v2212_v47, %v2144_v46  ;;  %v3599_v47 = vpack.c.bf16 %v2682_v59, %v2680_v12  ;;  %v2685_v46 = vld [vmem:[#allocation4 + $0x248] sm:$0xff]  ;;  %v2727_v12 = vld [vmem:[#allocation4 + $0x398] sm:$0xff] }
 0x5d8   : > { %3473 = vmatmul.mubr.msk.f32.gmra.mrb[26].mxu1 %vm832_vm9, %v2220_v31 }
 0x5da   : > { %v1986_v22 = vpop.permute.xlu0 %1985 }
 0x5db   : > { %v2084_v9 = vpop.permute.xlu1 %2083  ;;  %v2181_v55 = vsel %vm763_vm4, %v2173_v49, %v1986_v22  ;;  %v2684_v22 = vld [vmem:[#allocation4 + $0x240] sm:$0xff]  ;;  %v2691_v49 = vld [vmem:[#allocation4 + $0x278] sm:$0xff] }
 0x5dc   : > { %v2206_v35 = vsel %vm790_vm7, %v2198_v8, %v2084_v9  ;;  %v2686_v9 = vld [vmem:[#allocation4 + $0x250] sm:$0xff] }
 0x5de   : > { %v2018_v53 = vpop.permute.xlu0 %2017 }
 0x5df   : > { %v2116_v54 = vpop.permute.xlu1 %2115  ;;  %v2189_v61 = vsel %vm772_vm5, %v2181_v55, %v2018_v53  ;;  %v3603_v53 = vpack.c.bf16 %v2686_v9, %v2684_v22  ;;  %v3605_v55 = vpack.c.bf16 %v2691_v49, %v2689_v27  ;;  %v2731_v22 = vld [vmem:[#allocation4 + $0x3b8] sm:$0xff]  ;;  %v2728_v27 = vld [vmem:[#allocation4 + $0x3a0] sm:$0xff]  ;;  %v2730_v49 = vld [vmem:[#allocation4 + $0x3b0] sm:$0xff] }
 0x5e0   : > { %v2214_v58 = vsel %vm799_vm8, %v2206_v35, %v2116_v54  ;;  %v2688_v54 = vld [vmem:[#allocation4 + $0x260] sm:$0xff]  ;;  %v2701_v35 = vld [vmem:[#allocation4 + $0x2c8] sm:$0xff] }
 0x5e2   : > { %v2050_v63 = vpop.permute.xlu0 %2049 }
 0x5e3   : > { %v2197_v41 = vsel %vm781_vm6, %v2189_v61, %v2050_v63  ;;  %v1928_v56 = vpop.permute.xlu1 %1927  ;;  %v3607_v61 = vpack.c.bf16 %v2690_v60, %v2688_v54  ;;  %v2693_v63 = vld [vmem:[#allocation4 + $0x288] sm:$0xff]  ;;  %v2735_v54 = vld [vmem:[#allocation4 + $0x3d8] sm:$0xff]  ;;  %v3647_v60 = vpack.c.bf16 %v2730_v49, %v2728_v27 }
 0x5e4   : > { %v2205_v57 = vsel %vm790_vm7, %v2197_v41, %v2082_v34  ;;  %v2168_v42 = vsel %vm348_vm0, %v4702_v2, %v1928_v56  ;;  %v3609_v41 = vpack.c.bf16 %v2695_v13, %v2693_v63  ;;  %v2732_v63 = vld [vmem:[#allocation4 + $0x3c0] sm:$0xff]  ;;  %v2734_v13 = vld [vmem:[#allocation4 + $0x3d0] sm:$0xff]  ;;  %v2637_v27 = vld [vmem:[#allocation4 + $0xc8] sm:$0xff] }
 0x5e5   : > { %v2213_v48 = vsel %vm799_vm8, %v2205_v57, %v2114_v20  ;;  %v2692_v57 = vld [vmem:[#allocation4 + $0x280] sm:$0xff]  ;;  %v2639_v49 = vld [vmem:[#allocation4 + $0xd8] sm:$0xff] }
 0x5e6   : > { %v2086_v11 = vpop.permute.xlu0 %2085  ;;  %v2221_v37 = vsel %vm370_vm2, %v2213_v48, %v2146_v14  ;;  %v2678_v14 = vld [vmem:[#allocation4 + $0x210] sm:$0xff] }
 0x5e7   : > { %3475 = vmatprep.mubr.msk.f32.mxu1 %vm832_vm9, %v2221_v37  ;;  %v1960_v50 = vpop.permute.xlu1 %1959  ;;  %v3595_v40 = vpack.c.bf16 %v2678_v14, %v2676_v38  ;;  %v2694_v48 = vld [vmem:[#allocation4 + $0x290] sm:$0xff]  ;;  %v2699_v37 = vld [vmem:[#allocation4 + $0x2b8] sm:$0xff]  ;;  %v2721_v38 = vld [vmem:[#allocation4 + $0x368] sm:$0xff] }
 0x5e8   : > { %v2176_v21 = vsel %vm754_vm3, %v2168_v42, %v1960_v50  ;;  %v3611_v43 = vpack.c.bf16 %v2694_v48, %v2692_v57  ;;  %v2703_v50 = vld [vmem:[#allocation4 + $0x2d8] sm:$0xff]  ;;  %v2702_v42 = vld [vmem:[#allocation4 + $0x2d0] sm:$0xff]  ;;  %v4830_v57 = vld [vmem:[%s5076_s6] ss:$0 sm:$0xff] }
 0x5e9   : > { %v2184_v25 = vsel %vm763_vm4, %v2176_v21, %v1992_v39  ;;  %v2681_v39 = vld [vmem:[#allocation4 + $0x228] sm:$0xff] }
 0x5ea   : > { %v2118_v18 = vpop.permute.xlu0 %2117  ;;  %v2192_v15 = vsel %vm772_vm5, %v2184_v25, %v2024_v44  ;;  %v3597_v44 = vpack.c.bf16 %v2683_v62, %v2681_v39  ;;  %v2705_v21 = vld [vmem:[#allocation4 + $0x2e8] sm:$0xff]  ;;  %v2720_v62 = vld [vmem:[#allocation4 + $0x360] sm:$0xff] }
 0x5eb   : > { %v2120_v28 = vpop.permute.xlu1 %2119  ;;  %v2200_v2 = vsel %vm781_vm6, %v2192_v15, %v2056_v24  ;;  %v2687_v24 = vld [vmem:[#allocation4 + $0x258] sm:$0xff]  ;;  %v2704_v15 = vld [vmem:[#allocation4 + $0x2e0] sm:$0xff]  ;;  %v2737_v48 = vld [vmem:[#allocation4 + $0x3e8] sm:$0xff] }
 0x5ec   : > { %v2208_v17 = vsel %vm790_vm7, %v2200_v2, %v4710_v4  ;;  %v3593_v4 = vpack.c.bf16 %v2679_v29, %v2677_v51  ;;  %v3601_v31 = vpack.c.bf16 %v2687_v24, %v2685_v46  ;;  %v2708_v2 = vld [vmem:[#allocation4 + $0x300] sm:$0xff]  ;;  %v2718_v29 = vld [vmem:[#allocation4 + $0x350] sm:$0xff] }
 0x5ed   : > { %v2216_v36 = vsel %vm799_vm8, %v2208_v17, %v2120_v28  ;;  %v2716_v51 = vld [vmem:[#allocation4 + $0x340] sm:$0xff]  ;;  %v2726_v24 = vld [vmem:[#allocation4 + $0x390] sm:$0xff] }
 0x5ee   : > { %v2148_v10 = vpop.permute.xlu0 %2147  ;;  %3594 = vmatprep.subr.bf16.mxu0 %v3593_v4  ;;  %v2723_v4 = vld [vmem:[#allocation4 + $0x378] sm:$0xff]  ;;  %v3635_v14 = vpack.c.bf16 %v2718_v29, %v2716_v51  ;;  %v2724_v46 = vld [vmem:[#allocation4 + $0x380] sm:$0xff]  ;;  %v2626_v51 = vld [vmem:[#allocation4 + $0x70] sm:$0xff] }
 0x5ef   : > { %v2222_v1 = vsel %vm370_vm2, %v2214_v58, %v2148_v10  ;;  %v2152_v34 = vpop.permute.xlu1 %2151  ;;  %3596 = vmatpush1.bf16.msra.mxu0 %v3595_v40  ;;  %v3617_v58 = vpack.c.bf16 %v2703_v50, %v2701_v35  ;;  %v2700_v10 = vld [vmem:[#allocation4 + $0x2c0] sm:$0xff]  ;;  %v3637_v39 = vpack.c.bf16 %v2723_v4, %v2721_v38  ;;  %v2722_v40 = vld [vmem:[#allocation4 + $0x370] sm:$0xff]  ;;  %v3643_v9 = vpack.c.bf16 %v2726_v24, %v2724_v46  ;;  %v2629_v38 = vld [vmem:[#allocation4 + $0x88] sm:$0xff] }
 0x5f0   : > { %3476 = vmatmul.mubr.msk.f32.gmra.mrb[28].mxu1 %vm832_vm9, %v2222_v1  ;;  %v2224_v20 = vsel %vm370_vm2, %v2216_v36, %v2152_v34  ;;  %3598 = vmatprep.subr.bf16.mxu0 %v3597_v44  ;;  %v3619_v1 = vpack.c.bf16 %v2702_v42, %v2700_v10  ;;  %v2712_v34 = vld [vmem:[#allocation4 + $0x320] sm:$0xff]  ;;  %v2719_v36 = vld [vmem:[#allocation4 + $0x358] sm:$0xff]  ;;  %v2725_v44 = vld [vmem:[#allocation4 + $0x388] sm:$0xff]  ;;  %v3639_v59 = vpack.c.bf16 %v2722_v40, %v2720_v62 }
 0x5f1   : > { %v2615_v10 = vld [vmem:[#allocation4 + $0x18] sm:$0xff]  ;;  %v2628_v62 = vld [vmem:[#allocation4 + $0x80] sm:$0xff]  ;;  %v2630_v40 = vld [vmem:[#allocation4 + $0x90] sm:$0xff] }
 0x5f2   : > { %v1990_v45 = vpop.permute.xlu0 %1989  ;;  %v2631_v4 = vld [vmem:[#allocation4 + $0x98] sm:$0xff]  ;;  %v2633_v46 = vld [vmem:[#allocation4 + $0xa8] sm:$0xff] }
 0x5f3   : > { %v2183_v33 = vsel %vm763_vm4, %v2175_v32, %v1990_v45  ;;  %3600 = vmatpush1.bf16.msra.mxu0 %v3599_v47  ;;  %v2707_v45 = vld [vmem:[#allocation4 + $0x2f8] sm:$0xff]  ;;  %v3641_v47 = vpack.c.bf16 %v2727_v12, %v2725_v44 }
 0x5f4   : > { %3602 = vmatprep.subr.bf16.mxu0 %v3601_v31  ;;  %v3621_v25 = vpack.c.bf16 %v2707_v45, %v2705_v21  ;;  %v2711_v32 = vld [vmem:[#allocation4 + $0x318] sm:$0xff]  ;;  %v2729_v31 = vld [vmem:[#allocation4 + $0x3a8] sm:$0xff]  ;;  %v2614_v21 = vld [vmem:[#allocation4 + $0x10] sm:$0xff] }
 0x5f5   : > { %v2635_v24 = vld [vmem:[#allocation4 + $0xb8] sm:$0xff] }
 0x5f6   : > { %v2022_v16 = vpop.permute.xlu0 %2021 }
 0x5f7   : > { %v2191_v30 = vsel %vm772_vm5, %v2183_v33, %v2022_v16  ;;  %3604 = vmatpush1.bf16.msra.mxu0 %v3603_v53  ;;  %v2706_v16 = vld [vmem:[#allocation4 + $0x2f0] sm:$0xff]  ;;  %v3645_v53 = vpack.c.bf16 %v2731_v22, %v2729_v31  ;;  %v3549_v31 = vpack.c.bf16 %v2635_v24, %v2633_v46  ;;  %v2632_v22 = vld [vmem:[#allocation4 + $0xa0] sm:$0xff] }
 0x5f8   : > { %3606 = vmatprep.subr.bf16.mxu0 %v3605_v55  ;;  %v3623_v28 = vpack.c.bf16 %v2706_v16, %v2704_v15  ;;  %v2710_v33 = vld [vmem:[#allocation4 + $0x310] sm:$0xff]  ;;  %v2733_v55 = vld [vmem:[#allocation4 + $0x3c8] sm:$0xff]  ;;  %v2619_v15 = vld [vmem:[#allocation4 + $0x38] sm:$0xff] }
 0x5f9   : > { %v3627_v17 = vpack.c.bf16 %v2710_v33, %v2708_v2  ;;  %v2616_v16 = vld [vmem:[#allocation4 + $0x20] sm:$0xff]  ;;  %v2623_v2 = vld [vmem:[#allocation4 + $0x58] sm:$0xff] }
 0x5fa   : > { %v2054_v7 = vpop.permute.xlu0 %2053 }
 0x5fb   : > { %v2199_v3 = vsel %vm781_vm6, %v2191_v30, %v2054_v7  ;;  %3608 = vmatpush1.bf16.msra.mxu0 %v3607_v61  ;;  %v3625_v30 = vpack.c.bf16 %v2711_v32, %v2709_v26  ;;  %v2713_v7 = vld [vmem:[#allocation4 + $0x328] sm:$0xff]  ;;  %v3649_v61 = vpack.c.bf16 %v2735_v54, %v2733_v55  ;;  %v3553_v55 = vpack.c.bf16 %v2639_v49, %v2637_v27  ;;  %v2636_v54 = vld [vmem:[#allocation4 + $0xc0] sm:$0xff] }
 0x5fc   : > { %v2207_v23 = vsel %vm790_vm7, %v2199_v3, %v2086_v11  ;;  %3610 = vmatprep.subr.bf16.mxu0 %v3609_v41  ;;  %v2697_v11 = vld [vmem:[#allocation4 + $0x2a8] sm:$0xff]  ;;  %v2715_v3 = vld [vmem:[#allocation4 + $0x338] sm:$0xff]  ;;  %v3651_v41 = vpack.c.bf16 %v2734_v13, %v2732_v63 }
 0x5fd   : > { %v2215_v52 = vsel %vm799_vm8, %v2207_v23, %v2118_v18  ;;  %v3613_v56 = vpack.c.bf16 %v2699_v37, %v2697_v11  ;;  %v2698_v18 = vld [vmem:[#allocation4 + $0x2b0] sm:$0xff]  ;;  %v3629_v23 = vpack.c.bf16 %v2715_v3, %v2713_v7  ;;  %v2736_v37 = vld [vmem:[#allocation4 + $0x3e0] sm:$0xff]  ;;  %v2621_v32 = vld [vmem:[#allocation4 + $0x48] sm:$0xff] }
 0x5fe   : > { %v2150_v19 = vpop.permute.xlu0 %2149  ;;  %v3615_v8 = vpack.c.bf16 %v2698_v18, %v2696_v6  ;;  %v2620_v7 = vld [vmem:[#allocation4 + $0x40] sm:$0xff]  ;;  %v2622_v3 = vld [vmem:[#allocation4 + $0x50] sm:$0xff]  ;;  %v2641_v63 = vld [vmem:[#allocation4 + $0xe8] sm:$0xff] }
 0x5ff   : > { %v2223_v5 = vsel %vm370_vm2, %v2215_v52, %v2150_v19  ;;  %3612 = vmatpush1.bf16.msra.mxu0 %v3611_v43  ;;  %v2714_v52 = vld [vmem:[#allocation4 + $0x330] sm:$0xff]  ;;  %v2717_v19 = vld [vmem:[#allocation4 + $0x348] sm:$0xff]  ;;  %v2739_v43 = vld [vmem:[#allocation4 + $0x3f8] sm:$0xff] }
 0x600   : > { %3478 = vmatprep.mubr.msk.f32.mxu1 %vm832_vm9, %v2223_v5  ;;  %3614 = vmatprep.subr.bf16.mxu0 %v3613_v56  ;;  %v3631_v5 = vpack.c.bf16 %v2714_v52, %v2712_v34  ;;  %v3653_v11 = vpack.c.bf16 %v2739_v43, %v2737_v48  ;;  %v2738_v56 = vld [vmem:[#allocation4 + $0x3f0] sm:$0xff]  ;;  %v2643_v13 = vld [vmem:[#allocation4 + $0xf8] sm:$0xff]  ;;  %v2640_v43 = vld [vmem:[#allocation4 + $0xe0] sm:$0xff] }
 0x601   : > { %3479 = vmatmul.mubr.msk.f32.gmra.mrb[30].mxu1 %vm832_vm9, %v2224_v20  ;;  %v3633_v20 = vpack.c.bf16 %v2719_v36, %v2717_v19  ;;  %v3655_v18 = vpack.c.bf16 %v2738_v56, %v2736_v37  ;;  %v3539_v19 = vpack.c.bf16 %v2622_v3, %v2620_v7  ;;  %v3557_v48 = vpack.c.bf16 %v2643_v13, %v2641_v63  ;;  %v2652_v7 = vld [vmem:[#allocation4 + $0x140] sm:$0xff]  ;;  %v2654_v3 = vld [vmem:[#allocation4 + $0x150] sm:$0xff]  ;;  %v2665_v49 = vld [vmem:[#allocation4 + $0x1a8] sm:$0xff] }
 0x602   : > { %v2669_v13 = vld [vmem:[#allocation4 + $0x1c8] sm:$0xff] }
 0x603   : > { %3616 = vmatpush1.bf16.msra.mxu0 %v3615_v8 }
 0x604   : > { %3618 = vmatprep.subr.bf16.mxu0 %v3617_v58  ;;  %v2613_v58 = vld [vmem:[#allocation4 + $0x8] sm:$0xff] }
 0x605   : > { %v3529_v42 = vpack.c.bf16 %v2615_v10, %v2613_v58 }
 0x607   : > { %3620 = vmatpush1.bf16.msra.mxu0 %v3619_v1  ;;  %v2612_v1 = vld [vmem:[#allocation4] sm:$0xff]  ;;  %3530 = vmatprep.subr.bf16.mxu1 %v3529_v42 }
 0x608   : > { %3622 = vmatprep.subr.bf16.mxu0 %v3621_v25  ;;  %v3531_v45 = vpack.c.bf16 %v2614_v21, %v2612_v1  ;;  %v2617_v25 = vld [vmem:[#allocation4 + $0x28] sm:$0xff]  ;;  %v2644_v42 = vld [vmem:[#allocation4 + $0x100] sm:$0xff]  ;;  %v2646_v1 = vld [vmem:[#allocation4 + $0x110] sm:$0xff] }
 0x609   : > { %v3533_v26 = vpack.c.bf16 %v2619_v15, %v2617_v25  ;;  %v2649_v21 = vld [vmem:[#allocation4 + $0x128] sm:$0xff]  ;;  %v3563_v25 = vpack.c.bf16 %v2646_v1, %v2644_v42  ;;  %v2675_v1 = vld [vmem:[#allocation4 + $0x1f8] sm:$0xff] }
 0x60a   : > { %3532 = vmatpush1.bf16.msra.mxu1 %v3531_v45  ;;  %v2651_v45 = vld [vmem:[#allocation4 + $0x138] sm:$0xff]  ;;  %v2673_v42 = vld [vmem:[#allocation4 + $0x1e8] sm:$0xff] }
 0x60b   : > { %3624 = vmatpush1.bf16.msra.mxu0 %v3623_v28  ;;  %v2618_v28 = vld [vmem:[#allocation4 + $0x30] sm:$0xff]  ;;  %3534 = vmatprep.subr.bf16.mxu1 %v3533_v26  ;;  %v3565_v15 = vpack.c.bf16 %v2651_v45, %v2649_v21  ;;  %v3589_v21 = vpack.c.bf16 %v2675_v1, %v2673_v42  ;;  %v2672_v45 = vld [vmem:[#allocation4 + $0x1e0] sm:$0xff]  ;;  %v2755_v42 = vld [vmem:[#allocation4 + $0x478] sm:$0xff] }
 0x60c   : > { %3626 = vmatprep.subr.bf16.mxu0 %v3625_v30  ;;  %v3535_v33 = vpack.c.bf16 %v2618_v28, %v2616_v16  ;;  %v3537_v30 = vpack.c.bf16 %v2623_v2, %v2621_v32  ;;  %v2648_v16 = vld [vmem:[#allocation4 + $0x120] sm:$0xff]  ;;  %v2650_v26 = vld [vmem:[#allocation4 + $0x130] sm:$0xff]  ;;  %v2653_v32 = vld [vmem:[#allocation4 + $0x148] sm:$0xff] }
 0x60d   : > { %v3567_v28 = vpack.c.bf16 %v2650_v26, %v2648_v16  ;;  %v2655_v2 = vld [vmem:[#allocation4 + $0x158] sm:$0xff] }
 0x60e   : > { %3536 = vmatpush1.bf16.msra.mxu1 %v3535_v33 }
 0x60f   : > { %3628 = vmatpush1.bf16.msra.mxu0 %v3627_v17  ;;  %v2625_v17 = vld [vmem:[#allocation4 + $0x68] sm:$0xff]  ;;  %3538 = vmatprep.subr.bf16.mxu1 %v3537_v30  ;;  %v3569_v30 = vpack.c.bf16 %v2655_v2, %v2653_v32 }
 0x610   : > { %3630 = vmatprep.subr.bf16.mxu0 %v3629_v23  ;;  %v2627_v23 = vld [vmem:[#allocation4 + $0x78] sm:$0xff] }
 0x612   : > { %3540 = vmatpush1.bf16.msra.mxu1 %v3539_v19  ;;  %v2741_v19 = vld [vmem:[#allocation4 + $0x408] sm:$0xff] }
 0x613   : > { %3632 = vmatpush1.bf16.msra.mxu0 %v3631_v5  ;;  %v3541_v5 = vpack.c.bf16 %v2627_v23, %v2625_v17 }
 0x614   : > { %3634 = vmatprep.subr.bf16.mxu0 %v3633_v20  ;;  %v2624_v20 = vld [vmem:[#allocation4 + $0x60] sm:$0xff] }
 0x615   : > { %v3543_v29 = vpack.c.bf16 %v2626_v51, %v2624_v20  ;;  %3542 = vmatprep.subr.bf16.mxu1 %v3541_v5  ;;  %v3571_v5 = vpack.c.bf16 %v2654_v3, %v2652_v7  ;;  %v2443_v7 = vld [vmem:[#allocation3 + $0x91] sm:$0xff] }
 0x617   : > { %3636 = vmatpush1.bf16.msra.mxu0 %v3635_v14  ;;  %3544 = vmatpush1.bf16.msra.mxu1 %v3543_v29  ;;  %v2657_v29 = vld [vmem:[#allocation4 + $0x168] sm:$0xff] }
 0x618   : > { %3638 = vmatprep.subr.bf16.mxu0 %v3637_v39  ;;  %v3545_v39 = vpack.c.bf16 %v2631_v4, %v2629_v38  ;;  %v2659_v38 = vld [vmem:[#allocation4 + $0x178] sm:$0xff] }
 0x619   : > { %v3573_v4 = vpack.c.bf16 %v2659_v38, %v2657_v29 }
 0x61a   : > { %3546 = vmatprep.subr.bf16.mxu1 %v3545_v39  ;;  %v2658_v39 = vld [vmem:[#allocation4 + $0x170] sm:$0xff] }
 0x61b   : > { %3640 = vmatpush1.bf16.msra.mxu0 %v3639_v59  ;;  %v3547_v59 = vpack.c.bf16 %v2630_v40, %v2628_v62  ;;  %v2661_v40 = vld [vmem:[#allocation4 + $0x188] sm:$0xff] }
 0x61c   : > { %3642 = vmatprep.subr.bf16.mxu0 %v3641_v47 }
 0x61d   : > { %3548 = vmatpush1.bf16.msra.mxu1 %v3547_v59  ;;  %v2660_v59 = vld [vmem:[#allocation4 + $0x180] sm:$0xff] }
 0x61e   : > { %3550 = vmatprep.subr.bf16.mxu1 %v3549_v31 }
 0x61f   : > { %3644 = vmatpush1.bf16.msra.mxu0 %v3643_v9  ;;  %v2634_v9 = vld [vmem:[#allocation4 + $0xb0] sm:$0xff] }
 0x620   : > { %3646 = vmatprep.subr.bf16.mxu0 %v3645_v53  ;;  %v3551_v53 = vpack.c.bf16 %v2634_v9, %v2632_v22 }
 0x622   : > { %3552 = vmatpush1.bf16.msra.mxu1 %v3551_v53 }
 0x623   : > { %3648 = vmatpush1.bf16.msra.mxu0 %v3647_v60  ;;  %v2638_v60 = vld [vmem:[#allocation4 + $0xd0] sm:$0xff]  ;;  %3554 = vmatprep.subr.bf16.mxu1 %v3553_v55  ;;  %v2667_v55 = vld [vmem:[#allocation4 + $0x1b8] sm:$0xff] }
 0x624   : > { %3650 = vmatprep.subr.bf16.mxu0 %v3649_v61  ;;  %v3555_v61 = vpack.c.bf16 %v2638_v60, %v2636_v54  ;;  %v3581_v54 = vpack.c.bf16 %v2667_v55, %v2665_v49  ;;  %v2664_v60 = vld [vmem:[#allocation4 + $0x1a0] sm:$0xff]  ;;  %v2747_v49 = vld [vmem:[#allocation4 + $0x438] sm:$0xff] }
 0x626   : > { %3556 = vmatpush1.bf16.msra.mxu1 %v3555_v61  ;;  %v2666_v61 = vld [vmem:[#allocation4 + $0x1b0] sm:$0xff] }
 0x627   : > { %3652 = vmatpush1.bf16.msra.mxu0 %v3651_v41  ;;  %3558 = vmatprep.subr.bf16.mxu1 %v3557_v48  ;;  %v3583_v63 = vpack.c.bf16 %v2666_v61, %v2664_v60  ;;  %v2671_v48 = vld [vmem:[#allocation4 + $0x1d8] sm:$0xff] }
 0x628   : > { %3654 = vmatprep.subr.bf16.mxu0 %v3653_v11 }
 0x62b   : > { %3656 = vmatpush1.bf16.msra.mxu0 %v3655_v18 }
 0x697   : > { %v3471_v6 = vpop.f32.mrb[24].mxu1 }
 0x698   : > { %v2337_v8 = vadd.f32 %v3471_v6, %v4830_v57  ;;  %v2331_v35 = vpop.f32.mrb[25].mxu1 }
 0x699   : > { %v2332_v50 = vadd.f32 %v4830_v57, %v2331_v35  ;;  %v2645_v35 = vld [vmem:[#allocation4 + $0x108] sm:$0xff] }
 0x69a   : > { %2372 = vst.msk [vmem:[#allocation3 + $0x21] sm:$0xff] %vm370_vm2, %v2337_v8  ;;  %v2642_v8 = vld [vmem:[#allocation4 + $0xf0] sm:$0xff] }
 0x69b   : > { %2371 = vst.msk [vmem:[#allocation3 + $0x11] sm:$0xff] %vm370_vm2, %v2332_v50  ;;  %v2647_v50 = vld [vmem:[#allocation4 + $0x118] sm:$0xff]  ;;  %v3559_v58 = vpack.c.bf16 %v2642_v8, %v2640_v43  ;;  %v3585_v43 = vpack.c.bf16 %v2671_v48, %v2669_v13  ;;  %v2744_v48 = vld [vmem:[#allocation4 + $0x420] sm:$0xff] }
 0x69c   : > { %v3561_v10 = vpack.c.bf16 %v2647_v50, %v2645_v35 }
 0x69d   : > { %3560 = vmatpush1.bf16.msra.mxu1 %v3559_v58 }
 0x69e   : > { %3562 = vmatprep.subr.bf16.mxu1 %v3561_v10 }
 0x6a1   : > { %v4836_v34 = vld [vmem:[#allocation3 + $0x21] sm:$0xff]  ;;  %3564 = vmatpush1.bf16.msra.mxu1 %v3563_v25  ;;  %v2674_v25 = vld [vmem:[#allocation4 + $0x1f0] sm:$0xff] }
 0x6a2   : > { %v4838_v52 = vld [vmem:[#allocation3 + $0x12] sm:$0xff]  ;;  %v4849_v11 = vld [vmem:[#allocation3 + $0x22] sm:$0xff]  ;;  %3566 = vmatprep.subr.bf16.mxu1 %v3565_v15  ;;  %v3591_v15 = vpack.c.bf16 %v2674_v25, %v2672_v45 }
 0x6a3   : > { %v3751_v36 = vpack.i.bf16 %v4838_v52, %v4836_v34  ;;  %v4897_v3 = vld [vmem:[#allocation3 + $0x10] sm:$0xff]  ;;  %v2752_v45 = vld [vmem:[#allocation4 + $0x460] sm:$0xff] }
 0x6a4   : > { %v2754_v25 = vld [vmem:[#allocation4 + $0x470] sm:$0xff] }
 0x6a5   : > { %3752 = vrot.lane.b32.xlu0 %v3751_v36, %s3882_s23  ;;  %3568 = vmatpush1.bf16.msra.mxu1 %v3567_v28  ;;  %v2743_v36 = vld [vmem:[#allocation4 + $0x418] sm:$0xff] }
 0x6a6   : > { %v3657_v51 = vpack.c.bf16 %v2743_v36, %v2741_v19  ;;  %3570 = vmatprep.subr.bf16.mxu1 %v3569_v30  ;;  %v2388_v36 = vld [vmem:[#allocation3 + $0x11] sm:$0xff] }
 0x6a8   : > { %3658 = vmatprep.subr.bf16.mxu0 %v3657_v51 }
 0x6a9   : > { %3572 = vmatpush1.bf16.msra.mxu1 %v3571_v5  ;;  %v4905_v5 = vld [vmem:[#allocation3 + $0x20] sm:$0xff] }
 0x6aa   : > { %3574 = vmatprep.subr.bf16.mxu1 %v3573_v4  ;;  %v3796_v51 = vpack.i.bf16 %v2388_v36, %v4905_v5 }
 0x6ab   : > { %v3474_v14 = vpop.f32.mrb[26].mxu1 }
 0x6ac   : > { %v2347_v44 = vadd.f32 %v3474_v14, %v4830_v57  ;;  %v2341_v12 = vpop.f32.mrb[27].mxu1  ;;  %v2656_v14 = vld [vmem:[#allocation4 + $0x160] sm:$0xff] }
 0x6ad   : > { %v2342_v47 = vadd.f32 %v4830_v57, %v2341_v12  ;;  %v3575_v62 = vpack.c.bf16 %v2658_v39, %v2656_v14 }
 0x6ae   : > { %2374 = vst.msk [vmem:[#allocation3 + $0x41] sm:$0xff] %vm370_vm2, %v2347_v44  ;;  %v2663_v44 = vld [vmem:[#allocation4 + $0x198] sm:$0xff] }
 0x6af   : > { %2373 = vst.msk [vmem:[#allocation3 + $0x31] sm:$0xff] %vm370_vm2, %v2342_v47  ;;  %3576 = vmatpush1.bf16.msra.mxu1 %v3575_v62  ;;  %v3577_v12 = vpack.c.bf16 %v2663_v44, %v2661_v40  ;;  %v2662_v47 = vld [vmem:[#allocation4 + $0x190] sm:$0xff] }
 0x6b0   : > { %v3579_v46 = vpack.c.bf16 %v2662_v47, %v2660_v59  ;;  %v2740_v47 = vld [vmem:[#allocation4 + $0x400] sm:$0xff] }
 0x6b1   : > { %3578 = vmatprep.subr.bf16.mxu1 %v3577_v12 }
 0x6b3   : > { %3580 = vmatpush1.bf16.msra.mxu1 %v3579_v46  ;;  %v2742_v46 = vld [vmem:[#allocation4 + $0x410] sm:$0xff] }
 0x6b4   : > { %3582 = vmatprep.subr.bf16.mxu1 %v3581_v54  ;;  %v3659_v60 = vpack.c.bf16 %v2742_v46, %v2740_v47 }
 0x6b5   : > { %v4847_v41 = vld [vmem:[#allocation3 + $0x41] sm:$0xff] }
 0x6b6   : > { %v4851_v37 = vld [vmem:[#allocation3 + $0x31] sm:$0xff]  ;;  %v4867_v31 = vld [vmem:[#allocation3 + $0x42] sm:$0xff] }
 0x6b7   : > { %v4853_v56 = vld [vmem:[#allocation3 + $0x32] sm:$0xff]  ;;  %v3756_v6 = vpack.i.bf16 %v4849_v11, %v4851_v37  ;;  %3584 = vmatpush1.bf16.msra.mxu1 %v3583_v63  ;;  %v4914_v38 = vld [vmem:[#allocation3 + $0x40] sm:$0xff] }
 0x6b8   : > { %v3761_v18 = vpack.i.bf16 %v4853_v56, %v4847_v41  ;;  %3586 = vmatprep.subr.bf16.mxu1 %v3585_v43  ;;  %v4903_v19 = vld [vmem:[#allocation3 + $0x30] sm:$0xff]  ;;  %v3806_v14 = vpack.i.bf16 %v4851_v37, %v4914_v38 }
 0x6b9   : > { %3757 = vrot.lane.b32.xlu1 %v3756_v6, %s3882_s23  ;;  %v2668_v6 = vld [vmem:[#allocation4 + $0x1c0] sm:$0xff]  ;;  %v2746_v43 = vld [vmem:[#allocation4 + $0x430] sm:$0xff] }
 0x6ba   : > { %3762 = vrot.lane.b32.xlu0 %v3761_v18, %s3882_s23  ;;  %v2670_v18 = vld [vmem:[#allocation4 + $0x1d0] sm:$0xff] }
 0x6bb   : > { %v3587_v35 = vpack.c.bf16 %v2670_v18, %v2668_v6  ;;  %v2749_v6 = vld [vmem:[#allocation4 + $0x448] sm:$0xff]  ;;  %v2751_v18 = vld [vmem:[#allocation4 + $0x458] sm:$0xff] }
 0x6bd   : > { %3588 = vmatpush1.bf16.msra.mxu1 %v3587_v35  ;;  %v3665_v35 = vpack.c.bf16 %v2751_v18, %v2749_v6  ;;  %v2395_v6 = vld [vmem:[#allocation3 + $0x2] sm:$0xff] }
 0x6be   : > { %3590 = vmatprep.subr.bf16.mxu1 %v3589_v21  ;;  %v2379_v18 = vld [vmem:[#allocation3] sm:$0xff] }
 0x6c1   : > { %3592 = vmatpush1.bf16.msra.mxu1 %v3591_v15  ;;  %v3671_v15 = vpack.c.bf16 %v2754_v25, %v2752_v45 }
 0x6c3   : > { %v3477_v33 = vpop.f32.mrb[28].mxu1 }
 0x6c4   : > { %v2357_v17 = vadd.f32 %v3477_v33, %v4830_v57  ;;  %v2351_v23 = vpop.f32.mrb[29].mxu1  ;;  %v2387_v33 = vld [vmem:[#allocation3 + $0x1] sm:$0xff] }
 0x6c5   : > { %v2352_v20 = vadd.f32 %v4830_v57, %v2351_v23  ;;  %v3791_v23 = vpack.i.bf16 %v2387_v33, %v4897_v3 }
 0x6c6   : > { %2376 = vst.msk [vmem:[#allocation3 + $0x61] sm:$0xff] %vm370_vm2, %v2357_v17 }
 0x6c7   : > { %2375 = vst.msk [vmem:[#allocation3 + $0x51] sm:$0xff] %vm370_vm2, %v2352_v20  ;;  %v3801_v20 = vpack.i.bf16 %v4836_v34, %v4903_v19 }
 0x6cd   : > { %v4865_v24 = vld [vmem:[#allocation3 + $0x61] sm:$0xff] }
 0x6ce   : > { %v4869_v22 = vld [vmem:[#allocation3 + $0x51] sm:$0xff]  ;;  %v4885_v26 = vld [vmem:[#allocation3 + $0x62] sm:$0xff] }
 0x6cf   : > { %v4871_v9 = vld [vmem:[#allocation3 + $0x52] sm:$0xff]  ;;  %v3766_v53 = vpack.i.bf16 %v4867_v31, %v4869_v22  ;;  %v4924_v62 = vld [vmem:[#allocation3 + $0x60] sm:$0xff] }
 0x6d0   : > { %v3771_v27 = vpack.i.bf16 %v4871_v9, %v4865_v24  ;;  %v4912_v29 = vld [vmem:[#allocation3 + $0x50] sm:$0xff]  ;;  %v3816_v44 = vpack.i.bf16 %v4869_v22, %v4924_v62 }
 0x6d1   : > { %3767 = vrot.lane.b32.xlu1 %v3766_v53, %s3882_s23  ;;  %v3811_v4 = vpack.i.bf16 %v4847_v41, %v4912_v29 }
 0x6d2   : > { %3772 = vrot.lane.b32.xlu0 %v3771_v27, %s3882_s23  ;;  %v2745_v27 = vld [vmem:[#allocation4 + $0x428] sm:$0xff] }
 0x6d3   : > { %v3661_v13 = vpack.c.bf16 %v2747_v49, %v2745_v27 }
 0x6d4   : > { %v3480_v8 = vpop.f32.mrb[30].mxu1 }
 0x6d5   : > { %v2367_v50 = vadd.f32 %v3480_v8, %v4830_v57  ;;  %v2361_v58 = vpop.f32.mrb[31].mxu1  ;;  %v3663_v8 = vpack.c.bf16 %v2746_v43, %v2744_v48 }
 0x6d6   : > { %v2362_v10 = vadd.f32 %v4830_v57, %v2361_v58  ;;  %v2750_v58 = vld [vmem:[#allocation4 + $0x450] sm:$0xff] }
 0x6d7   : > { %2378 = vst.msk [vmem:[#allocation3 + $0x81] sm:$0xff] %vm370_vm2, %v2367_v50  ;;  %v2748_v50 = vld [vmem:[#allocation4 + $0x440] sm:$0xff] }
 0x6d8   : > { %2377 = vst.msk [vmem:[#allocation3 + $0x71] sm:$0xff] %vm370_vm2, %v2362_v10  ;;  %v2753_v10 = vld [vmem:[#allocation4 + $0x468] sm:$0xff]  ;;  %v3667_v1 = vpack.c.bf16 %v2750_v58, %v2748_v50  ;;  %v2435_v58 = vld [vmem:[#allocation3 + $0x90] sm:$0xff] }
 0x6d9   : > { %v3669_v21 = vpack.c.bf16 %v2755_v42, %v2753_v10 }
 0x6de   : > { %v4883_v16 = vld [vmem:[#allocation3 + $0x81] sm:$0xff] }
 0x6df   : > { %v4887_v28 = vld [vmem:[#allocation3 + $0x71] sm:$0xff]  ;;  %v4895_v30 = vld [vmem:[#allocation3 + $0x82] sm:$0xff] }
 0x6e0   : > { %v4889_v57 = vld [vmem:[#allocation3 + $0x72] sm:$0xff]  ;;  %v3776_v32 = vpack.i.bf16 %v4885_v26, %v4887_v28  ;;  %v3786_v17 = vpack.i.bf16 %v4895_v30, %v2443_v7  ;;  %v4932_v12 = vld [vmem:[#allocation3 + $0x80] sm:$0xff] }
 0x6e1   : > { %v3781_v2 = vpack.i.bf16 %v4889_v57, %v4883_v16  ;;  %v4922_v39 = vld [vmem:[#allocation3 + $0x70] sm:$0xff]  ;;  %v3826_v59 = vpack.i.bf16 %v4887_v28, %v4932_v12 }
 0x6e2   : > { %3777 = vrot.lane.b32.xlu1 %v3776_v32, %s3882_s23  ;;  %v3821_v40 = vpack.i.bf16 %v4865_v24, %v4922_v39 }
 0x6e3   : > { %3782 = vrot.lane.b32.xlu0 %v3781_v2, %s3882_s23 }
 0x6e6   : > { %3787 = vrot.lane.b32.xlu1 %v3786_v17, %s3882_s23 }
 0x6e7   : > { %3792 = vrot.lane.b32.xlu0 %v3791_v23, %s3882_s23 }
 0x6ea   : > { %3797 = vrot.lane.b32.xlu1 %v3796_v51, %s3882_s23 }
 0x6eb   : > { %3802 = vrot.lane.b32.xlu0 %v3801_v20, %s3882_s23 }
 0x6ee   : > { %3807 = vrot.lane.b32.xlu1 %v3806_v14, %s3882_s23 }
 0x6ef   : > { %3812 = vrot.lane.b32.xlu0 %v3811_v4, %s3882_s23 }
 0x6f2   : > { %3817 = vrot.lane.b32.xlu1 %v3816_v44, %s3882_s23 }
 0x6f3   : > { %3822 = vrot.lane.b32.xlu0 %v3821_v40, %s3882_s23 }
 0x6f6   : > { %3827 = vrot.lane.b32.xlu1 %v3826_v59, %s3882_s23  ;;  %s5034_s23 = scalar_lea.vmem %s5079_s9, %s3293_s20 }
 0x717   : > { %v3753_v53 = vpop.permute.xlu0 %3752 }
 0x718   : > { %v3755_v55 = vunpack.i.h.bf16 %v3753_v53  ;;  %v3754_v54 = vunpack.i.l.bf16 %v3753_v53 }
 0x71a   : > { %v2604_v61 = vsel %vm370_vm2, %v4905_v5, %v3754_v54  ;;  %v2596_v63 = vsel %vm370_vm2, %v2388_v36, %v3755_v55 }
 0x71b   : > { %2969 = vmatprep.mubr.f32.mxu0 %v2604_v61 }
 0x71c   : > { %2970 = vmatmul.mubr.f32.vlgmr.msra.gmra.mrb[8].mxu0 %v2596_v63 }
 0x71d   : > { %3660 = vmatpush1.bf16.msra.mxu0 %v3659_v60 }
 0x71e   : > { %3662 = vmatprep.subr.bf16.mxu0 %v3661_v13 }
 0x721   : > { %3664 = vmatpush1.bf16.msra.mxu0 %v3663_v8 }
 0x722   : > { %3666 = vmatprep.subr.bf16.mxu0 %v3665_v35 }
 0x725   : > { %3668 = vmatpush1.bf16.msra.mxu0 %v3667_v1 }
 0x726   : > { %3670 = vmatprep.subr.bf16.mxu0 %v3669_v21 }
 0x729   : > { %3672 = vmatpush1.bf16.msra.mxu0 %v3671_v15 }
 0x72b   : > { %v3758_v32 = vpop.permute.xlu1 %3757 }
 0x72c   : > { %v3763_v2 = vpop.permute.xlu0 %3762  ;;  %v3760_v33 = vunpack.i.h.bf16 %v3758_v32  ;;  %v3759_v7 = vunpack.i.l.bf16 %v3758_v32 }
 0x72d   : > { %v3764_v17 = vunpack.i.l.bf16 %v3763_v2  ;;  %v3765_v20 = vunpack.i.h.bf16 %v3763_v2 }
 0x72e   : > { %v2605_v23 = vsel %vm370_vm2, %v4903_v19, %v3759_v7  ;;  %v2597_v36 = vsel %vm370_vm2, %v4836_v34, %v3760_v33 }
 0x72f   : > { %2975 = vmatprep.mubr.f32.mxu0 %v2605_v23  ;;  %v2606_v51 = vsel %vm370_vm2, %v4914_v38, %v3764_v17  ;;  %v2598_v4 = vsel %vm370_vm2, %v4851_v37, %v3765_v20 }
 0x730   : > { %2976 = vmatmul.mubr.f32.gmra.mrb[10].mxu0 %v2597_v36 }
 0x731   : > { %2981 = vmatprep.mubr.f32.mxu0 %v2606_v51 }
 0x734   : > { %2982 = vmatmul.mubr.f32.gmra.mrb[12].mxu0 %v2598_v4 }
 0x743   : > { %v3768_v14 = vpop.permute.xlu1 %3767 }
 0x744   : > { %v3773_v40 = vpop.permute.xlu0 %3772  ;;  %v3770_v44 = vunpack.i.h.bf16 %v3768_v14  ;;  %v3769_v59 = vunpack.i.l.bf16 %v3768_v14 }
 0x745   : > { %v3774_v47 = vunpack.i.l.bf16 %v3773_v40  ;;  %v3775_v53 = vunpack.i.h.bf16 %v3773_v40 }
 0x746   : > { %v2607_v46 = vsel %vm370_vm2, %v4912_v29, %v3769_v59  ;;  %v2599_v34 = vsel %vm370_vm2, %v4847_v41, %v3770_v44 }
 0x747   : > { %2987 = vmatprep.mubr.f32.mxu0 %v2607_v46  ;;  %v2608_v27 = vsel %vm370_vm2, %v4924_v62, %v3774_v47  ;;  %v2600_v37 = vsel %vm370_vm2, %v4869_v22, %v3775_v53 }
 0x748   : > { %2988 = vmatmul.mubr.f32.gmra.mrb[14].mxu0 %v2599_v34 }
 0x749   : > { %2993 = vmatprep.mubr.f32.mxu0 %v2608_v27 }
 0x74c   : > { %2994 = vmatmul.mubr.f32.gmra.mrb[16].mxu0 %v2600_v37 }
 0x754   : > { %v3778_v49 = vpop.permute.xlu1 %3777 }
 0x755   : > { %v3783_v55 = vpop.permute.xlu0 %3782  ;;  %v3780_v54 = vunpack.i.h.bf16 %v3778_v49  ;;  %v3779_v60 = vunpack.i.l.bf16 %v3778_v49 }
 0x756   : > { %v3784_v61 = vunpack.i.l.bf16 %v3783_v55  ;;  %v3785_v13 = vunpack.i.h.bf16 %v3783_v55 }
 0x757   : > { %v2609_v63 = vsel %vm370_vm2, %v4922_v39, %v3779_v60  ;;  %v2601_v41 = vsel %vm370_vm2, %v4865_v24, %v3780_v54 }
 0x758   : > { %v3788_v48 = vpop.permute.xlu1 %3787  ;;  %2999 = vmatprep.mubr.f32.mxu0 %v2609_v63  ;;  %v2610_v50 = vsel %vm370_vm2, %v4932_v12, %v3784_v61  ;;  %v2602_v45 = vsel %vm370_vm2, %v4887_v28, %v3785_v13 }
 0x759   : > { %v3793_v43 = vpop.permute.xlu0 %3792  ;;  %v3789_v8 = vunpack.i.l.bf16 %v3788_v48  ;;  %3000 = vmatmul.mubr.f32.gmra.mrb[18].mxu0 %v2601_v41  ;;  %v3790_v24 = vunpack.i.h.bf16 %v3788_v48 }
 0x75a   : > { %v3795_v22 = vunpack.i.h.bf16 %v3793_v43  ;;  %v3794_v35 = vunpack.i.l.bf16 %v3793_v43  ;;  %3005 = vmatprep.mubr.f32.mxu0 %v2610_v50 }
 0x75b   : > { %v2611_v12 = vsel %vm370_vm2, %v2435_v58, %v3789_v8  ;;  %v2603_v28 = vsel %vm370_vm2, %v4883_v16, %v3790_v24 }
 0x75c   : > { %v2588_v10 = vsel %vm370_vm2, %v2395_v6, %v3794_v35  ;;  %v2580_v42 = vsel %vm370_vm2, %v2379_v18, %v3795_v22  ;;  %v3798_v21 = vpop.permute.xlu1 %3797 }
 0x75d   : > { %v3803_v1 = vpop.permute.xlu0 %3802  ;;  %2856 = vmatprep.mubr.f32.mxu1 %v2588_v10  ;;  %v3800_v15 = vunpack.i.h.bf16 %v3798_v21  ;;  %v3799_v32 = vunpack.i.l.bf16 %v3798_v21  ;;  %3006 = vmatmul.mubr.f32.gmra.mrb[20].mxu0 %v2602_v45 }
 0x75e   : > { %v3804_v25 = vunpack.i.l.bf16 %v3803_v1  ;;  %2857 = vmatmul.mubr.f32.vlgmr.msra.gmra.mrb[32].mxu1 %v2580_v42  ;;  %3011 = vmatprep.mubr.f32.mxu0 %v2611_v12  ;;  %v3805_v7 = vunpack.i.h.bf16 %v3803_v1 }
 0x75f   : > { %v2589_v2 = vsel %vm370_vm2, %v4838_v52, %v3799_v32  ;;  %v2581_v33 = vsel %vm370_vm2, %v4897_v3, %v3800_v15 }
 0x760   : > { %v3808_v17 = vpop.permute.xlu1 %3807  ;;  %2862 = vmatprep.mubr.f32.mxu1 %v2589_v2  ;;  %v2590_v36 = vsel %vm370_vm2, %v4849_v11, %v3804_v25  ;;  %v2582_v3 = vsel %vm370_vm2, %v4905_v5, %v3805_v7 }
 0x761   : > { %v3809_v23 = vunpack.i.l.bf16 %v3808_v17  ;;  %3012 = vmatmul.mubr.f32.gmra.mrb[22].mxu0 %v2603_v28  ;;  %v3813_v20 = vpop.permute.xlu0 %3812  ;;  %v3810_v52 = vunpack.i.h.bf16 %v3808_v17 }
 0x762   : > { %2863 = vmatmul.mubr.f32.gmra.mrb[34].mxu1 %v2581_v33  ;;  %3082 = vmatprep.mubr.f32.mxu0 %v3874_v0  ;;  %v3814_v51 = vunpack.i.l.bf16 %v3813_v20  ;;  %v3815_v14 = vunpack.i.h.bf16 %v3813_v20 }
 0x763   : > { %2868 = vmatprep.mubr.f32.mxu1 %v2590_v36  ;;  %v2591_v16 = vsel %vm370_vm2, %v4853_v56, %v3809_v23  ;;  %v2583_v40 = vsel %vm370_vm2, %v4903_v19, %v3810_v52 }
 0x764   : > { %v3818_v4 = vpop.permute.xlu1 %3817  ;;  %v2592_v5 = vsel %vm370_vm2, %v4867_v31, %v3814_v51  ;;  %v2584_v47 = vsel %vm370_vm2, %v4914_v38, %v3815_v14 }
 0x765   : > { %3282 = vmatmul.mubr.msk.f32.vlgmr.msra.gmra.mrb[8].mxu0 %vm370_vm2, %v4849_v11  ;;  %v3819_v44 = vunpack.i.l.bf16 %v3818_v4  ;;  %v3823_v11 = vpop.permute.xlu0 %3822  ;;  %v3820_v59 = vunpack.i.h.bf16 %v3818_v4 }
 0x766   : > { %2869 = vmatmul.mubr.f32.gmra.mrb[36].mxu1 %v2582_v3  ;;  %3088 = vmatprep.mubr.f32.mxu0 %v3874_v0  ;;  %v3824_v46 = vunpack.i.l.bf16 %v3823_v11  ;;  %v3825_v34 = vunpack.i.h.bf16 %v3823_v11 }
 0x767   : > { %2874 = vmatprep.mubr.f32.mxu1 %v2591_v16  ;;  %v2593_v19 = vsel %vm370_vm2, %v4871_v9, %v3819_v44  ;;  %v2585_v53 = vsel %vm370_vm2, %v4912_v29, %v3820_v59 }
 0x768   : > { %v2594_v38 = vsel %vm370_vm2, %v4885_v26, %v3824_v46  ;;  %v2586_v37 = vsel %vm370_vm2, %v4924_v62, %v3825_v34  ;;  %v2758_v62 = vlaneseq }
 0x769   : > { %3283 = vmatmul.mubr.msk.f32.gmra.mrb[10].mxu0 %vm370_vm2, %v4853_v56  ;;  %v3828_v56 = vpop.permute.xlu1 %3827 }
 0x76a   : > { %2875 = vmatmul.mubr.f32.gmra.mrb[38].mxu1 %v2583_v40  ;;  %3094 = vmatprep.mubr.f32.mxu0 %v3874_v0  ;;  %v3829_v27 = vunpack.i.l.bf16 %v3828_v56  ;;  %v2759_v49 = vshrl.u32 %v2758_v62, 7 }
 0x76b   : > { %2880 = vmatprep.mubr.f32.mxu1 %v2592_v5 }
 0x76c   : > { %v2595_v29 = vsel %vm370_vm2, %v4889_v57, %v3829_v27  ;;  %v2760_v55 = vsub.s32 0, %v2759_v49 }
 0x76d   : > { %3284 = vmatmul.mubr.msk.f32.gmra.mrb[12].mxu0 %vm370_vm2, %v4867_v31  ;;  %v3830_v31 = vunpack.i.h.bf16 %v3828_v56 }
 0x76e   : > { %2881 = vmatmul.mubr.f32.gmra.mrb[40].mxu1 %v2584_v47  ;;  %3100 = vmatprep.mubr.f32.mxu0 %v3874_v0 }
 0x76f   : > { %2886 = vmatprep.mubr.f32.mxu1 %v2593_v19 }
 0x771   : > { %3285 = vmatmul.mubr.msk.f32.gmra.mrb[14].mxu0 %vm370_vm2, %v4871_v9  ;;  %v2587_v9 = vsel %vm370_vm2, %v4922_v39, %v3830_v31  ;;  %v2756_v39 = vld [vmem:[%s5078_s8] sm:$0x3] }
 0x772   : > { %2887 = vmatmul.mubr.f32.gmra.mrb[42].mxu1 %v2585_v53  ;;  %3106 = vmatprep.mubr.f32.mxu0 %v3874_v0  ;;  %v5025_v61 = vrot.slane %v2756_v39, %v2760_v55 }
 0x773   : > { %2892 = vmatprep.mubr.f32.mxu1 %v2594_v38 }
 0x775   : > { %3286 = vmatmul.mubr.msk.f32.gmra.mrb[16].mxu0 %vm370_vm2, %v4885_v26  ;;  %v2451_v26 = vld [vmem:[#allocation3 + $0x92] sm:$0xff] }
 0x776   : > { %2893 = vmatmul.mubr.f32.gmra.mrb[44].mxu1 %v2586_v37  ;;  %3112 = vmatprep.mubr.f32.mxu0 %v3874_v0 }
 0x777   : > { %2898 = vmatprep.mubr.f32.mxu1 %v2595_v29 }
 0x779   : > { %3287 = vmatmul.mubr.msk.f32.gmra.mrb[18].mxu0 %vm370_vm2, %v4889_v57  ;;  %v2764_v57 = vsub.s32 1, %v2759_v49 }
 0x77a   : > { %2899 = vmatmul.mubr.f32.gmra.mrb[46].mxu1 %v2587_v9  ;;  %3118 = vmatprep.mubr.f32.mxu0 %v3874_v0 }
 0x77b   : > { %v5027_v63 = vrot.slane %v2756_v39, %v2764_v57 }
 0x77d   : > { %3288 = vmatmul.mubr.msk.f32.gmra.mrb[20].mxu0 %vm370_vm2, %v4895_v30 }
 0x77e   : > { %3124 = vmatprep.mubr.f32.mxu0 %v3874_v0 }
 0x781   : > { %3289 = vmatmul.mubr.msk.f32.gmra.mrb[22].mxu0 %vm370_vm2, %v2451_v26 }
 0x831   : > { %v2858_v54 = vpop.f32.mrb[32].mxu1 }
 0x832   : > { %v2860_v60 = vpop.f32.mrb[33].mxu1  ;;  %v2859_v41 = vadd.f32 %v2858_v54, %v5025_v61 }
 0x833   : > { %v2861_v13 = vadd.f32 %v2860_v60, %v5027_v63 }
 0x835   : > { %v2864_v30 = vpop.f32.mrb[34].mxu1 }
 0x836   : > { %v2866_v0 = vpop.f32.mrb[35].mxu1  ;;  %v2865_v35 = vadd.f32 %v2864_v30, %v5025_v61 }
 0x837   : > { %v2867_v50 = vadd.f32 %v2866_v0, %v5027_v63 }
 0x838   : > { %v3084_v43 = vpop.f32.mrb[8].mxu0 }
 0x839   : > { %v2870_v48 = vpop.f32.mrb[36].mxu1  ;;  %v3674_v6 = vadd.f32 %v3084_v43, %v2859_v41  ;;  %v3086_v8 = vpop.f32.mrb[9].mxu0 }
 0x83a   : > { %v2872_v18 = vpop.f32.mrb[37].mxu1  ;;  %v3676_v22 = vadd.f32 %v3086_v8, %v2861_v13  ;;  %v2871_v45 = vadd.f32 %v2870_v48, %v5025_v61 }
 0x83b   : > { %3131 = vst [vmem:[%s5034_s23] sm:$0xff] %v3674_v6  ;;  %v2873_v25 = vadd.f32 %v2872_v18, %v5027_v63 }
 0x83c   : > { %3132 = vst [vmem:[%s5034_s23 + $0x8] sm:$0xff] %v3676_v22  ;;  %v3090_v10 = vpop.f32.mrb[10].mxu0 }
 0x83d   : > { %v2876_v58 = vpop.f32.mrb[38].mxu1  ;;  %v3678_v42 = vadd.f32 %v3090_v10, %v2865_v35  ;;  %v3092_v1 = vpop.f32.mrb[11].mxu0 }
 0x83e   : > { %v2878_v24 = vpop.f32.mrb[39].mxu1  ;;  %v3680_v21 = vadd.f32 %v3092_v1, %v2867_v50  ;;  %v2877_v17 = vadd.f32 %v2876_v58, %v5025_v61 }
 0x83f   : > { %3133 = vst [vmem:[%s5034_s23 + $0x10] sm:$0xff] %v3678_v42  ;;  %v2879_v28 = vadd.f32 %v2878_v24, %v5027_v63 }
 0x840   : > { %3134 = vst [vmem:[%s5034_s23 + $0x18] sm:$0xff] %v3680_v21  ;;  %v3096_v32 = vpop.f32.mrb[12].mxu0 }
 0x841   : > { %v2882_v15 = vpop.f32.mrb[40].mxu1  ;;  %v3682_v12 = vadd.f32 %v3096_v32, %v2871_v45  ;;  %v3098_v33 = vpop.f32.mrb[13].mxu0 }
 0x842   : > { %v2884_v2 = vpop.f32.mrb[41].mxu1  ;;  %v3684_v7 = vadd.f32 %v3098_v33, %v2873_v25  ;;  %v2883_v16 = vadd.f32 %v2882_v15, %v5025_v61 }
 0x843   : > { %3135 = vst [vmem:[%s5034_s23 + $0x20] sm:$0xff] %v3682_v12  ;;  %v2885_v4 = vadd.f32 %v2884_v2, %v5027_v63 }
 0x844   : > { %3136 = vst [vmem:[%s5034_s23 + $0x28] sm:$0xff] %v3684_v7  ;;  %v3102_v36 = vpop.f32.mrb[14].mxu0 }
 0x845   : > { %v2888_v23 = vpop.f32.mrb[42].mxu1  ;;  %v3686_v20 = vadd.f32 %v3102_v36, %v2877_v17  ;;  %v3104_v3 = vpop.f32.mrb[15].mxu0 }
 0x846   : > { %v2890_v52 = vpop.f32.mrb[43].mxu1  ;;  %v3688_v51 = vadd.f32 %v3104_v3, %v2879_v28  ;;  %v2889_v47 = vadd.f32 %v2888_v23, %v5025_v61 }
 0x847   : > { %3137 = vst [vmem:[%s5034_s23 + $0x30] sm:$0xff] %v3686_v20  ;;  %v2891_v46 = vadd.f32 %v2890_v52, %v5027_v63 }
 0x848   : > { %3138 = vst [vmem:[%s5034_s23 + $0x38] sm:$0xff] %v3688_v51  ;;  %v3108_v40 = vpop.f32.mrb[16].mxu0 }
 0x849   : > { %v2894_v14 = vpop.f32.mrb[44].mxu1  ;;  %v3690_v44 = vadd.f32 %v3108_v40, %v2883_v16  ;;  %v3110_v11 = vpop.f32.mrb[17].mxu0 }
 0x84a   : > { %v2896_v5 = vpop.f32.mrb[45].mxu1  ;;  %v3692_v59 = vadd.f32 %v3110_v11, %v2885_v4  ;;  %v2895_v31 = vadd.f32 %v2894_v14, %v5025_v61 }
 0x84b   : > { %3139 = vst [vmem:[%s5034_s23 + $0x40] sm:$0xff] %v3690_v44  ;;  %v2897_v37 = vadd.f32 %v2896_v5, %v5027_v63 }
 0x84c   : > { %3140 = vst [vmem:[%s5034_s23 + $0x48] sm:$0xff] %v3692_v59  ;;  %v3114_v56 = vpop.f32.mrb[18].mxu0 }
 0x84d   : > { %v2900_v19 = vpop.f32.mrb[46].mxu1  ;;  %v3694_v34 = vadd.f32 %v3114_v56, %v2889_v47  ;;  %v3116_v27 = vpop.f32.mrb[19].mxu0 }
 0x84e   : > { %v2902_v53 = vpop.f32.mrb[47].mxu1  ;;  %v3696_v38 = vadd.f32 %v3116_v27, %v2891_v46  ;;  %v2901_v49 = vadd.f32 %v2900_v19, %v5025_v61 }
 0x84f   : > { %3141 = vst [vmem:[%s5034_s23 + $0x50] sm:$0xff] %v3694_v34  ;;  %v2903_v55 = vadd.f32 %v2902_v53, %v5027_v63 }
 0x850   : > { %3142 = vst [vmem:[%s5034_s23 + $0x58] sm:$0xff] %v3696_v38  ;;  %v3120_v29 = vpop.f32.mrb[20].mxu0 }
 0x851   : > { %v3698_v9 = vadd.f32 %v3120_v29, %v2895_v31  ;;  %v3122_v26 = vpop.f32.mrb[21].mxu0 }
 0x852   : > { %v3700_v62 = vadd.f32 %v3122_v26, %v2897_v37 }
 0x853   : > { %3143 = vst [vmem:[%s5034_s23 + $0x60] sm:$0xff] %v3698_v9 }
 0x854   : > { %3144 = vst [vmem:[%s5034_s23 + $0x68] sm:$0xff] %v3700_v62  ;;  %v3126_v39 = vpop.f32.mrb[22].mxu0 }
 0x855   : > { %v3702_v54 = vadd.f32 %v3126_v39, %v2901_v49  ;;  %v3128_v57 = vpop.f32.mrb[23].mxu0 }
 0x856   : > { %v3704_v60 = vadd.f32 %v3128_v57, %v2903_v55 }
 0x857   : > { %3145 = vst [vmem:[%s5034_s23 + $0x70] sm:$0xff] %v3702_v54 }
 0x858   : > { %3146 = vst [vmem:[%s5034_s23 + $0x78] sm:$0xff] %v3704_v60 }
 0x859 PF: > { %s20_s30 = sadd.s32 1, %s3869_s30  }
 0x85a   : > { %p17_p3 = scmp.ge.s32.totalorder %s20_s30, 4  }
 0x85c   :  { %19 = sbr.rel (!%p17_p3) target bundleno = 1 (0x1), region = 99 }
 0x863   :  { %3168 = vsyncpa [#allocation5], 1 }
 0x864   :  { %3170 = vsyncpa [#allocation5 + $0x1], 1 }

</bundles_post_ra>
